<compile_context>
chip_gen: v5e
topology: v5e:2x2
jax: 0.10.0
libtpu: 0.0.40
codegen_flags: <defaults>
</compile_context>

<pallas_src>
import jax
import jax.numpy as jnp
from jax import lax
from jax.experimental import pallas as pl
from jax.experimental.pallas import tpu as pltpu

# Make reference (XLA) and kernel (Mosaic) matmuls both full-f32.
jax.config.update("jax_default_matmul_precision", "highest")

VMEM_SPEC = pl.BlockSpec(memory_space=pltpu.MemorySpace.VMEM)


# --------------------------- fused forward kernel --------------------------- #
def _make_fused_kernel(B, S, W, H, VP):
    """VP = lane-padded (multiple of 128) width of the block-diag one-hot."""
    T = S * W
    H2 = 2 * H          # [fwd | bwd] feature width
    G6 = 6 * H          # interleaved gate width [r_f r_b z_f z_b n_f n_b]
    WB = W * B          # rows per sentence group in the gate scratch

    def kernel(idx_ref,        # (T*B, 2) int32: [token(t), token(T-1-t) + V]
               embbd_ref,      # (VP, 2E) block-diag embedding table (row-padded)
               wihbd_ref,      # (2E, 6H) block-diag, gate-interleaved W_ih^T
               bi_ref,         # (1, 6H)  gate-interleaved b_ih
               whhbd_ref,      # (2H, 6H) block-diag, gate-interleaved W_hh^T
               bh_ref,         # (1, 6H)  gate-interleaved b_hh
               fc1w_ref,       # (2H, H)
               fc1b_ref,       # (1, H)
               fc2w_ref,       # (H, 6)
               fc2b_ref,       # (1, 6)
               out_ref,        # (S*B, 6)
               g_scr,          # (T*B, 6H) f32: per-token input-gate pre-acts
               mx_scr):        # (S*B, 2H) f32: per-sentence max (written once)
        TB = T * B

        # ---- fused embedding lookup + input projection for BOTH directions ---
        # Row t*B+b of g_scr holds the fwd gates at time t and the bwd gates at
        # time T-1-t, so each recurrence step reads one contiguous (B, 6H) slab.
        idx = idx_ref[...]                                        # (TB, 2)
        iota = lax.broadcasted_iota(jnp.int32, (TB, VP), 1)       # 128-aligned
        onehot = jnp.logical_or(iota == idx[:, 0:1],
                                iota == idx[:, 1:2]).astype(jnp.float32)
        emb2 = jnp.dot(onehot, embbd_ref[...],
                       preferred_element_type=jnp.float32)        # (TB, 2E)
        g_scr[...] = (jnp.dot(emb2, wihbd_ref[...],
                              preferred_element_type=jnp.float32)
                      + bi_ref[...])                              # (TB, 6H)

        whh = whhbd_ref[...]                                      # (2H, 6H)
        bh = jnp.broadcast_to(bh_ref[...], (B, G6))               # hoisted bcast

        # ---- merged fwd+bwd recurrence: S groups x W unrolled inner steps ----
        def group_body(s, h):                                     # h: (B, 2H)
            row0 = pl.multiple_of(s * WB, WB)
            gblock = g_scr[pl.ds(row0, WB), :]                    # aligned (WB, 6H)
            gmax = jnp.full((B, H2), -jnp.inf, jnp.float32)
            for w in range(W):                                    # static unroll
                gi = gblock[w * B:(w + 1) * B, :]                 # (B, 6H)
                gh = jnp.dot(h, whh, preferred_element_type=jnp.float32) + bh
                r = jax.nn.sigmoid(gi[:, 0:H2] + gh[:, 0:H2])
                z = jax.nn.sigmoid(gi[:, H2:2 * H2] + gh[:, H2:2 * H2])
                n = jnp.tanh(gi[:, 2 * H2:3 * H2] + r * gh[:, 2 * H2:3 * H2])
                h = n + z * (h - n)                               # (B, 2H)
                gmax = jnp.maximum(gmax, h)                       # vreg carry
            # Flush once per group: fwd half of this group is hidden states of
            # sentence s, bwd half is hidden states of sentence S-1-s.
            mx_scr[pl.ds(s * B, B), 0:H] = gmax[:, 0:H]
            mx_scr[pl.ds((S - 1 - s) * B, B), H:H2] = gmax[:, H:H2]
            return h

        lax.fori_loop(0, S, group_body, jnp.zeros((B, H2), jnp.float32))

        # ---- FC head: Linear(2H->H) -> ReLU -> Linear(H->6) -> Sigmoid -------
        m = mx_scr[...]                                           # (S*B, 2H)
        h1 = jnp.maximum(
            jnp.dot(m, fc1w_ref[...], preferred_element_type=jnp.float32)
            + fc1b_ref[...], 0.0)
        out_ref[...] = jax.nn.sigmoid(
            jnp.dot(h1, fc2w_ref[...], preferred_element_type=jnp.float32)
            + fc2b_ref[...])

    return kernel


# ------------------------------- forward ------------------------------------ #
@jax.jit
def net_forward(x_idx, params):
    emb = params["embedding"]                    # (V, E)
    V, E = emb.shape
    H = params["whh_f"].shape[1]
    B, S, W = x_idx.shape
    T = S * W
    VP = ((2 * V + 127) // 128) * 128            # lane-pad one-hot width

    def ginter(mf, mb):
        # (X, 3H) x 2 -> (X, 6H) with column order [r_f r_b z_f z_b n_f n_b]
        return jnp.concatenate(
            [mf[:, 0:H], mb[:, 0:H],
             mf[:, H:2 * H], mb[:, H:2 * H],
             mf[:, 2 * H:3 * H], mb[:, 2 * H:3 * H]], axis=1)

    # block-diag duplicated embedding table (fwd rows 0:V, bwd rows V:2V),
    # row-padded to VP so the in-kernel one-hot is 128-lane aligned.
    zVE = jnp.zeros((V, E), jnp.float32)
    emb_bd = jnp.concatenate(
        [jnp.concatenate([emb, zVE], axis=1),
         jnp.concatenate([zVE, emb], axis=1)], axis=0)            # (2V, 2E)
    emb_bd = jnp.pad(emb_bd, ((0, VP - 2 * V), (0, 0)))           # (VP, 2E)

    # pre-transposed, block-diag, gate-interleaved GRU weights (no .T in-kernel)
    zE3 = jnp.zeros((E, 3 * H), jnp.float32)
    wih_bd = jnp.concatenate(
        [ginter(params["wih_f"].T, zE3),
         ginter(zE3, params["wih_b"].T)], axis=0)                 # (2E, 6H)
    zH3 = jnp.zeros((H, 3 * H), jnp.float32)
    whh_bd = jnp.concatenate(
        [ginter(params["whh_f"].T, zH3),
         ginter(zH3, params["whh_b"].T)], axis=0)                 # (2H, 6H)
    bi = ginter(params["bih_f"][None, :], params["bih_b"][None, :])   # (1, 6H)
    bh = ginter(params["bhh_f"][None, :], params["bhh_b"][None, :])   # (1, 6H)

    fc1_wT = params["fc1_w"].T                                    # (2H, H)
    fc1_b = params["fc1_b"][None, :]                              # (1, H)
    fc2_wT = params["fc2_w"].T                                    # (H, 6)
    fc2_b = params["fc2_b"][None, :]                              # (1, 6)

    # token ids, time-major: row t*B+b = [token(b, t), token(b, T-1-t) + V]
    flat = x_idx.reshape(B, T).astype(jnp.int32)                  # time = s*W+w
    idx_f = flat.T                                                # (T, B)
    idx_b = flat[:, ::-1].T + V                                   # (T, B)
    idx2 = jnp.stack([idx_f, idx_b], axis=-1).reshape(T * B, 2)

    kernel = _make_fused_kernel(B, S, W, H, VP)
    y = pl.pallas_call(
        kernel,
        out_shape=jax.ShapeDtypeStruct((S * B, 6), jnp.float32),
        in_specs=[VMEM_SPEC] * 10,
        out_specs=VMEM_SPEC,
        scratch_shapes=[pltpu.VMEM((T * B, 6 * H), jnp.float32),
                        pltpu.VMEM((S * B, 2 * H), jnp.float32)],
        compiler_params=pltpu.CompilerParams(
            vmem_limit_bytes=32 * 1024 * 1024),
    )(idx2, emb_bd, wih_bd, bi, whh_bd, bh, fc1_wT, fc1_b, fc2_wT, fc2_b)

    # kernel rows are sentence-major / batch-minor -> (B, S, 6)
    return jnp.transpose(y.reshape(S, B, 6), (1, 0, 2))


# ----------------------- pure-JAX reference (for checking) ------------------ #
@jax.jit
def reference_forward(x_idx, params):
    emb = jnp.take(params["embedding"], x_idx, axis=0)            # (B, S, W, E)
    B, S, W, E = emb.shape
    H = params["whh_f"].shape[1]
    T = S * W
    x_tbe = jnp.transpose(emb.reshape(B, T, E), (1, 0, 2))        # (T, B, E)

    def run(wih, whh, bih, bhh, reverse):
        def cell(h, xt):
            gi = xt @ wih.T + bih
            gh = h @ whh.T + bhh
            r = jax.nn.sigmoid(gi[:, 0:H] + gh[:, 0:H])
            z = jax.nn.sigmoid(gi[:, H:2 * H] + gh[:, H:2 * H])
            n = jnp.tanh(gi[:, 2 * H:3 * H] + r * gh[:, 2 * H:3 * H])
            h_new = (1.0 - z) * n + z * h
            return h_new, h_new
        _, hs = lax.scan(cell, jnp.zeros((B, H), jnp.float32), x_tbe,
                         reverse=reverse)
        return hs                                                 # (T, B, H)

    hf = run(params["wih_f"], params["whh_f"],
             params["bih_f"], params["bhh_f"], False)
    hb = run(params["wih_b"], params["whh_b"],
             params["bih_b"], params["bhh_b"], True)
    out = jnp.concatenate([hf, hb], axis=-1)                      # (T, B, 2H)
    out = jnp.transpose(out, (1, 0, 2)).reshape(B, S, W, 2 * H)
    m = jnp.max(out, axis=2)                                      # (B, S, 2H)
    h1 = jax.nn.relu(m @ params["fc1_w"].T + params["fc1_b"])
    return jax.nn.sigmoid(h1 @ params["fc2_w"].T + params["fc2_b"])


# --------------------------- parameter init --------------------------------- #
def init_params(key, vocab, E, H):
    ks = jax.random.split(key, 11)
    bound = 1.0 / float(H) ** 0.5

    def uni(k, shape):
        return jax.random.uniform(k, shape, jnp.float32, -bound, bound)

    def xavier(k, shape):                       # torch.nn.init.xavier_normal_
        std = (2.0 / (shape[0] + shape[1])) ** 0.5
        return jax.random.normal(k, shape, jnp.float32) * std

    return {
        "embedding": jax.random.normal(ks[0], (vocab, E), jnp.float32),
        # PyTorch GRU layout: W_ih (3H, E), W_hh (3H, H), gates [r, z, n]
        "wih_f": uni(ks[1], (3 * H, E)), "whh_f": uni(ks[2], (3 * H, H)),
        "bih_f": uni(ks[3], (3 * H,)),   "bhh_f": uni(ks[4], (3 * H,)),
        "wih_b": uni(ks[5], (3 * H, E)), "whh_b": uni(ks[6], (3 * H, H)),
        "bih_b": uni(ks[7], (3 * H,)),   "bhh_b": uni(ks[8], (3 * H,)),
        # FC head
        "fc1_w": xavier(ks[9], (H, 2 * H)), "fc1_b": jnp.zeros((H,), jnp.float32),
        "fc2_w": xavier(ks[10], (6, H)),    "fc2_b": jnp.zeros((6,), jnp.float32),
    }


if __name__ == "__main__":
    key = jax.random.PRNGKey(0)
    k_params, k_x = jax.random.split(key)

    vocab_size = 50
    embedding_dim = 32      # config.embedding_dim
    hidden_dim = 32         # config.hidden_dim
    B, S, W = 2, 4, 8       # batch, sentences, words per sentence

    params = init_params(k_params, vocab_size, embedding_dim, hidden_dim)
    x_idx = jax.random.randint(k_x, (B, S, W), 0, vocab_size, dtype=jnp.int32)

    y = net_forward(x_idx, params)
    jax.block_until_ready(y)
    assert y.shape == (B, S, 6) and y.dtype == jnp.float32

    y_ref = reference_forward(x_idx, params)
    jax.block_until_ready(y_ref)
    assert bool(jnp.allclose(y, y_ref, rtol=2e-3, atol=2e-3)), (
        "mismatch vs reference, max abs diff = "
        + str(float(jnp.max(jnp.abs(y - y_ref)))))

    print("KERNEL_OK")
</pallas_src>

<mosaic_0001>
module attributes {stable_mosaic.version = 11 : i64} {
  func.func @kernel(%arg0: memref<64x2xi32, #tpu.memory_space<vmem>>, %arg1: memref<128x64xf32, #tpu.memory_space<vmem>>, %arg2: memref<64x192xf32, #tpu.memory_space<vmem>>, %arg3: memref<1x192xf32, #tpu.memory_space<vmem>>, %arg4: memref<64x192xf32, #tpu.memory_space<vmem>>, %arg5: memref<1x192xf32, #tpu.memory_space<vmem>>, %arg6: memref<64x32xf32, #tpu.memory_space<vmem>>, %arg7: memref<1x32xf32, #tpu.memory_space<vmem>>, %arg8: memref<32x6xf32, #tpu.memory_space<vmem>>, %arg9: memref<1x6xf32, #tpu.memory_space<vmem>>, %arg10: memref<8x6xf32, #tpu.memory_space<vmem>>, %arg11: memref<64x192xf32, #tpu.memory_space<vmem>>, %arg12: memref<8x64xf32, #tpu.memory_space<vmem>>) attributes {dimension_semantics = [], scalar_prefetch = 0 : i64, scratch_operands = 2 : i64, tpu.core_type = #tpu.core_type<tc>} {
    %c0 = arith.constant 0 : index
    %c0_0 = arith.constant 0 : index
    %0 = vector.load %arg0[%c0, %c0_0] : memref<64x2xi32, #tpu.memory_space<vmem>>, vector<64x2xi32>
    %1 = tpu.iota {dimensions = array<i32: 1>} : vector<64x128xi32>
    %2 = vector.extract_strided_slice %0 {offsets = [0, 0], sizes = [64, 1], strides = [1, 1]} : vector<64x2xi32> to vector<64x1xi32>
    %3 = vector.broadcast %2 : vector<64x1xi32> to vector<64x128xi32>
    %4 = arith.cmpi eq, %1, %3 : vector<64x128xi32>
    %5 = vector.extract_strided_slice %0 {offsets = [0, 1], sizes = [64, 1], strides = [1, 1]} : vector<64x2xi32> to vector<64x1xi32>
    %6 = vector.broadcast %5 : vector<64x1xi32> to vector<64x128xi32>
    %7 = arith.cmpi eq, %1, %6 : vector<64x128xi32>
    %8 = arith.ori %4, %7 : vector<64x128xi1>
    %9 = arith.extui %8 : vector<64x128xi1> to vector<64x128xi32>
    %10 = arith.sitofp %9 : vector<64x128xi32> to vector<64x128xf32>
    %c0_1 = arith.constant 0 : index
    %c0_2 = arith.constant 0 : index
    %11 = vector.load %arg1[%c0_1, %c0_2] : memref<128x64xf32, #tpu.memory_space<vmem>>, vector<128x64xf32>
    %cst = arith.constant dense<0.000000e+00> : vector<64x64xf32>
    %12 = tpu.matmul %10, %11, %cst {dimension_numbers = #tpu.dot_dimension_numbers<[1], [0], [0], [1], [0, 0, 1, 1], [], []>, precision = #tpu.contract_precision<fp32>} : vector<64x128xf32>, vector<128x64xf32>, vector<64x64xf32> -> vector<64x64xf32>
    %c0_3 = arith.constant 0 : index
    %c0_4 = arith.constant 0 : index
    %13 = vector.load %arg2[%c0_3, %c0_4] : memref<64x192xf32, #tpu.memory_space<vmem>>, vector<64x192xf32>
    %cst_5 = arith.constant dense<0.000000e+00> : vector<64x192xf32>
    %14 = tpu.matmul %12, %13, %cst_5 {dimension_numbers = #tpu.dot_dimension_numbers<[1], [0], [0], [1], [0, 0, 1, 1], [], []>, precision = #tpu.contract_precision<fp32>} : vector<64x64xf32>, vector<64x192xf32>, vector<64x192xf32> -> vector<64x192xf32>
    %c0_6 = arith.constant 0 : index
    %c0_7 = arith.constant 0 : index
    %15 = vector.load %arg3[%c0_6, %c0_7] : memref<1x192xf32, #tpu.memory_space<vmem>>, vector<1x192xf32>
    %16 = vector.broadcast %15 : vector<1x192xf32> to vector<64x192xf32>
    %17 = arith.addf %14, %16 : vector<64x192xf32>
    %c0_8 = arith.constant 0 : index
    %c0_9 = arith.constant 0 : index
    %18 = vector.load %arg11[%c0_8, %c0_9] : memref<64x192xf32, #tpu.memory_space<vmem>>, vector<64x192xf32>
    tpu.vector_store %arg11[%c0_8, %c0_9], %17 {strides = array<i32>} : memref<64x192xf32, #tpu.memory_space<vmem>>, vector<64x192xf32>,
    %c0_10 = arith.constant 0 : index
    %c0_11 = arith.constant 0 : index
    %19 = vector.load %arg4[%c0_10, %c0_11] : memref<64x192xf32, #tpu.memory_space<vmem>>, vector<64x192xf32>
    %c0_12 = arith.constant 0 : index
    %c0_13 = arith.constant 0 : index
    %20 = vector.load %arg5[%c0_12, %c0_13] : memref<1x192xf32, #tpu.memory_space<vmem>>, vector<1x192xf32>
    %21 = vector.shape_cast %20 : vector<1x192xf32> to vector<1x192xf32>
    %22 = vector.broadcast %21 : vector<1x192xf32> to vector<2x192xf32>
    %cst_14 = arith.constant 0.000000e+00 : f32
    %23 = vector.broadcast %cst_14 : f32 to vector<2x64xf32>
    %c0_i32 = arith.constant 0 : i32
    %c4_i32 = arith.constant 4 : i32
    %24 = arith.addi %c0_i32, %c4_i32 : i32
    %c1_i32 = arith.constant 1 : i32
    %25 = scf.for %arg13 = %c0_i32 to %24 step %c1_i32 iter_args(%arg14 = %23) -> (vector<2x64xf32>)  : i32 {
      %c16_i32 = arith.constant 16 : i32
      %45 = arith.muli %arg13, %c16_i32 : i32
      %46 = tpu.assume_multiple %45, 16 : i32
      %47 = arith.index_cast %46 : i32 to index
      %c0_32 = arith.constant 0 : index
      %48 = vector.load %arg11[%47, %c0_32] : memref<64x192xf32, #tpu.memory_space<vmem>>, vector<16x192xf32>
      %cst_33 = arith.constant 0xFF800000 : f32
      %49 = vector.broadcast %cst_33 : f32 to vector<2x64xf32>
      %50 = vector.extract_strided_slice %48 {offsets = [0, 0], sizes = [2, 192], strides = [1, 1]} : vector<16x192xf32> to vector<2x192xf32>
      %cst_34 = arith.constant dense<0.000000e+00> : vector<2x192xf32>
      %51 = tpu.matmul %arg14, %19, %cst_34 {dimension_numbers = #tpu.dot_dimension_numbers<[1], [0], [0], [1], [0, 0, 1, 1], [], []>, precision = #tpu.contract_precision<fp32>} : vector<2x64xf32>, vector<64x192xf32>, vector<2x192xf32> -> vector<2x192xf32>
      %52 = arith.addf %51, %22 : vector<2x192xf32>
      %53 = vector.extract_strided_slice %50 {offsets = [0, 0], sizes = [2, 64], strides = [1, 1]} : vector<2x192xf32> to vector<2x64xf32>
      %54 = vector.extract_strided_slice %52 {offsets = [0, 0], sizes = [2, 64], strides = [1, 1]} : vector<2x192xf32> to vector<2x64xf32>
      %55 = arith.addf %53, %54 : vector<2x64xf32>
      %56 = arith.negf %55 : vector<2x64xf32>
      %57 = math.exp %56 : vector<2x64xf32>
      %cst_35 = arith.constant 1.000000e+00 : f32
      %58 = vector.broadcast %cst_35 : f32 to vector<2x64xf32>
      %59 = arith.addf %58, %57 : vector<2x64xf32>
      %60 = arith.divf %58, %59 : vector<2x64xf32>
      %61 = vector.extract_strided_slice %50 {offsets = [0, 64], sizes = [2, 64], strides = [1, 1]} : vector<2x192xf32> to vector<2x64xf32>
      %62 = vector.extract_strided_slice %52 {offsets = [0, 64], sizes = [2, 64], strides = [1, 1]} : vector<2x192xf32> to vector<2x64xf32>
      %63 = arith.addf %61, %62 : vector<2x64xf32>
      %64 = arith.negf %63 : vector<2x64xf32>
      %65 = math.exp %64 : vector<2x64xf32>
      %cst_36 = arith.constant 1.000000e+00 : f32
      %66 = vector.broadcast %cst_36 : f32 to vector<2x64xf32>
      %67 = arith.addf %66, %65 : vector<2x64xf32>
      %68 = arith.divf %66, %67 : vector<2x64xf32>
      %69 = vector.extract_strided_slice %50 {offsets = [0, 128], sizes = [2, 64], strides = [1, 1]} : vector<2x192xf32> to vector<2x64xf32>
      %70 = vector.extract_strided_slice %52 {offsets = [0, 128], sizes = [2, 64], strides = [1, 1]} : vector<2x192xf32> to vector<2x64xf32>
      %71 = arith.mulf %60, %70 : vector<2x64xf32>
      %72 = arith.addf %69, %71 : vector<2x64xf32>
      %73 = math.tanh %72 : vector<2x64xf32>
      %74 = arith.subf %arg14, %73 : vector<2x64xf32>
      %75 = arith.mulf %68, %74 : vector<2x64xf32>
      %76 = arith.addf %73, %75 : vector<2x64xf32>
      %77 = arith.maximumf %49, %76 : vector<2x64xf32>
      %78 = vector.extract_strided_slice %48 {offsets = [2, 0], sizes = [2, 192], strides = [1, 1]} : vector<16x192xf32> to vector<2x192xf32>
      %cst_37 = arith.constant dense<0.000000e+00> : vector<2x192xf32>
      %79 = tpu.matmul %76, %19, %cst_37 {dimension_numbers = #tpu.dot_dimension_numbers<[1], [0], [0], [1], [0, 0, 1, 1], [], []>, precision = #tpu.contract_precision<fp32>} : vector<2x64xf32>, vector<64x192xf32>, vector<2x192xf32> -> vector<2x192xf32>
      %80 = arith.addf %79, %22 : vector<2x192xf32>
      %81 = vector.extract_strided_slice %78 {offsets = [0, 0], sizes = [2, 64], strides = [1, 1]} : vector<2x192xf32> to vector<2x64xf32>
      %82 = vector.extract_strided_slice %80 {offsets = [0, 0], sizes = [2, 64], strides = [1, 1]} : vector<2x192xf32> to vector<2x64xf32>
      %83 = arith.addf %81, %82 : vector<2x64xf32>
      %84 = arith.negf %83 : vector<2x64xf32>
      %85 = math.exp %84 : vector<2x64xf32>
      %cst_38 = arith.constant 1.000000e+00 : f32
      %86 = vector.broadcast %cst_38 : f32 to vector<2x64xf32>
      %87 = arith.addf %86, %85 : vector<2x64xf32>
      %88 = arith.divf %86, %87 : vector<2x64xf32>
      %89 = vector.extract_strided_slice %78 {offsets = [0, 64], sizes = [2, 64], strides = [1, 1]} : vector<2x192xf32> to vector<2x64xf32>
      %90 = vector.extract_strided_slice %80 {offsets = [0, 64], sizes = [2, 64], strides = [1, 1]} : vector<2x192xf32> to vector<2x64xf32>
      %91 = arith.addf %89, %90 : vector<2x64xf32>
      %92 = arith.negf %91 : vector<2x64xf32>
      %93 = math.exp %92 : vector<2x64xf32>
      %cst_39 = arith.constant 1.000000e+00 : f32
      %94 = vector.broadcast %cst_39 : f32 to vector<2x64xf32>
      %95 = arith.addf %94, %93 : vector<2x64xf32>
      %96 = arith.divf %94, %95 : vector<2x64xf32>
      %97 = vector.extract_strided_slice %78 {offsets = [0, 128], sizes = [2, 64], strides = [1, 1]} : vector<2x192xf32> to vector<2x64xf32>
      %98 = vector.extract_strided_slice %80 {offsets = [0, 128], sizes = [2, 64], strides = [1, 1]} : vector<2x192xf32> to vector<2x64xf32>
      %99 = arith.mulf %88, %98 : vector<2x64xf32>
      %100 = arith.addf %97, %99 : vector<2x64xf32>
      %101 = math.tanh %100 : vector<2x64xf32>
      %102 = arith.subf %76, %101 : vector<2x64xf32>
      %103 = arith.mulf %96, %102 : vector<2x64xf32>
      %104 = arith.addf %101, %103 : vector<2x64xf32>
      %105 = arith.maximumf %77, %104 : vector<2x64xf32>
      %106 = vector.extract_strided_slice %48 {offsets = [4, 0], sizes = [2, 192], strides = [1, 1]} : vector<16x192xf32> to vector<2x192xf32>
      %cst_40 = arith.constant dense<0.000000e+00> : vector<2x192xf32>
      %107 = tpu.matmul %104, %19, %cst_40 {dimension_numbers = #tpu.dot_dimension_numbers<[1], [0], [0], [1], [0, 0, 1, 1], [], []>, precision = #tpu.contract_precision<fp32>} : vector<2x64xf32>, vector<64x192xf32>, vector<2x192xf32> -> vector<2x192xf32>
      %108 = arith.addf %107, %22 : vector<2x192xf32>
      %109 = vector.extract_strided_slice %106 {offsets = [0, 0], sizes = [2, 64], strides = [1, 1]} : vector<2x192xf32> to vector<2x64xf32>
      %110 = vector.extract_strided_slice %108 {offsets = [0, 0], sizes = [2, 64], strides = [1, 1]} : vector<2x192xf32> to vector<2x64xf32>
      %111 = arith.addf %109, %110 : vector<2x64xf32>
      %112 = arith.negf %111 : vector<2x64xf32>
      %113 = math.exp %112 : vector<2x64xf32>
      %cst_41 = arith.constant 1.000000e+00 : f32
      %114 = vector.broadcast %cst_41 : f32 to vector<2x64xf32>
      %115 = arith.addf %114, %113 : vector<2x64xf32>
      %116 = arith.divf %114, %115 : vector<2x64xf32>
      %117 = vector.extract_strided_slice %106 {offsets = [0, 64], sizes = [2, 64], strides = [1, 1]} : vector<2x192xf32> to vector<2x64xf32>
      %118 = vector.extract_strided_slice %108 {offsets = [0, 64], sizes = [2, 64], strides = [1, 1]} : vector<2x192xf32> to vector<2x64xf32>
      %119 = arith.addf %117, %118 : vector<2x64xf32>
      %120 = arith.negf %119 : vector<2x64xf32>
      %121 = math.exp %120 : vector<2x64xf32>
      %cst_42 = arith.constant 1.000000e+00 : f32
      %122 = vector.broadcast %cst_42 : f32 to vector<2x64xf32>
      %123 = arith.addf %122, %121 : vector<2x64xf32>
      %124 = arith.divf %122, %123 : vector<2x64xf32>
      %125 = vector.extract_strided_slice %106 {offsets = [0, 128], sizes = [2, 64], strides = [1, 1]} : vector<2x192xf32> to vector<2x64xf32>
      %126 = vector.extract_strided_slice %108 {offsets = [0, 128], sizes = [2, 64], strides = [1, 1]} : vector<2x192xf32> to vector<2x64xf32>
      %127 = arith.mulf %116, %126 : vector<2x64xf32>
      %128 = arith.addf %125, %127 : vector<2x64xf32>
      %129 = math.tanh %128 : vector<2x64xf32>
      %130 = arith.subf %104, %129 : vector<2x64xf32>
      %131 = arith.mulf %124, %130 : vector<2x64xf32>
      %132 = arith.addf %129, %131 : vector<2x64xf32>
      %133 = arith.maximumf %105, %132 : vector<2x64xf32>
      %134 = vector.extract_strided_slice %48 {offsets = [6, 0], sizes = [2, 192], strides = [1, 1]} : vector<16x192xf32> to vector<2x192xf32>
      %cst_43 = arith.constant dense<0.000000e+00> : vector<2x192xf32>
      %135 = tpu.matmul %132, %19, %cst_43 {dimension_numbers = #tpu.dot_dimension_numbers<[1], [0], [0], [1], [0, 0, 1, 1], [], []>, precision = #tpu.contract_precision<fp32>} : vector<2x64xf32>, vector<64x192xf32>, vector<2x192xf32> -> vector<2x192xf32>
      %136 = arith.addf %135, %22 : vector<2x192xf32>
      %137 = vector.extract_strided_slice %134 {offsets = [0, 0], sizes = [2, 64], strides = [1, 1]} : vector<2x192xf32> to vector<2x64xf32>
      %138 = vector.extract_strided_slice %136 {offsets = [0, 0], sizes = [2, 64], strides = [1, 1]} : vector<2x192xf32> to vector<2x64xf32>
      %139 = arith.addf %137, %138 : vector<2x64xf32>
      %140 = arith.negf %139 : vector<2x64xf32>
      %141 = math.exp %140 : vector<2x64xf32>
      %cst_44 = arith.constant 1.000000e+00 : f32
      %142 = vector.broadcast %cst_44 : f32 to vector<2x64xf32>
      %143 = arith.addf %142, %141 : vector<2x64xf32>
      %144 = arith.divf %142, %143 : vector<2x64xf32>
      %145 = vector.extract_strided_slice %134 {offsets = [0, 64], sizes = [2, 64], strides = [1, 1]} : vector<2x192xf32> to vector<2x64xf32>
      %146 = vector.extract_strided_slice %136 {offsets = [0, 64], sizes = [2, 64], strides = [1, 1]} : vector<2x192xf32> to vector<2x64xf32>
      %147 = arith.addf %145, %146 : vector<2x64xf32>
      %148 = arith.negf %147 : vector<2x64xf32>
      %149 = math.exp %148 : vector<2x64xf32>
      %cst_45 = arith.constant 1.000000e+00 : f32
      %150 = vector.broadcast %cst_45 : f32 to vector<2x64xf32>
      %151 = arith.addf %150, %149 : vector<2x64xf32>
      %152 = arith.divf %150, %151 : vector<2x64xf32>
      %153 = vector.extract_strided_slice %134 {offsets = [0, 128], sizes = [2, 64], strides = [1, 1]} : vector<2x192xf32> to vector<2x64xf32>
      %154 = vector.extract_strided_slice %136 {offsets = [0, 128], sizes = [2, 64], strides = [1, 1]} : vector<2x192xf32> to vector<2x64xf32>
      %155 = arith.mulf %144, %154 : vector<2x64xf32>
      %156 = arith.addf %153, %155 : vector<2x64xf32>
      %157 = math.tanh %156 : vector<2x64xf32>
      %158 = arith.subf %132, %157 : vector<2x64xf32>
      %159 = arith.mulf %152, %158 : vector<2x64xf32>
      %160 = arith.addf %157, %159 : vector<2x64xf32>
      %161 = arith.maximumf %133, %160 : vector<2x64xf32>
      %162 = vector.extract_strided_slice %48 {offsets = [8, 0], sizes = [2, 192], strides = [1, 1]} : vector<16x192xf32> to vector<2x192xf32>
      %cst_46 = arith.constant dense<0.000000e+00> : vector<2x192xf32>
      %163 = tpu.matmul %160, %19, %cst_46 {dimension_numbers = #tpu.dot_dimension_numbers<[1], [0], [0], [1], [0, 0, 1, 1], [], []>, precision = #tpu.contract_precision<fp32>} : vector<2x64xf32>, vector<64x192xf32>, vector<2x192xf32> -> vector<2x192xf32>
      %164 = arith.addf %163, %22 : vector<2x192xf32>
      %165 = vector.extract_strided_slice %162 {offsets = [0, 0], sizes = [2, 64], strides = [1, 1]} : vector<2x192xf32> to vector<2x64xf32>
      %166 = vector.extract_strided_slice %164 {offsets = [0, 0], sizes = [2, 64], strides = [1, 1]} : vector<2x192xf32> to vector<2x64xf32>
      %167 = arith.addf %165, %166 : vector<2x64xf32>
      %168 = arith.negf %167 : vector<2x64xf32>
      %169 = math.exp %168 : vector<2x64xf32>
      %cst_47 = arith.constant 1.000000e+00 : f32
      %170 = vector.broadcast %cst_47 : f32 to vector<2x64xf32>
      %171 = arith.addf %170, %169 : vector<2x64xf32>
      %172 = arith.divf %170, %171 : vector<2x64xf32>
      %173 = vector.extract_strided_slice %162 {offsets = [0, 64], sizes = [2, 64], strides = [1, 1]} : vector<2x192xf32> to vector<2x64xf32>
      %174 = vector.extract_strided_slice %164 {offsets = [0, 64], sizes = [2, 64], strides = [1, 1]} : vector<2x192xf32> to vector<2x64xf32>
      %175 = arith.addf %173, %174 : vector<2x64xf32>
      %176 = arith.negf %175 : vector<2x64xf32>
      %177 = math.exp %176 : vector<2x64xf32>
      %cst_48 = arith.constant 1.000000e+00 : f32
      %178 = vector.broadcast %cst_48 : f32 to vector<2x64xf32>
      %179 = arith.addf %178, %177 : vector<2x64xf32>
      %180 = arith.divf %178, %179 : vector<2x64xf32>
      %181 = vector.extract_strided_slice %162 {offsets = [0, 128], sizes = [2, 64], strides = [1, 1]} : vector<2x192xf32> to vector<2x64xf32>
      %182 = vector.extract_strided_slice %164 {offsets = [0, 128], sizes = [2, 64], strides = [1, 1]} : vector<2x192xf32> to vector<2x64xf32>
      %183 = arith.mulf %172, %182 : vector<2x64xf32>
      %184 = arith.addf %181, %183 : vector<2x64xf32>
      %185 = math.tanh %184 : vector<2x64xf32>
      %186 = arith.subf %160, %185 : vector<2x64xf32>
      %187 = arith.mulf %180, %186 : vector<2x64xf32>
      %188 = arith.addf %185, %187 : vector<2x64xf32>
      %189 = arith.maximumf %161, %188 : vector<2x64xf32>
      %190 = vector.extract_strided_slice %48 {offsets = [10, 0], sizes = [2, 192], strides = [1, 1]} : vector<16x192xf32> to vector<2x192xf32>
      %cst_49 = arith.constant dense<0.000000e+00> : vector<2x192xf32>
      %191 = tpu.matmul %188, %19, %cst_49 {dimension_numbers = #tpu.dot_dimension_numbers<[1], [0], [0], [1], [0, 0, 1, 1], [], []>, precision = #tpu.contract_precision<fp32>} : vector<2x64xf32>, vector<64x192xf32>, vector<2x192xf32> -> vector<2x192xf32>
      %192 = arith.addf %191, %22 : vector<2x192xf32>
      %193 = vector.extract_strided_slice %190 {offsets = [0, 0], sizes = [2, 64], strides = [1, 1]} : vector<2x192xf32> to vector<2x64xf32>
      %194 = vector.extract_strided_slice %192 {offsets = [0, 0], sizes = [2, 64], strides = [1, 1]} : vector<2x192xf32> to vector<2x64xf32>
      %195 = arith.addf %193, %194 : vector<2x64xf32>
      %196 = arith.negf %195 : vector<2x64xf32>
      %197 = math.exp %196 : vector<2x64xf32>
      %cst_50 = arith.constant 1.000000e+00 : f32
      %198 = vector.broadcast %cst_50 : f32 to vector<2x64xf32>
      %199 = arith.addf %198, %197 : vector<2x64xf32>
      %200 = arith.divf %198, %199 : vector<2x64xf32>
      %201 = vector.extract_strided_slice %190 {offsets = [0, 64], sizes = [2, 64], strides = [1, 1]} : vector<2x192xf32> to vector<2x64xf32>
      %202 = vector.extract_strided_slice %192 {offsets = [0, 64], sizes = [2, 64], strides = [1, 1]} : vector<2x192xf32> to vector<2x64xf32>
      %203 = arith.addf %201, %202 : vector<2x64xf32>
      %204 = arith.negf %203 : vector<2x64xf32>
      %205 = math.exp %204 : vector<2x64xf32>
      %cst_51 = arith.constant 1.000000e+00 : f32
      %206 = vector.broadcast %cst_51 : f32 to vector<2x64xf32>
      %207 = arith.addf %206, %205 : vector<2x64xf32>
      %208 = arith.divf %206, %207 : vector<2x64xf32>
      %209 = vector.extract_strided_slice %190 {offsets = [0, 128], sizes = [2, 64], strides = [1, 1]} : vector<2x192xf32> to vector<2x64xf32>
      %210 = vector.extract_strided_slice %192 {offsets = [0, 128], sizes = [2, 64], strides = [1, 1]} : vector<2x192xf32> to vector<2x64xf32>
      %211 = arith.mulf %200, %210 : vector<2x64xf32>
      %212 = arith.addf %209, %211 : vector<2x64xf32>
      %213 = math.tanh %212 : vector<2x64xf32>
      %214 = arith.subf %188, %213 : vector<2x64xf32>
      %215 = arith.mulf %208, %214 : vector<2x64xf32>
      %216 = arith.addf %213, %215 : vector<2x64xf32>
      %217 = arith.maximumf %189, %216 : vector<2x64xf32>
      %218 = vector.extract_strided_slice %48 {offsets = [12, 0], sizes = [2, 192], strides = [1, 1]} : vector<16x192xf32> to vector<2x192xf32>
      %cst_52 = arith.constant dense<0.000000e+00> : vector<2x192xf32>
      %219 = tpu.matmul %216, %19, %cst_52 {dimension_numbers = #tpu.dot_dimension_numbers<[1], [0], [0], [1], [0, 0, 1, 1], [], []>, precision = #tpu.contract_precision<fp32>} : vector<2x64xf32>, vector<64x192xf32>, vector<2x192xf32> -> vector<2x192xf32>
      %220 = arith.addf %219, %22 : vector<2x192xf32>
      %221 = vector.extract_strided_slice %218 {offsets = [0, 0], sizes = [2, 64], strides = [1, 1]} : vector<2x192xf32> to vector<2x64xf32>
      %222 = vector.extract_strided_slice %220 {offsets = [0, 0], sizes = [2, 64], strides = [1, 1]} : vector<2x192xf32> to vector<2x64xf32>
      %223 = arith.addf %221, %222 : vector<2x64xf32>
      %224 = arith.negf %223 : vector<2x64xf32>
      %225 = math.exp %224 : vector<2x64xf32>
      %cst_53 = arith.constant 1.000000e+00 : f32
      %226 = vector.broadcast %cst_53 : f32 to vector<2x64xf32>
      %227 = arith.addf %226, %225 : vector<2x64xf32>
      %228 = arith.divf %226, %227 : vector<2x64xf32>
      %229 = vector.extract_strided_slice %218 {offsets = [0, 64], sizes = [2, 64], strides = [1, 1]} : vector<2x192xf32> to vector<2x64xf32>
      %230 = vector.extract_strided_slice %220 {offsets = [0, 64], sizes = [2, 64], strides = [1, 1]} : vector<2x192xf32> to vector<2x64xf32>
      %231 = arith.addf %229, %230 : vector<2x64xf32>
      %232 = arith.negf %231 : vector<2x64xf32>
      %233 = math.exp %232 : vector<2x64xf32>
      %cst_54 = arith.constant 1.000000e+00 : f32
      %234 = vector.broadcast %cst_54 : f32 to vector<2x64xf32>
      %235 = arith.addf %234, %233 : vector<2x64xf32>
      %236 = arith.divf %234, %235 : vector<2x64xf32>
      %237 = vector.extract_strided_slice %218 {offsets = [0, 128], sizes = [2, 64], strides = [1, 1]} : vector<2x192xf32> to vector<2x64xf32>
      %238 = vector.extract_strided_slice %220 {offsets = [0, 128], sizes = [2, 64], strides = [1, 1]} : vector<2x192xf32> to vector<2x64xf32>
      %239 = arith.mulf %228, %238 : vector<2x64xf32>
      %240 = arith.addf %237, %239 : vector<2x64xf32>
      %241 = math.tanh %240 : vector<2x64xf32>
      %242 = arith.subf %216, %241 : vector<2x64xf32>
      %243 = arith.mulf %236, %242 : vector<2x64xf32>
      %244 = arith.addf %241, %243 : vector<2x64xf32>
      %245 = arith.maximumf %217, %244 : vector<2x64xf32>
      %246 = vector.extract_strided_slice %48 {offsets = [14, 0], sizes = [2, 192], strides = [1, 1]} : vector<16x192xf32> to vector<2x192xf32>
      %cst_55 = arith.constant dense<0.000000e+00> : vector<2x192xf32>
      %247 = tpu.matmul %244, %19, %cst_55 {dimension_numbers = #tpu.dot_dimension_numbers<[1], [0], [0], [1], [0, 0, 1, 1], [], []>, precision = #tpu.contract_precision<fp32>} : vector<2x64xf32>, vector<64x192xf32>, vector<2x192xf32> -> vector<2x192xf32>
      %248 = arith.addf %247, %22 : vector<2x192xf32>
      %249 = vector.extract_strided_slice %246 {offsets = [0, 0], sizes = [2, 64], strides = [1, 1]} : vector<2x192xf32> to vector<2x64xf32>
      %250 = vector.extract_strided_slice %248 {offsets = [0, 0], sizes = [2, 64], strides = [1, 1]} : vector<2x192xf32> to vector<2x64xf32>
      %251 = arith.addf %249, %250 : vector<2x64xf32>
      %252 = arith.negf %251 : vector<2x64xf32>
      %253 = math.exp %252 : vector<2x64xf32>
      %cst_56 = arith.constant 1.000000e+00 : f32
      %254 = vector.broadcast %cst_56 : f32 to vector<2x64xf32>
      %255 = arith.addf %254, %253 : vector<2x64xf32>
      %256 = arith.divf %254, %255 : vector<2x64xf32>
      %257 = vector.extract_strided_slice %246 {offsets = [0, 64], sizes = [2, 64], strides = [1, 1]} : vector<2x192xf32> to vector<2x64xf32>
      %258 = vector.extract_strided_slice %248 {offsets = [0, 64], sizes = [2, 64], strides = [1, 1]} : vector<2x192xf32> to vector<2x64xf32>
      %259 = arith.addf %257, %258 : vector<2x64xf32>
      %260 = arith.negf %259 : vector<2x64xf32>
      %261 = math.exp %260 : vector<2x64xf32>
      %cst_57 = arith.constant 1.000000e+00 : f32
      %262 = vector.broadcast %cst_57 : f32 to vector<2x64xf32>
      %263 = arith.addf %262, %261 : vector<2x64xf32>
      %264 = arith.divf %262, %263 : vector<2x64xf32>
      %265 = vector.extract_strided_slice %246 {offsets = [0, 128], sizes = [2, 64], strides = [1, 1]} : vector<2x192xf32> to vector<2x64xf32>
      %266 = vector.extract_strided_slice %248 {offsets = [0, 128], sizes = [2, 64], strides = [1, 1]} : vector<2x192xf32> to vector<2x64xf32>
      %267 = arith.mulf %256, %266 : vector<2x64xf32>
      %268 = arith.addf %265, %267 : vector<2x64xf32>
      %269 = math.tanh %268 : vector<2x64xf32>
      %270 = arith.subf %244, %269 : vector<2x64xf32>
      %271 = arith.mulf %264, %270 : vector<2x64xf32>
      %272 = arith.addf %269, %271 : vector<2x64xf32>
      %273 = arith.maximumf %245, %272 : vector<2x64xf32>
      %274 = vector.extract_strided_slice %273 {offsets = [0, 0], sizes = [2, 32], strides = [1, 1]} : vector<2x64xf32> to vector<2x32xf32>
      %c2_i32 = arith.constant 2 : i32
      %275 = arith.muli %arg13, %c2_i32 : i32
      %276 = arith.index_cast %275 : i32 to index
      %c0_58 = arith.constant 0 : index
      %277 = vector.load %arg12[%276, %c0_58] : memref<8x64xf32, #tpu.memory_space<vmem>>, vector<2x32xf32>
      tpu.vector_store %arg12[%276, %c0_58], %274 {strides = array<i32>} : memref<8x64xf32, #tpu.memory_space<vmem>>, vector<2x32xf32>,
      %278 = vector.extract_strided_slice %273 {offsets = [0, 32], sizes = [2, 32], strides = [1, 1]} : vector<2x64xf32> to vector<2x32xf32>
      %c3_i32 = arith.constant 3 : i32
      %279 = arith.subi %c3_i32, %arg13 : i32
      %c2_i32_59 = arith.constant 2 : i32
      %280 = arith.muli %279, %c2_i32_59 : i32
      %281 = arith.index_cast %280 : i32 to index
      %c32 = arith.constant 32 : index
      %282 = vector.load %arg12[%281, %c32] : memref<8x64xf32, #tpu.memory_space<vmem>>, vector<2x32xf32>
      tpu.vector_store %arg12[%281, %c32], %278 {strides = array<i32>} : memref<8x64xf32, #tpu.memory_space<vmem>>, vector<2x32xf32>,
      scf.yield %272 : vector<2x64xf32>
    }
    %c4_i32_15 = arith.constant 4 : i32
    %c0_16 = arith.constant 0 : index
    %c0_17 = arith.constant 0 : index
    %26 = vector.load %arg12[%c0_16, %c0_17] : memref<8x64xf32, #tpu.memory_space<vmem>>, vector<8x64xf32>
    %c0_18 = arith.constant 0 : index
    %c0_19 = arith.constant 0 : index
    %27 = vector.load %arg6[%c0_18, %c0_19] : memref<64x32xf32, #tpu.memory_space<vmem>>, vector<64x32xf32>
    %cst_20 = arith.constant dense<0.000000e+00> : vector<8x32xf32>
    %28 = tpu.matmul %26, %27, %cst_20 {dimension_numbers = #tpu.dot_dimension_numbers<[1], [0], [0], [1], [0, 0, 1, 1], [], []>, precision = #tpu.contract_precision<fp32>} : vector<8x64xf32>, vector<64x32xf32>, vector<8x32xf32> -> vector<8x32xf32>
    %c0_21 = arith.constant 0 : index
    %c0_22 = arith.constant 0 : index
    %29 = vector.load %arg7[%c0_21, %c0_22] : memref<1x32xf32, #tpu.memory_space<vmem>>, vector<1x32xf32>
    %30 = vector.broadcast %29 : vector<1x32xf32> to vector<8x32xf32>
    %31 = arith.addf %28, %30 : vector<8x32xf32>
    %cst_23 = arith.constant 0.000000e+00 : f32
    %32 = vector.broadcast %cst_23 : f32 to vector<8x32xf32>
    %33 = arith.maximumf %31, %32 : vector<8x32xf32>
    %c0_24 = arith.constant 0 : index
    %c0_25 = arith.constant 0 : index
    %34 = vector.load %arg8[%c0_24, %c0_25] : memref<32x6xf32, #tpu.memory_space<vmem>>, vector<32x6xf32>
    %cst_26 = arith.constant dense<0.000000e+00> : vector<8x6xf32>
    %35 = tpu.matmul %33, %34, %cst_26 {dimension_numbers = #tpu.dot_dimension_numbers<[1], [0], [0], [1], [0, 0, 1, 1], [], []>, precision = #tpu.contract_precision<fp32>} : vector<8x32xf32>, vector<32x6xf32>, vector<8x6xf32> -> vector<8x6xf32>
    %c0_27 = arith.constant 0 : index
    %c0_28 = arith.constant 0 : index
    %36 = vector.load %arg9[%c0_27, %c0_28] : memref<1x6xf32, #tpu.memory_space<vmem>>, vector<1x6xf32>
    %37 = vector.broadcast %36 : vector<1x6xf32> to vector<8x6xf32>
    %38 = arith.addf %35, %37 : vector<8x6xf32>
    %39 = arith.negf %38 : vector<8x6xf32>
    %40 = math.exp %39 : vector<8x6xf32>
    %cst_29 = arith.constant 1.000000e+00 : f32
    %41 = vector.broadcast %cst_29 : f32 to vector<8x6xf32>
    %42 = arith.addf %41, %40 : vector<8x6xf32>
    %43 = arith.divf %41, %42 : vector<8x6xf32>
    %c0_30 = arith.constant 0 : index
    %c0_31 = arith.constant 0 : index
    %44 = vector.load %arg10[%c0_30, %c0_31] : memref<8x6xf32, #tpu.memory_space<vmem>>, vector<8x6xf32>
    tpu.vector_store %arg10[%c0_30, %c0_31], %43 {strides = array<i32>} : memref<8x6xf32, #tpu.memory_space<vmem>>, vector<8x6xf32>,
    return
  }
}

</mosaic_0001>

<bundles_post_ra>
// kernel: net_forward.1
= control target key start
LH: loop header
LB: loop body
LE: loop exit
PB: predicated region body
PF: predicated region fallthrough
CT: control target
= control target key end

     0   :  { %v6578_v0 = vmov 0   ;;  %v6579_v4 = vmov 1   ;;  %s9121_s0 = inlined_call_operand.vmem [shape: s32[64,2], index: 0, kind: input, shape index: {}]   ;;  %s9122_s6 = inlined_call_operand.vmem [shape: f32[64,32], index: 6, kind: input, shape index: {}]   ;;  %s9123_s7 = inlined_call_operand.vmem [shape: f32[1,32], index: 7, kind: input, shape index: {}]   ;;  %s9124_s8 = inlined_call_operand.vmem [shape: f32[32,6], index: 8, kind: input, shape index: {}]   ;;  %s9125_s9 = inlined_call_operand.vmem [shape: f32[1,6], index: 9, kind: input, shape index: {}]   ;;  %s9126_s10 = inlined_call_operand.vmem [shape: f32[8,6], index: 10, kind: output, shape index: {}]   ;;  %s9127_s1 = inlined_call_operand.vmem [shape: f32[128,64], index: 1, kind: input, shape index: {}]   ;;  %s9128_s2 = inlined_call_operand.vmem [shape: f32[64,192], index: 2, kind: input, shape index: {}]   ;;  %s9129_s3 = inlined_call_operand.vmem [shape: f32[1,192], index: 3, kind: input, shape index: {}]   ;;  %s9130_s5 = inlined_call_operand.vmem [shape: f32[1,192], index: 5, kind: input, shape index: {}]   ;;  %s9131_s4 = inlined_call_operand.vmem [shape: f32[64,192], index: 4, kind: input, shape index: {}]  }
   0x1   :  { %6495 = vset.pattern.permute.xlu1 %v6578_v0  ;;  %6493 = vset.pattern.permute.xlu0 %v6578_v0  ;;  %v40_v1 = vld [vmem:[%s9121_s0 + $0x28] sm:$0xff]  ;;  %v39_v2 = vld [vmem:[%s9121_s0 + $0x20] sm:$0xff]  ;;  %v41_v5 = vld [vmem:[%s9121_s0 + $0x30] sm:$0xff] }
   0x2   :  { %v35_v3 = vld [vmem:[%s9121_s0] sm:$0xff]  ;;  %61 = vperm.xlu1 %6495, %v40_v1   ;;  %58 = vperm.xlu0 %6493, %v39_v2   ;;  %v36_v6 = vld [vmem:[%s9121_s0 + $0x8] sm:$0xff]  ;;  %v148_v7 = vld [vmem:[%s9127_s1 + $0x78] sm:$0xff] }
   0x3   :  { %6497 = vset.pattern.permute.xlu2 %v6578_v0  ;;  %v147_v8 = vld [vmem:[%s9127_s1 + $0x70] sm:$0xff]  ;;  %v146_v9 = vld [vmem:[%s9127_s1 + $0x68] sm:$0xff]  ;;  %v6668_v10 = vand.u32 4294901760, %v148_v7  ;;  %v145_v13 = vld [vmem:[%s9127_s1 + $0x60] sm:$0xff] }
   0x4   :  { %46 = vperm.xlu2 %6497, %v35_v3   ;;  %v6670_v11 = vand.u32 4294901760, %v147_v8  ;;  %v6672_v12 = vand.u32 4294901760, %v146_v9  ;;  %v144_v14 = vld [vmem:[%s9127_s1 + $0x58] sm:$0xff]  ;;  %v143_v15 = vld [vmem:[%s9127_s1 + $0x50] sm:$0xff]  ;;  %v6683_v16 = vand.u32 4294901760, %v145_v13  ;;  %v142_v46 = vld [vmem:[%s9127_s1 + $0x48] sm:$0xff] }
   0x5   :  { %v6685_v17 = vand.u32 4294901760, %v144_v14  ;;  %v6687_v18 = vand.u32 4294901760, %v143_v15  ;;  %v6692_v19 = vsub.f32 %v148_v7, %v6668_v10  ;;  %150 = vmatpush.msra.mxu0 %v6668_v10  ;;  %6440 = vmatpush.msra.mxu2 %v6668_v10  ;;  %v37_v34 = vld [vmem:[%s9121_s0 + $0x10] sm:$0xff]  ;;  %v42_v40 = vld [vmem:[%s9121_s0 + $0x38] sm:$0xff]  ;;  %v6762_v47 = vand.u32 4294901760, %v142_v46  ;;  %v141_v48 = vld [vmem:[%s9127_s1 + $0x40] sm:$0xff] }
   0x6   :  { %v6695_v20 = vsub.f32 %v147_v8, %v6670_v11  ;;  %v6698_v21 = vsub.f32 %v146_v9, %v6672_v12  ;;  %v6701_v22 = vsub.f32 %v145_v13, %v6683_v16  ;;  %v38_v45 = vld [vmem:[%s9121_s0 + $0x18] sm:$0xff]  ;;  %v6771_v50 = vand.u32 4294901760, %v141_v48  ;;  %v139_v52 = vld [vmem:[%s9127_s1 + $0x30] sm:$0xff]  ;;  %v138_v61 = vld [vmem:[%s9127_s1 + $0x28] sm:$0xff] }
   0x7   :  { %v6704_v23 = vsub.f32 %v144_v14, %v6685_v17  ;;  %v248_v24 = vand.u32 4294901760, %v6692_v19  ;;  %v6712_v28 = vsub.f32 %v143_v15, %v6687_v18  ;;  %152 = vmatpush.msra.mxu0 %v6670_v11  ;;  %6441 = vmatpush.msra.mxu2 %v6670_v11  ;;  %v6769_v49 = vsub.f32 %v142_v46, %v6762_v47  ;;  %v140_v51 = vld [vmem:[%s9127_s1 + $0x38] sm:$0xff] }
   0x8   :  { %v254_v25 = vand.u32 4294901760, %v6695_v20  ;;  %v260_v26 = vand.u32 4294901760, %v6698_v21  ;;  %v266_v27 = vand.u32 4294901760, %v6701_v22  ;;  %v6783_v54 = vsub.f32 %v141_v48, %v6771_v50  ;;  %v136_v9 = vld [vmem:[%s9127_s1 + $0x18] sm:$0xff] }
   0x9   :  { %v249_v29 = vsub.f32 %v6692_v19, %v248_v24  ;;  %v272_v32 = vand.u32 4294901760, %v6704_v23  ;;  %154 = vmatpush.msra.mxu0 %v6672_v12  ;;  %v278_v37 = vand.u32 4294901760, %v6712_v28  ;;  %6442 = vmatpush.msra.mxu2 %v6672_v12  ;;  %v284_v53 = vand.u32 4294901760, %v6769_v49 }
   0xa   :  { %6496 = vset.pattern.permute.xlu1 %v6579_v4  ;;  %6494 = vset.pattern.permute.xlu0 %v6579_v4  ;;  %v255_v30 = vsub.f32 %v6695_v20, %v254_v25  ;;  %v261_v31 = vsub.f32 %v6698_v21, %v260_v26  ;;  %v267_v36 = vsub.f32 %v6701_v22, %v266_v27  ;;  %v6785_v55 = vand.u32 4294901760, %v140_v51 }
   0xb   :  { %93 = vperm.xlu1 %6496, %v40_v1   ;;  %90 = vperm.xlu0 %6494, %v39_v2   ;;  %v250_v33 = vand.u32 4294901760, %v249_v29  ;;  %v273_v39 = vsub.f32 %v6704_v23, %v272_v32  ;;  %v279_v42 = vsub.f32 %v6712_v28, %v278_v37  ;;  %v6787_v56 = vand.u32 4294901760, %v139_v52 }
   0xc   :  { %6498 = vset.pattern.permute.xlu2 %v6579_v4  ;;  %v256_v35 = vand.u32 4294901760, %v255_v30  ;;  %156 = vmatpush.msra.mxu0 %v6683_v16  ;;  %v262_v38 = vand.u32 4294901760, %v261_v31  ;;  %v268_v41 = vand.u32 4294901760, %v267_v36  ;;  %v285_v57 = vsub.f32 %v6769_v49, %v284_v53  ;;  %v135_v31 = vld [vmem:[%s9127_s1 + $0x10] sm:$0xff] }
   0xd   :  { %78 = vperm.xlu2 %6498, %v35_v3   ;;  %251 = vmatpush.msra.mxu1 %v250_v33  ;;  %v274_v43 = vand.u32 4294901760, %v273_v39  ;;  %v280_v44 = vand.u32 4294901760, %v279_v42  ;;  %v290_v58 = vand.u32 4294901760, %v6783_v54  ;;  %v6796_v59 = vsub.f32 %v140_v51, %v6785_v55  ;;  %v137_v3 = vld [vmem:[%s9127_s1 + $0x20] sm:$0xff] }
   0xe   :  { %6456 = vmatpush.msra.mxu3 %v250_v33  ;;  %158 = vmatpush.msra.mxu0 %v6685_v17  ;;  %v6799_v60 = vsub.f32 %v139_v52, %v6787_v56  ;;  %v286_v62 = vand.u32 4294901760, %v285_v57  ;;  %v6812_v2 = vand.u32 4294901760, %v138_v61  ;;  %v6823_v7 = vand.u32 4294901760, %v137_v3 }
   0xf   :  { %257 = vmatpush.msra.mxu1 %v256_v35  ;;  %6443 = vmatpush.msra.mxu2 %v6683_v16  ;;  %v291_v63 = vsub.f32 %v6783_v54, %v290_v58  ;;  %v6836_v29 = vand.u32 4294901760, %v136_v9 }
  0x10   :  { %6457 = vmatpush.msra.mxu3 %v256_v35  ;;  %160 = vmatpush.msra.mxu0 %v6687_v18  ;;  %v302_v1 = vand.u32 4294901760, %v6799_v60  ;;  %v6827_v8 = vsub.f32 %v138_v61, %v6812_v2  ;;  %v6834_v15 = vsub.f32 %v137_v3, %v6823_v7  ;;  %v6848_v35 = vand.u32 4294901760, %v135_v31 }
  0x11   :  { %263 = vmatpush.msra.mxu1 %v262_v38  ;;  %6444 = vmatpush.msra.mxu2 %v6685_v17 }
  0x12   :  { %6458 = vmatpush.msra.mxu3 %v262_v38  ;;  %162 = vmatpush.msra.mxu0 %v6762_v47  ;;  %v308_v30 = vand.u32 4294901760, %v6827_v8  ;;  %v314_v33 = vand.u32 4294901760, %v6834_v15  ;;  %v134_v38 = vld [vmem:[%s9127_s1 + $0x8] sm:$0xff] }
  0x13   :  { %6499 = vset.pattern.permute.xlu1 %v6578_v0  ;;  %6500 = vset.pattern.permute.xlu0 %v6578_v0  ;;  %v6865_v42 = vand.u32 4294901760, %v134_v38 }
  0x14   :  { %64 = vperm.xlu1 %6499, %v41_v5   ;;  %49 = vperm.xlu0 %6500, %v36_v6   ;;  %v309_v36 = vsub.f32 %v6827_v8, %v308_v30  ;;  %v315_v39 = vsub.f32 %v6834_v15, %v314_v33 }
  0x15   :  { %96 = vperm.xlu2 %6498, %v41_v5   ;;  %269 = vmatpush.msra.mxu1 %v268_v41  ;;  %v6877_v51 = vsub.f32 %v134_v38, %v6865_v42 }
  0x16   :  { %6459 = vmatpush.msra.mxu3 %v268_v41  ;;  %6445 = vmatpush.msra.mxu2 %v6687_v18  ;;  %v6863_v41 = vsub.f32 %v135_v31, %v6848_v35 }
  0x17   :  { %275 = vmatpush.msra.mxu1 %v274_v43  ;;  %164 = vmatpush.msra.mxu0 %v6771_v50 }
  0x18   :  { %6460 = vmatpush.msra.mxu3 %v274_v43  ;;  %6446 = vmatpush.msra.mxu2 %v6762_v47  ;;  %v310_v43 = vand.u32 4294901760, %v309_v36  ;;  %v326_v48 = vand.u32 4294901760, %v6863_v41 }
  0x19   :  { %281 = vmatpush.msra.mxu1 %v280_v44  ;;  %166 = vmatpush.msra.mxu0 %v6785_v55 }
  0x1a   :  { %6461 = vmatpush.msra.mxu3 %v280_v44  ;;  %6447 = vmatpush.msra.mxu2 %v6771_v50  ;;  %v133_v44 = vld [vmem:[%s9127_s1] sm:$0xff]  ;;  %v327_v61 = vsub.f32 %v6863_v41, %v326_v48 }
  0x1b   :  { %168 = vmatpush.msra.mxu0 %v6787_v56  ;;  %287 = vmatpush.msra.mxu1 %v286_v62  ;;  %v6879_v52 = vand.u32 4294901760, %v133_v44 }
  0x1c   :  { %6501 = vset.pattern.permute.xlu1 %v6579_v4  ;;  %6503 = vset.pattern.permute.xlu0 %v6579_v4  ;;  %v328_v3 = vand.u32 4294901760, %v327_v61 }
  0x1d   :  { %81 = vperm.xlu1 %6501, %v36_v6   ;;  %84 = vperm.xlu0 %6503, %v37_v34   ;;  %v303_v6 = vsub.f32 %v6799_v60, %v302_v1 }
  0x1e   :  { %6502 = vset.pattern.permute.xlu2 %v6578_v0  ;;  %6448 = vmatpush.msra.mxu2 %v6785_v55 }
  0x1f   :  { %67 = vperm.xlu2 %6502, %v42_v40   ;;  %6462 = vmatpush.msra.mxu3 %v286_v62  ;;  %v304_v14 = vand.u32 4294901760, %v303_v6  ;;  %v332_v62 = vand.u32 4294901760, %v6877_v51 }
  0x20   :  { %6449 = vmatpush.msra.mxu2 %v6787_v56  ;;  %170 = vmatpush.msra.mxu0 %v6812_v2 }
  0x22   :  { %6450 = vmatpush.msra.mxu2 %v6812_v2  ;;  %172 = vmatpush.msra.mxu0 %v6823_v7 }
  0x24   :  { %6451 = vmatpush.msra.mxu2 %v6823_v7  ;;  %174 = vmatpush.msra.mxu0 %v6836_v29 }
  0x25   :  { %99 = vperm.xlu1 %6501, %v42_v40  }
  0x26   :  { %6452 = vmatpush.msra.mxu2 %v6836_v29  ;;  %176 = vmatpush.msra.mxu0 %v6848_v35 }
  0x27   :  { %52 = vperm.xlu2 %6502, %v37_v34   ;;  %v6846_v34 = vsub.f32 %v136_v9, %v6836_v29 }
  0x28   :  { %6453 = vmatpush.msra.mxu2 %v6848_v35  ;;  %178 = vmatpush.msra.mxu0 %v6865_v42 }
  0x29   :  { %v320_v40 = vand.u32 4294901760, %v6846_v34 }
  0x2a   :  { %6454 = vmatpush.msra.mxu2 %v6865_v42  ;;  %180 = vmatpush.msra.mxu0 %v6879_v52 }
  0x2b   :  { %v321_v46 = vsub.f32 %v6846_v34, %v320_v40 }
  0x2c   :  { %6455 = vmatpush.msra.mxu2 %v6879_v52  ;;  %548 = vmatpush.msrb.mxu0 %v248_v24 }
  0x2d   :  { %6504 = vset.pattern.permute.xlu1 %v6578_v0  ;;  %v296_v0 = vand.u32 4294901760, %v6796_v59  ;;  %v322_v57 = vand.u32 4294901760, %v321_v46 }
  0x2e   :  { %55 = vperm.xlu1 %6504, %v38_v45   ;;  %377 = vmatpush.msrb.mxu2 %v6692_v19  ;;  %v43_v19 = vlaneseq }
  0x2f   :  { %6505 = vset.pattern.permute.xlu2 %v6579_v4  ;;  %v292_v4 = vand.u32 4294901760, %v291_v63  ;;  %v297_v5 = vsub.f32 %v6796_v59, %v296_v0  ;;  %v6888_v63 = vsub.f32 %v133_v44, %v6879_v52  ;;  %552 = vmatpush.msrb.mxu0 %v254_v25 }
  0x30   :  { %87 = vperm.xlu2 %6505, %v38_v45   ;;  %v316_v45 = vand.u32 4294901760, %v315_v39  ;;  %380 = vmatpush.msrb.mxu2 %v6695_v20 }
  0x31   :  { %293 = vmatpush.msra.mxu1 %v292_v4  ;;  %v298_v13 = vand.u32 4294901760, %v297_v5  ;;  %6463 = vmatpush.msra.mxu3 %v292_v4  ;;  %v333_v4 = vsub.f32 %v6877_v51, %v332_v62  ;;  %v338_v5 = vand.u32 4294901760, %v6888_v63 }
  0x32   :  { %383 = vmatpush.msrb.mxu2 %v6698_v21  ;;  %556 = vmatpush.msrb.mxu0 %v260_v26 }
  0x33   :  { %299 = vmatpush.msra.mxu1 %v298_v13  ;;  %6464 = vmatpush.msra.mxu3 %v298_v13  ;;  %v334_v6 = vand.u32 4294901760, %v333_v4  ;;  %v339_v9 = vsub.f32 %v6888_v63, %v338_v5 }
  0x34   :  { %386 = vmatpush.msrb.mxu2 %v6701_v22  ;;  %560 = vmatpush.msrb.mxu0 %v266_v27 }
  0x35   :  { %305 = vmatpush.msra.mxu1 %v304_v14  ;;  %6465 = vmatpush.msra.mxu3 %v304_v14  ;;  %v340_v13 = vand.u32 4294901760, %v339_v9 }
  0x36   :  { %389 = vmatpush.msrb.mxu2 %v6704_v23  ;;  %564 = vmatpush.msrb.mxu0 %v272_v32 }
  0x37   :  { %311 = vmatpush.msra.mxu1 %v310_v43  ;;  %6466 = vmatpush.msra.mxu3 %v310_v43 }
  0x38   :  { %392 = vmatpush.msrb.mxu2 %v6712_v28  ;;  %568 = vmatpush.msrb.mxu0 %v278_v37 }
  0x39   :  { %317 = vmatpush.msra.mxu1 %v316_v45  ;;  %6467 = vmatpush.msra.mxu3 %v316_v45 }
  0x3a   :  { %395 = vmatpush.msrb.mxu2 %v6769_v49  ;;  %572 = vmatpush.msrb.mxu0 %v284_v53 }
  0x3b   :  { %323 = vmatpush.msra.mxu1 %v322_v57  ;;  %6468 = vmatpush.msra.mxu3 %v322_v57 }
  0x3c   :  { %398 = vmatpush.msrb.mxu2 %v6783_v54  ;;  %576 = vmatpush.msrb.mxu0 %v290_v58 }
  0x3d   :  { %329 = vmatpush.msra.mxu1 %v328_v3  ;;  %6469 = vmatpush.msra.mxu3 %v328_v3 }
  0x3e   :  { %401 = vmatpush.msrb.mxu2 %v6796_v59  ;;  %580 = vmatpush.msrb.mxu0 %v296_v0 }
  0x3f   :  { %335 = vmatpush.msra.mxu1 %v334_v6  ;;  %6470 = vmatpush.msra.mxu3 %v334_v6 }
  0x40   :  { %404 = vmatpush.msrb.mxu2 %v6799_v60  ;;  %584 = vmatpush.msrb.mxu0 %v302_v1 }
  0x41   :  { %341 = vmatpush.msra.mxu1 %v340_v13  ;;  %6471 = vmatpush.msra.mxu3 %v340_v13 }
  0x42   :  { %407 = vmatpush.msrb.mxu2 %v6827_v8  ;;  %588 = vmatpush.msrb.mxu0 %v308_v30 }
  0x43   :  { %465 = vmatpush.msrb.mxu3 %v6668_v10  ;;  %643 = vmatpush.msrb.mxu1 %v6668_v10  ;;  %v6928_v10 = vand.u32 127, %v43_v19 }
  0x44   :  { %410 = vmatpush.msrb.mxu2 %v6834_v15  ;;  %592 = vmatpush.msrb.mxu0 %v314_v33 }
  0x45   :  { %467 = vmatpush.msrb.mxu3 %v6670_v11  ;;  %645 = vmatpush.msrb.mxu1 %v6670_v11 }
  0x46   :  { %413 = vmatpush.msrb.mxu2 %v6846_v34  ;;  %596 = vmatpush.msrb.mxu0 %v320_v40 }
  0x47   :  { %469 = vmatpush.msrb.mxu3 %v6672_v12  ;;  %647 = vmatpush.msrb.mxu1 %v6672_v12  ;;  %v721_v12 = vld [vmem:[%s9128_s2 + $0x70] sm:$0xff] }
  0x48   :  { %416 = vmatpush.msrb.mxu2 %v6863_v41  ;;  %600 = vmatpush.msrb.mxu0 %v326_v48 }
  0x49   :  { %471 = vmatpush.msrb.mxu3 %v6683_v16  ;;  %649 = vmatpush.msrb.mxu1 %v6683_v16  ;;  %v6580_v16 = vmov 0.0  }
  0x4a   :  { %419 = vmatpush.msrb.mxu2 %v6877_v51  ;;  %604 = vmatpush.msrb.mxu0 %v332_v62 }
  0x4b   :  { %473 = vmatpush.msrb.mxu3 %v6685_v17  ;;  %651 = vmatpush.msrb.mxu1 %v6685_v17 }
  0x4c   :  { %422 = vmatpush.msrb.mxu2 %v6888_v63  ;;  %608 = vmatpush.msrb.mxu0 %v338_v5 }
  0x4d   :  { %475 = vmatpush.msrb.mxu3 %v6687_v18  ;;  %653 = vmatpush.msrb.mxu1 %v6687_v18  ;;  %v6581_v18 = vmov 1.0  }
  0x4f   :  { %477 = vmatpush.msrb.mxu3 %v6762_v47  ;;  %655 = vmatpush.msrb.mxu1 %v6762_v47 }
  0x51   :  { %479 = vmatpush.msrb.mxu3 %v6771_v50  ;;  %657 = vmatpush.msrb.mxu1 %v6771_v50 }
  0x53   :  { %481 = vmatpush.msrb.mxu3 %v6785_v55  ;;  %659 = vmatpush.msrb.mxu1 %v6785_v55 }
  0x55   :  { %483 = vmatpush.msrb.mxu3 %v6787_v56  ;;  %661 = vmatpush.msrb.mxu1 %v6787_v56 }
  0x57   :  { %485 = vmatpush.msrb.mxu3 %v6812_v2  ;;  %663 = vmatpush.msrb.mxu1 %v6812_v2 }
  0x59   :  { %487 = vmatpush.msrb.mxu3 %v6823_v7  ;;  %665 = vmatpush.msrb.mxu1 %v6823_v7 }
  0x5b   :  { %489 = vmatpush.msrb.mxu3 %v6836_v29  ;;  %667 = vmatpush.msrb.mxu1 %v6836_v29 }
  0x5d   :  { %491 = vmatpush.msrb.mxu3 %v6848_v35  ;;  %669 = vmatpush.msrb.mxu1 %v6848_v35 }
  0x5e   :  { %v47_v20 = vpop.permute.xlu2 %46 }
  0x5f   :  { %vm69_vm0 = vcmp.eq.s32.totalorder %v6928_v10, %v47_v20  ;;  %493 = vmatpush.msrb.mxu3 %v6865_v42  ;;  %671 = vmatpush.msrb.mxu1 %v6865_v42 }
  0x61   :  { %495 = vmatpush.msrb.mxu3 %v6879_v52  ;;  %673 = vmatpush.msrb.mxu1 %v6879_v52 }
  0x67   :  { %v79_v11 = vpop.permute.xlu2 %78 }
  0x68   :  { %vm101_vm1 = vcmp.eq.s32.totalorder %v6928_v10, %v79_v11 }
  0x69   :  { %vm6949_vm2 = vmor %vm69_vm0, %vm101_vm1 }
  0x6a   :  { %v6393_v17 = vsel %vm6949_vm2, 1.0, %v6580_v16  ;;  %6401 = vmatmul.msk.f32.vlgmr.msra.gmra.mxu1 %vm6949_vm2, %v6581_v18 }
  0x6b   :  { %v6963_v21 = vsub.f32 %v6393_v17, %v6393_v17 }
  0x6d   :  { %v183_v22 = vand.u32 4294901760, %v6963_v21 }
  0x6f   :  { %v184_v23 = vsub.f32 %v6963_v21, %v183_v22  ;;  %v97_v27 = vpop.permute.xlu2 %96 }
  0x70   :  { %vm107_vm9 = vcmp.eq.s32.totalorder %v6928_v10, %v97_v27  ;;  %v717_v27 = vld [vmem:[%s9128_s2 + $0x50] sm:$0xff] }
  0x71   :  { %v185_v24 = vand.u32 4294901760, %v184_v23 }
  0x73   :  { %186 = vmatmul.f32.vlgmr.msra.gmra.mxu0 %v185_v24 }
  0x74   :  { %v62_v25 = vpop.permute.xlu1 %61  ;;  %v59_v26 = vpop.permute.xlu0 %58 }
  0x75   :  { %vm74_vm3 = vcmp.eq.s32.totalorder %v6928_v10, %v62_v25  ;;  %vm73_vm6 = vcmp.eq.s32.totalorder %v6928_v10, %v59_v26 }
  0x79   :  { %v68_v54 = vpop.permute.xlu2 %67 }
  0x7d   :  { %v94_v28 = vpop.permute.xlu1 %93  ;;  %v91_v32 = vpop.permute.xlu0 %90 }
  0x7e   :  { %vm106_vm4 = vcmp.eq.s32.totalorder %v6928_v10, %v94_v28  ;;  %vm105_vm5 = vcmp.eq.s32.totalorder %v6928_v10, %v91_v32  ;;  %v7190_v32 = vand.u32 4294901760, %v717_v27 }
  0x7f   :  { %vm7003_vm7 = vmor %vm74_vm3, %vm106_vm4  ;;  %vm76_vm3 = vcmp.eq.s32.totalorder %v6928_v10, %v68_v54 }
  0x80   :  { %vm7007_vm8 = vmor %vm73_vm6, %vm105_vm5  ;;  %v6398_v49 = vsel %vm7003_vm7, 1.0, %v6580_v16  ;;  %v7199_v47 = vsub.f32 %v717_v27, %v7190_v32  ;;  %v722_v27 = vld [vmem:[%s9128_s2 + $0x78] sm:$0xff] }
  0x81   :  { %v6397_v50 = vsel %vm7007_vm8, 1.0, %v6580_v16  ;;  %6405 = vmatmul.msk.f32.vlgmr.msra.gmra.mxu3 %vm7007_vm8, %v6581_v18  ;;  %v7022_v55 = vsub.f32 %v6398_v49, %v6398_v49  ;;  %v53_v14 = vpop.permute.xlu2 %52 }
  0x82   :  { %v7020_v53 = vsub.f32 %v6397_v50, %v6397_v50  ;;  %vm71_vm13 = vcmp.eq.s32.totalorder %v6928_v10, %v53_v14  ;;  %v865_v49 = vand.u32 4294901760, %v7199_v47  ;;  %v715_v50 = vld [vmem:[%s9128_s2 + $0x40] sm:$0xff] }
  0x83   :  { %v223_v2 = vand.u32 4294901760, %v7022_v55  ;;  %v7207_v54 = vand.u32 4294901760, %v715_v50 }
  0x84   :  { %v215_v56 = vand.u32 4294901760, %v7020_v53 }
  0x85   :  { %v224_v15 = vsub.f32 %v7022_v55, %v223_v2 }
  0x86   :  { %v65_v58 = vpop.permute.xlu1 %64  ;;  %v50_v59 = vpop.permute.xlu0 %49  ;;  %v216_v60 = vsub.f32 %v7020_v53, %v215_v56 }
  0x87   :  { %vm75_vm10 = vcmp.eq.s32.totalorder %v6928_v10, %v65_v58  ;;  %vm70_vm12 = vcmp.eq.s32.totalorder %v6928_v10, %v50_v59  ;;  %v225_v31 = vand.u32 4294901760, %v224_v15  ;;  %v713_v59 = vld [vmem:[%s9128_s2 + $0x30] sm:$0xff] }
  0x88   :  { %vm7030_vm11 = vmor %vm75_vm10, %vm107_vm9  ;;  %v217_v1 = vand.u32 4294901760, %v216_v60  ;;  %v7215_v0 = vand.u32 4294901760, %v713_v59 }
  0x89   :  { %v6399_v7 = vsel %vm7030_vm11, 1.0, %v6580_v16  ;;  %6406 = vmatmul.msk.f32.gmra.mxu3 %vm7003_vm7, %v6581_v18 }
  0x8a   :  { %218 = vmatmul.f32.vlgmr.msra.gmra.mxu2 %v217_v1  ;;  %v7041_v8 = vsub.f32 %v6399_v7, %v6399_v7  ;;  %v88_v61 = vpop.permute.xlu2 %87  ;;  %v876_v7 = vsub.f32 %v713_v59, %v7215_v0 }
  0x8b   :  { %vm104_vm6 = vcmp.eq.s32.totalorder %v6928_v10, %v88_v61 }
  0x8c   :  { %v231_v33 = vand.u32 4294901760, %v7041_v8 }
  0x8e   :  { %v232_v40 = vsub.f32 %v7041_v8, %v231_v33 }
  0x8f   :  { %v82_v29 = vpop.permute.xlu1 %81  ;;  %v85_v30 = vpop.permute.xlu0 %84 }
  0x90   :  { %vm102_vm14 = vcmp.eq.s32.totalorder %v6928_v10, %v82_v29  ;;  %vm103_vm15 = vcmp.eq.s32.totalorder %v6928_v10, %v85_v30  ;;  %v233_v45 = vand.u32 4294901760, %v232_v40  ;;  %v711_v30 = vld [vmem:[%s9128_s2 + $0x20] sm:$0xff] }
  0x91   :  { %vm7051_vm0 = vmor %vm70_vm12, %vm102_vm14  ;;  %6407 = vmatmul.msk.f32.gmra.mxu3 %vm7030_vm11, %v6581_v18  ;;  %v707_v40 = vld [vmem:[%s9128_s2] sm:$0xff] }
  0x92   :  { %v6394_v35 = vsel %vm7051_vm0, 1.0, %v6580_v16  ;;  %vm7061_vm1 = vmor %vm71_vm13, %vm103_vm15  ;;  %226 = vmatmul.f32.gmra.mxu2 %v225_v31  ;;  %6402 = vmatmul.msk.f32.gmra.mxu1 %vm7051_vm0, %v6581_v18 }
  0x93   :  { %v190_v38 = vsub.f32 %v6394_v35, %v6394_v35  ;;  %v6395_v39 = vsel %vm7061_vm1, 1.0, %v6580_v16  ;;  %v709_v35 = vld [vmem:[%s9128_s2 + $0x10] sm:$0xff] }
  0x94   :  { %v198_v41 = vsub.f32 %v6395_v39, %v6395_v39 }
  0x95   :  { %v191_v42 = vand.u32 4294901760, %v190_v38 }
  0x96   :  { %v199_v51 = vand.u32 4294901760, %v198_v41 }
  0x97   :  { %v100_v43 = vpop.permute.xlu1 %99  ;;  %v192_v44 = vsub.f32 %v190_v38, %v191_v42 }
  0x98   :  { %vm108_vm4 = vcmp.eq.s32.totalorder %v6928_v10, %v100_v43  ;;  %v200_v62 = vsub.f32 %v198_v41, %v199_v51 }
  0x99   :  { %vm7076_vm5 = vmor %vm76_vm3, %vm108_vm4  ;;  %v193_v48 = vand.u32 4294901760, %v192_v44  ;;  %v776_v44 = vand.u32 4294901760, %v707_v40 }
  0x9a   :  { %v6400_v52 = vsel %vm7076_vm5, 1.0, %v6580_v16  ;;  %234 = vmatmul.f32.gmra.mxu2 %v233_v45  ;;  %6403 = vmatmul.msk.f32.gmra.mxu1 %vm7061_vm1, %v6581_v18  ;;  %v201_v5 = vand.u32 4294901760, %v200_v62 }
  0x9b   :  { %v238_v57 = vsub.f32 %v6400_v52, %v6400_v52  ;;  %6408 = vmatmul.msk.f32.gmra.mxu3 %vm7076_vm5, %v6581_v18  ;;  %194 = vmatmul.f32.gmra.mxu0 %v193_v48  ;;  %v894_v48 = vsub.f32 %v707_v40, %v776_v44 }
  0x9d   :  { %v239_v63 = vand.u32 4294901760, %v238_v57 }
  0x9f   :  { %v240_v3 = vsub.f32 %v238_v57, %v239_v63 }
  0xa0   :  { %v56_v4 = vpop.permute.xlu1 %55 }
  0xa1   :  { %vm72_vm9 = vcmp.eq.s32.totalorder %v6928_v10, %v56_v4  ;;  %v241_v6 = vand.u32 4294901760, %v240_v3 }
  0xa2   :  { %vm7091_vm10 = vmor %vm72_vm9, %vm104_vm6 }
  0xa3   :  { %v6396_v13 = vsel %vm7091_vm10, 1.0, %v6580_v16  ;;  %499 = vmatmul.f32.vlgmr.msrb.gmra.mxu3 %v183_v22  ;;  %202 = vmatmul.f32.gmra.mxu0 %v201_v5  ;;  %v7139_v16 = vand.u32 4294901760, %v721_v12  ;;  %v719_v22 = vld [vmem:[%s9128_s2 + $0x60] sm:$0xff] }
  0xa4   :  { %v206_v19 = vsub.f32 %v6396_v13, %v6396_v13  ;;  %242 = vmatmul.f32.gmra.mxu2 %v241_v6  ;;  %6404 = vmatmul.msk.f32.gmra.mxu1 %vm7091_vm10, %v6581_v18  ;;  %v7173_v23 = vand.u32 4294901760, %v719_v22 }
  0xa5   :  { %v7148_v17 = vsub.f32 %v721_v12, %v7139_v16  ;;  %763 = vmatpush.msra.mxu2 %v7139_v16  ;;  %1014 = vmatpush.msra.mxu1 %v7139_v16 }
  0xa6   :  { %v207_v20 = vand.u32 4294901760, %v206_v19  ;;  %v7184_v26 = vsub.f32 %v719_v22, %v7173_v23 }
  0xa7   :  { %942 = vmatpush.msra.mxu0 %v7148_v17  ;;  %765 = vmatpush.msra.mxu2 %v7173_v23 }
  0xa8   :  { %v208_v10 = vsub.f32 %v206_v19, %v207_v20  ;;  %1016 = vmatpush.msra.mxu1 %v7173_v23  ;;  %v859_v28 = vand.u32 4294901760, %v7184_v26 }
  0xa9   :  { %945 = vmatpush.msra.mxu0 %v7184_v26  ;;  %767 = vmatpush.msra.mxu2 %v7190_v32 }
  0xaa   :  { %v209_v11 = vand.u32 4294901760, %v208_v10  ;;  %v860_v37 = vsub.f32 %v7184_v26, %v859_v28  ;;  %1018 = vmatpush.msra.mxu1 %v7190_v32 }
  0xab   :  { %505 = vmatmul.f32.gmra.mxu3 %v191_v42  ;;  %948 = vmatpush.msra.mxu0 %v7199_v47 }
  0xac   :  { %425 = vmatmul.f32.vlgmr.msrb.gmra.mxu2 %v6963_v21  ;;  %6417 = vmatmul.msk.f32.vlgmr.msrb.gmra.mxu1 %vm6949_vm2, %v6581_v18  ;;  %v853_v21 = vand.u32 4294901760, %v7148_v17 }
  0xad   :  { %210 = vmatmul.f32.gmra.mxu0 %v209_v11  ;;  %769 = vmatpush.msra.mxu2 %v7207_v54 }
  0xae   :  { %v854_v24 = vsub.f32 %v7148_v17, %v853_v21  ;;  %1020 = vmatpush.msra.mxu1 %v7207_v54 }
  0xaf   :  { %771 = vmatpush.msra.mxu2 %v7215_v0 }
  0xb0   :  { %v855_v25 = vand.u32 4294901760, %v854_v24  ;;  %1022 = vmatpush.msra.mxu1 %v7215_v0 }
  0xb2   :  { %856 = vmatpush.msra.mxu3 %v855_v25 }
  0xb3   :  { %511 = vmatmul.f32.gmra.mxu3 %v199_v51 }
  0xb4   :  { %430 = vmatmul.f32.gmra.mxu2 %v190_v38  ;;  %6418 = vmatmul.msk.f32.gmra.mxu1 %vm7051_vm0, %v6581_v18  ;;  %v774_v38 = vand.u32 4294901760, %v709_v35 }
  0xb5   :  { %6409 = vmatmul.msk.f32.vlgmr.msrb.gmra.mxu0 %vm6949_vm2, %v6581_v18  ;;  %vm729_vm2 = vcmask 523264  }
  0xb6   :  { %v888_v43 = vsub.f32 %v709_v35, %v774_v38 }
  0xb8   :  { %v889_v46 = vand.u32 4294901760, %v888_v43 }
  0xba   :  { %v890_v52 = vsub.f32 %v888_v43, %v889_v46 }
  0xbb   :  { %517 = vmatmul.f32.gmra.mxu3 %v207_v20 }
  0xbc   :  { %435 = vmatmul.f32.gmra.mxu2 %v198_v41  ;;  %6419 = vmatmul.msk.f32.gmra.mxu1 %vm7061_vm1, %v6581_v18 }
  0xbd   :  { %6410 = vmatmul.msk.f32.gmra.mxu0 %vm7051_vm0, %v6581_v18 }
  0xc3   :  { %523 = vmatmul.f32.gmra.mxu3 %v215_v56  ;;  %v870_v56 = vsub.f32 %v715_v50, %v7207_v54 }
  0xc4   :  { %440 = vmatmul.f32.gmra.mxu2 %v206_v19  ;;  %6420 = vmatmul.msk.f32.gmra.mxu1 %vm7091_vm10, %v6581_v18 }
  0xc5   :  { %6411 = vmatmul.msk.f32.gmra.mxu0 %vm7061_vm1, %v6581_v18  ;;  %v871_v58 = vand.u32 4294901760, %v870_v56 }
  0xc6   :  { %951 = vmatpush.msra.mxu0 %v870_v56 }
  0xc7   :  { %v872_v60 = vsub.f32 %v870_v56, %v871_v58 }
  0xc8   :  { %954 = vmatpush.msra.mxu0 %v876_v7 }
  0xcb   :  { %529 = vmatmul.f32.gmra.mxu3 %v223_v2  ;;  %v873_v2 = vand.u32 4294901760, %v872_v60 }
  0xcc   :  { %445 = vmatmul.f32.gmra.mxu2 %v7020_v53  ;;  %6421 = vmatmul.msk.f32.gmra.mxu1 %vm7007_vm8, %v6581_v18  ;;  %v866_v53 = vsub.f32 %v7199_v47, %v865_v49 }
  0xcd   :  { %6412 = vmatmul.msk.f32.gmra.mxu0 %vm7091_vm10, %v6581_v18 }
  0xd3   :  { %535 = vmatmul.f32.gmra.mxu3 %v231_v33  ;;  %v772_v33 = vand.u32 4294901760, %v711_v30 }
  0xd4   :  { %450 = vmatmul.f32.gmra.mxu2 %v7022_v55  ;;  %6422 = vmatmul.msk.f32.gmra.mxu1 %vm7003_vm7, %v6581_v18  ;;  %v867_v55 = vand.u32 4294901760, %v866_v53 }
  0xd5   :  { %6413 = vmatmul.msk.f32.gmra.mxu0 %vm7007_vm8, %v6581_v18  ;;  %773 = vmatpush.msra.mxu2 %v772_v33  ;;  %v882_v36 = vsub.f32 %v711_v30, %v772_v33 }
  0xd6   :  { %1024 = vmatpush.msra.mxu1 %v772_v33 }
  0xd7   :  { %v883_v42 = vand.u32 4294901760, %v882_v36  ;;  %775 = vmatpush.msra.mxu2 %v774_v38  ;;  %957 = vmatpush.msra.mxu0 %v882_v36 }
  0xd8   :  { %1026 = vmatpush.msra.mxu1 %v774_v38 }
  0xd9   :  { %v884_v45 = vsub.f32 %v882_v36, %v883_v42  ;;  %960 = vmatpush.msra.mxu0 %v888_v43  ;;  %777 = vmatpush.msra.mxu2 %v776_v44 }
  0xda   :  { %1028 = vmatpush.msra.mxu1 %v776_v44 }
  0xdb   :  { %541 = vmatmul.f32.gmra.mxu3 %v239_v63  ;;  %1089 = vmatpush.msrb.mxu2 %v853_v21  ;;  %v885_v51 = vand.u32 4294901760, %v884_v45  ;;  %v891_v63 = vand.u32 4294901760, %v890_v52  ;;  %v718_v52 = vld [vmem:[%s9128_s2 + $0x58] sm:$0xff] }
  0xdc   :  { %455 = vmatmul.f32.gmra.mxu2 %v7041_v8  ;;  %6423 = vmatmul.msk.f32.gmra.mxu1 %vm7030_vm11, %v6581_v18  ;;  %v877_v8 = vand.u32 4294901760, %v876_v7 }
  0xdd   :  { %6414 = vmatmul.msk.f32.gmra.mxu0 %vm7003_vm7, %v6581_v18  ;;  %1093 = vmatpush.msrb.mxu2 %v859_v28 }
  0xde   :  { %v878_v15 = vsub.f32 %v876_v7, %v877_v8  ;;  %963 = vmatpush.msra.mxu0 %v894_v48  ;;  %v720_v7 = vld [vmem:[%s9128_s2 + $0x68] sm:$0xff] }
  0xdf   :  { %1097 = vmatpush.msrb.mxu2 %v865_v49 }
  0xe0   :  { %v879_v29 = vand.u32 4294901760, %v878_v15  ;;  %v7287_v15 = vand.u32 4294901760, %v720_v7 }
  0xe1   :  { %1101 = vmatpush.msrb.mxu2 %v871_v58 }
  0xe2   :  { %v7296_v35 = vsub.f32 %v720_v7, %v7287_v15 }
  0xe3   :  { %1105 = vmatpush.msrb.mxu2 %v877_v8 }
  0xe4   :  { %460 = vmatmul.f32.gmra.mxu2 %v238_v57  ;;  %6424 = vmatmul.msk.f32.gmra.mxu1 %vm7076_vm5, %v6581_v18  ;;  %v895_v57 = vand.u32 4294901760, %v894_v48 }
  0xe5   :  { %6415 = vmatmul.msk.f32.gmra.mxu0 %vm7030_vm11, %v6581_v18  ;;  %1109 = vmatpush.msrb.mxu2 %v883_v42 }
  0xe6   :  { %v896_v3 = vsub.f32 %v894_v48, %v895_v57 }
  0xe7   :  { %v7222_v14 = vpop.f32.mrf.mxu1  ;;  %1113 = vmatpush.msrb.mxu2 %v889_v46 }
  0xe8   :  { %v897_v6 = vand.u32 4294901760, %v896_v3  ;;  %v7319_v3 = vand.u32 4294901760, %v718_v52 }
  0xe9   :  { %1117 = vmatpush.msrb.mxu2 %v895_v57 }
  0xed   :  { %6416 = vmatmul.msk.f32.gmra.mxu0 %vm7076_vm5, %v6581_v18  ;;  %v861_v18 = vand.u32 4294901760, %v860_v37 }
  0xef   :  { %862 = vmatpush.msra.mxu3 %v861_v18 }
  0xf0   :  { %v187_v41 = vpop.f32.mrf.mxu0 }
  0xf1   :  { %868 = vmatpush.msra.mxu3 %v867_v55  ;;  %v345_v17 = vadd.f32 %v7222_v14, %v187_v41  ;;  %v1313_v41 = vand.u32 4294901760, %v7296_v35 }
  0xf3   :  { %874 = vmatpush.msra.mxu3 %v873_v2  ;;  %v1314_v48 = vsub.f32 %v7296_v35, %v1313_v41 }
  0xf5   :  { %880 = vmatpush.msra.mxu3 %v879_v29 }
  0xf7   :  { %886 = vmatpush.msra.mxu3 %v885_v51 }
  0xf9   :  { %892 = vmatpush.msra.mxu3 %v891_v63  ;;  %v1315_v63 = vand.u32 4294901760, %v1314_v48 }
  0xfb   :  { %898 = vmatpush.msra.mxu3 %v897_v6 }
  0xfd   :  { %1160 = vmatpush.msrb.mxu3 %v7139_v16 }
  0xff   :  { %1162 = vmatpush.msrb.mxu3 %v7173_v23 }
 0x101   :  { %1164 = vmatpush.msrb.mxu3 %v7190_v32  ;;  %v7266_v32 = vand.u32 4294901760, %v722_v27 }
 0x103   :  { %1166 = vmatpush.msrb.mxu3 %v7207_v54  ;;  %1217 = vmatpush.msrb.mxu0 %v7266_v32  ;;  %v7271_v47 = vsub.f32 %v722_v27, %v7266_v32 }
 0x104   :  { %v7217_v1 = vpop.f32.mrf.mxu3 }
 0x105   :  { %1168 = vmatpush.msrb.mxu3 %v7215_v0  ;;  %v1307_v55 = vand.u32 4294901760, %v7271_v47  ;;  %1219 = vmatpush.msrb.mxu0 %v7287_v15 }
 0x107   :  { %1170 = vmatpush.msrb.mxu3 %v772_v33  ;;  %v1308_v60 = vsub.f32 %v7271_v47, %v1307_v55  ;;  %1221 = vmatpush.msrb.mxu0 %v7319_v3 }
 0x109   :  { %1172 = vmatpush.msrb.mxu3 %v774_v38  ;;  %v1309_v14 = vand.u32 4294901760, %v1308_v60 }
 0x10b   :  { %1174 = vmatpush.msrb.mxu3 %v776_v44  ;;  %1310 = vmatpush.msrb.mxu1 %v1309_v14 }
 0x10c   :  { %v7227_v31 = vpop.f32.mrf.mxu3 }
 0x10d   :  { %v7229_v34 = vpop.f32.mrf.mxu2  ;;  %1316 = vmatpush.msrb.mxu1 %v1315_v63 }
 0x10f   :  { %v7234_v39 = vpop.f32.mrf.mxu1 }
 0x114   :  { %v7245_v62 = vpop.f32.mrf.mxu3 }
 0x115   :  { %v7241_v61 = vpop.f32.mrf.mxu2 }
 0x117   :  { %v352_v4 = vpop.f32.mrf.mxu1 }
 0x118   :  { %v195_v5 = vpop.f32.mrf.mxu0 }
 0x119   :  { %v349_v37 = vadd.f32 %v7234_v39, %v195_v5 }
 0x11d   :  { %v7251_v13 = vpop.f32.mrf.mxu2 }
 0x11e   :  { %v7249_v9 = vpop.f32.mrf.mxu3 }
 0x120   :  { %v203_v19 = vpop.f32.mrf.mxu0 }
 0x121   :  { %v7254_v20 = vpop.f32.mrf.mxu1  ;;  %v353_v30 = vadd.f32 %v352_v4, %v203_v19 }
 0x126   :  { %v500_v10 = vpop.f32.mrf.mxu3 }
 0x127   :  { %v7258_v11 = vpop.f32.mrf.mxu2 }
 0x129   :  { %v676_v12 = vpop.f32.mrf.mxu1 }
 0x12a   :  { %v7260_v16 = vpop.f32.mrf.mxu0 }
 0x12b   :  { %v357_v6 = vadd.f32 %v7254_v20, %v7260_v16 }
 0x12e   :  { %v506_v21 = vpop.f32.mrf.mxu3 }
 0x12f   :  { %v426_v22 = vpop.f32.mrf.mxu2 }
 0x130   :  { %v427_v23 = vadd.f32 %v426_v22, %v345_v17 }
 0x131   :  { %v680_v24 = vpop.f32.mrf.mxu1 }
 0x132   :  { %v501_v25 = vadd.f32 %v500_v10, %v427_v23  ;;  %v611_v26 = vpop.f32.mrf.mxu0  ;;  %v7330_v10 = vsub.f32 %v718_v52, %v7319_v3 }
 0x134   :  { %v612_v28 = vadd.f32 %v611_v26, %v501_v25  ;;  %v1319_v20 = vand.u32 4294901760, %v7330_v10 }
 0x136   :  { %v677_v18 = vadd.f32 %v676_v12, %v612_v28  ;;  %v512_v49 = vpop.f32.mrf.mxu3  ;;  %v1320_v26 = vsub.f32 %v7330_v10, %v1319_v20 }
 0x137   :  { %v431_v50 = vpop.f32.mrf.mxu2 }
 0x138   :  { %v731_v53 = vsel %vm729_vm2, %v677_v18, 0  ;;  %v432_v54 = vadd.f32 %v431_v50, %v349_v37  ;;  %v716_v37 = vld [vmem:[%s9128_s2 + $0x48] sm:$0xff] }
 0x139   :  { %v7275_v56 = vand.u32 4294901760, %v731_v53  ;;  %v684_v2 = vpop.f32.mrf.mxu1  ;;  %v7355_v50 = vand.u32 4294901760, %v716_v37 }
 0x13a   :  { %v507_v58 = vadd.f32 %v506_v21, %v432_v54  ;;  %v615_v59 = vpop.f32.mrf.mxu0  ;;  %v714_v54 = vld [vmem:[%s9128_s2 + $0x38] sm:$0xff] }
 0x13b   :  { %v7281_v0 = vsub.f32 %v731_v53, %v7275_v56  ;;  %900 = vmatmul.f32.vlgmr.msra.gmra.mxu3 %v7275_v56  ;;  %1223 = vmatpush.msrb.mxu0 %v7355_v50  ;;  %v7368_v60 = vsub.f32 %v716_v37, %v7355_v50 }
 0x13c   :  { %v616_v8 = vadd.f32 %v615_v59, %v507_v58  ;;  %1468 = vmatpush.msra.mxu3 %v7266_v32  ;;  %v361_v58 = vadd.f32 %v7217_v1, %v7229_v34  ;;  %v712_v1 = vld [vmem:[%s9128_s2 + $0x28] sm:$0xff] }
 0x13d   :  { %966 = vmatmul.f32.vlgmr.msra.gmra.mxu0 %v7281_v0  ;;  %v7292_v29 = vand.u32 4294901760, %v7281_v0 }
 0x13e   :  { %v681_v33 = vadd.f32 %v680_v24, %v616_v8  ;;  %1470 = vmatpush.msra.mxu3 %v7287_v15  ;;  %v518_v43 = vpop.f32.mrf.mxu3 }
 0x13f   :  { %v436_v36 = vpop.f32.mrf.mxu2  ;;  %1032 = vmatmul.f32.vlgmr.msra.gmra.mxu1 %v7292_v29  ;;  %v781_v38 = vsub.f32 %v7281_v0, %v7292_v29 }
 0x140   :  { %v734_v39 = vsel %vm729_vm2, %v681_v33, 0  ;;  %v437_v40 = vadd.f32 %v436_v36, %v353_v30  ;;  %1472 = vmatpush.msra.mxu3 %v7319_v3  ;;  %v1325_v33 = vand.u32 4294901760, %v7368_v60 }
 0x141   :  { %v7304_v42 = vand.u32 4294901760, %v734_v39  ;;  %v7306_v44 = vand.u32 4294901760, %v781_v38  ;;  %v688_v4 = vpop.f32.mrf.mxu1 }
 0x142   :  { %v513_v45 = vadd.f32 %v512_v49, %v437_v40  ;;  %v619_v46 = vpop.f32.mrf.mxu0  ;;  %v1321_v49 = vand.u32 4294901760, %v1320_v26  ;;  %1474 = vmatpush.msra.mxu3 %v7355_v50  ;;  %v7390_v40 = vand.u32 4294901760, %v712_v1  ;;  %v1326_v48 = vsub.f32 %v7368_v60, %v1325_v33 }
 0x143   :  { %v7312_v51 = vsub.f32 %v734_v39, %v7304_v42  ;;  %783 = vmatmul.f32.vlgmr.msra.gmra.mxu2 %v7306_v44  ;;  %904 = vmatmul.f32.gmra.mxu3 %v7304_v42 }
 0x144   :  { %v620_v57 = vadd.f32 %v619_v46, %v513_v45  ;;  %1396 = vmatpush.msra.mxu2 %v7271_v47  ;;  %1322 = vmatpush.msrb.mxu1 %v1321_v49 }
 0x145   :  { %971 = vmatmul.f32.gmra.mxu0 %v7312_v51  ;;  %v7324_v5 = vand.u32 4294901760, %v7312_v51 }
 0x146   :  { %v685_v19 = vadd.f32 %v684_v2, %v620_v57  ;;  %1399 = vmatpush.msra.mxu2 %v7296_v35  ;;  %v524_v28 = vpop.f32.mrf.mxu3  ;;  %v7370_v2 = vand.u32 4294901760, %v714_v54 }
 0x147   :  { %v441_v12 = vpop.f32.mrf.mxu2  ;;  %1038 = vmatmul.f32.gmra.mxu1 %v7324_v5  ;;  %v789_v17 = vsub.f32 %v7312_v51, %v7324_v5 }
 0x148   :  { %v737_v21 = vsel %vm729_vm2, %v685_v19, 0  ;;  %v442_v22 = vadd.f32 %v441_v12, %v357_v6  ;;  %1402 = vmatpush.msra.mxu2 %v7330_v10  ;;  %1225 = vmatpush.msrb.mxu0 %v7370_v2  ;;  %v7383_v36 = vsub.f32 %v714_v54, %v7370_v2  ;;  %v708_v6 = vld [vmem:[%s9128_s2 + $0x8] sm:$0xff]  ;;  %v1327_v12 = vand.u32 4294901760, %v1326_v48 }
 0x149   :  { %v7339_v16 = vand.u32 4294901760, %v737_v21  ;;  %v7341_v23 = vand.u32 4294901760, %v789_v17  ;;  %v692_v7 = vpop.f32.mrf.mxu1  ;;  %1476 = vmatpush.msra.mxu3 %v7370_v2 }
 0x14a   :  { %v519_v24 = vadd.f32 %v518_v43, %v442_v22  ;;  %v623_v25 = vpop.f32.mrf.mxu0  ;;  %1405 = vmatpush.msra.mxu2 %v7368_v60  ;;  %v710_v43 = vld [vmem:[%s9128_s2 + $0x18] sm:$0xff]  ;;  %v1331_v52 = vand.u32 4294901760, %v7383_v36  ;;  %1227 = vmatpush.msrb.mxu0 %v7390_v40 }
 0x14b   :  { %v7348_v27 = vsub.f32 %v737_v21, %v7339_v16  ;;  %791 = vmatmul.f32.gmra.mxu2 %v7341_v23  ;;  %908 = vmatmul.f32.gmra.mxu3 %v7339_v16  ;;  %v7400_v57 = vand.u32 4294901760, %v710_v43  ;;  %v7418_v21 = vand.u32 4294901760, %v708_v6 }
 0x14c   :  { %v624_v18 = vadd.f32 %v623_v25, %v519_v24  ;;  %1408 = vmatpush.msra.mxu2 %v7383_v36  ;;  %v1332_v17 = vsub.f32 %v7383_v36, %v1331_v52  ;;  %1478 = vmatpush.msra.mxu3 %v7390_v40 }
 0x14d   :  { %976 = vmatmul.f32.gmra.mxu0 %v7348_v27  ;;  %v7359_v53 = vand.u32 4294901760, %v7348_v27  ;;  %v7427_v26 = vsub.f32 %v710_v43, %v7400_v57  ;;  %1328 = vmatpush.msrb.mxu1 %v1327_v12  ;;  %v7434_v49 = vsub.f32 %v708_v6, %v7418_v21 }
 0x14e   :  { %v689_v59 = vadd.f32 %v688_v4, %v624_v18  ;;  %v7409_v4 = vsub.f32 %v712_v1, %v7390_v40  ;;  %v530_v22 = vpop.f32.mrf.mxu3  ;;  %v1333_v18 = vand.u32 4294901760, %v1332_v17  ;;  %1229 = vmatpush.msrb.mxu0 %v7400_v57  ;;  %1480 = vmatpush.msra.mxu3 %v7400_v57  ;;  %v369_v17 = vadd.f32 %v7245_v62, %v7251_v13 }
 0x14f   :  { %v446_v8 = vpop.f32.mrf.mxu2  ;;  %1044 = vmatmul.f32.gmra.mxu1 %v7359_v53  ;;  %v797_v14 = vsub.f32 %v7348_v27, %v7359_v53 }
 0x150   :  { %v740_v34 = vsel %vm729_vm2, %v689_v59, 0  ;;  %v447_v30 = vadd.f32 %v446_v8, %v361_v58  ;;  %v1337_v25 = vand.u32 4294901760, %v7409_v4  ;;  %1411 = vmatpush.msra.mxu2 %v7409_v4  ;;  %1334 = vmatpush.msrb.mxu1 %v1333_v18  ;;  %v1349_v8 = vand.u32 4294901760, %v7434_v49 }
 0x151   :  { %v7386_v38 = vand.u32 4294901760, %v740_v34  ;;  %v7388_v39 = vand.u32 4294901760, %v797_v14  ;;  %1231 = vmatpush.msrb.mxu0 %v7418_v21  ;;  %v696_v14 = vpop.f32.mrf.mxu1  ;;  %1482 = vmatpush.msra.mxu3 %v7418_v21 }
 0x152   :  { %v525_v45 = vadd.f32 %v524_v28, %v447_v30  ;;  %v627_v46 = vpop.f32.mrf.mxu0  ;;  %v365_v28 = vadd.f32 %v7227_v31, %v7241_v61  ;;  %v1338_v59 = vsub.f32 %v7409_v4, %v1337_v25  ;;  %v1343_v31 = vand.u32 4294901760, %v7427_v26  ;;  %1414 = vmatpush.msra.mxu2 %v7427_v26 }
 0x153   :  { %v7404_v63 = vsub.f32 %v740_v34, %v7386_v38  ;;  %799 = vmatmul.f32.gmra.mxu2 %v7388_v39  ;;  %912 = vmatmul.f32.gmra.mxu3 %v7386_v38  ;;  %v1350_v48 = vsub.f32 %v7434_v49, %v1349_v8 }
 0x154   :  { %v628_v19 = vadd.f32 %v627_v46, %v525_v45  ;;  %v1339_v30 = vand.u32 4294901760, %v1338_v59  ;;  %v1344_v43 = vsub.f32 %v7427_v26, %v1343_v31  ;;  %1543 = vmatpush.msra.mxu0 %v1307_v55  ;;  %1417 = vmatpush.msra.mxu2 %v7434_v49 }
 0x155   :  { %981 = vmatmul.f32.gmra.mxu0 %v7404_v63  ;;  %v7423_v24 = vand.u32 4294901760, %v7404_v63  ;;  %v1351_v47 = vand.u32 4294901760, %v1350_v48 }
 0x156   :  { %v693_v37 = vadd.f32 %v692_v7, %v628_v19  ;;  %v1345_v19 = vand.u32 4294901760, %v1344_v43  ;;  %1340 = vmatpush.msrb.mxu1 %v1339_v30  ;;  %1547 = vmatpush.msra.mxu0 %v1313_v41  ;;  %v536_v26 = vpop.f32.mrf.mxu3 }
 0x157   :  { %v451_v54 = vpop.f32.mrf.mxu2  ;;  %1050 = vmatmul.f32.gmra.mxu1 %v7423_v24  ;;  %v805_v58 = vsub.f32 %v7404_v63, %v7423_v24 }
 0x158   :  { %v743_v61 = vsel %vm729_vm2, %v693_v37, 0  ;;  %v452_v7 = vadd.f32 %v451_v54, %v365_v28  ;;  %1346 = vmatpush.msrb.mxu1 %v1345_v19  ;;  %1551 = vmatpush.msra.mxu0 %v1319_v20 }
 0x159   :  { %v7447_v1 = vand.u32 4294901760, %v743_v61  ;;  %v7449_v34 = vand.u32 4294901760, %v805_v58  ;;  %v700_v18 = vpop.f32.mrf.mxu1 }
 0x15a   :  { %v531_v45 = vadd.f32 %v530_v22, %v452_v7  ;;  %v631_v46 = vpop.f32.mrf.mxu0  ;;  %1352 = vmatpush.msrb.mxu1 %v1351_v47  ;;  %1555 = vmatpush.msra.mxu0 %v1325_v33  ;;  %v373_v33 = vadd.f32 %v7249_v9, %v7258_v11 }
 0x15b   :  { %v7458_v6 = vsub.f32 %v743_v61, %v7447_v1  ;;  %807 = vmatmul.f32.gmra.mxu2 %v7449_v34  ;;  %916 = vmatmul.f32.gmra.mxu3 %v7447_v1 }
 0x15c   :  { %v632_v12 = vadd.f32 %v631_v46, %v531_v45  ;;  %1614 = vmatpush.msra.mxu1 %v7266_v32  ;;  %1559 = vmatpush.msra.mxu0 %v1331_v52 }
 0x15d   :  { %986 = vmatmul.f32.gmra.mxu0 %v7458_v6  ;;  %v7466_v55 = vand.u32 4294901760, %v7458_v6 }
 0x15e   :  { %v697_v22 = vadd.f32 %v696_v14, %v632_v12  ;;  %1616 = vmatpush.msra.mxu1 %v7287_v15  ;;  %1563 = vmatpush.msra.mxu0 %v1337_v25  ;;  %v542_v54 = vpop.f32.mrf.mxu3 }
 0x15f   :  { %v456_v28 = vpop.f32.mrf.mxu2  ;;  %1056 = vmatmul.f32.gmra.mxu1 %v7466_v55  ;;  %v813_v35 = vsub.f32 %v7458_v6, %v7466_v55 }
 0x160   :  { %v746_v41 = vsel %vm729_vm2, %v697_v22, 0  ;;  %v457_v37 = vadd.f32 %v456_v28, %v369_v17  ;;  %1618 = vmatpush.msra.mxu1 %v7319_v3  ;;  %1567 = vmatpush.msra.mxu0 %v1343_v31 }
 0x161   :  { %v7479_v62 = vand.u32 4294901760, %v746_v41  ;;  %v7481_v13 = vand.u32 4294901760, %v813_v35  ;;  %v704_v61 = vpop.f32.mrf.mxu1 }
 0x162   :  { %v537_v10 = vadd.f32 %v536_v26, %v457_v37  ;;  %v635_v20 = vpop.f32.mrf.mxu0  ;;  %1620 = vmatpush.msra.mxu1 %v7355_v50  ;;  %1571 = vmatpush.msra.mxu0 %v1349_v8  ;;  %v7640_v26 = vld [vmem:[%s9129_s3] sm:$0x3] }
 0x163   :  { %v7487_v49 = vsub.f32 %v746_v41, %v7479_v62  ;;  %815 = vmatmul.f32.gmra.mxu2 %v7481_v13  ;;  %920 = vmatmul.f32.gmra.mxu3 %v7479_v62  ;;  %v7649_v41 = vperm.slane %v7640_v26, 0 }
 0x164   :  { %v636_v60 = vadd.f32 %v635_v20, %v537_v10  ;;  %1622 = vmatpush.msra.mxu1 %v7370_v2 }
 0x165   :  { %991 = vmatmul.f32.gmra.mxu0 %v7487_v49  ;;  %v7496_v32 = vand.u32 4294901760, %v7487_v49 }
 0x166   :  { %v701_v36 = vadd.f32 %v700_v18, %v636_v60  ;;  %1624 = vmatpush.msra.mxu1 %v7390_v40 }
 0x167   :  { %v461_v52 = vpop.f32.mrf.mxu2  ;;  %1062 = vmatmul.f32.gmra.mxu1 %v7496_v32  ;;  %v821_v15 = vsub.f32 %v7487_v49, %v7496_v32 }
 0x168   :  { %v749_v4 = vsel %vm729_vm2, %v701_v36, 0  ;;  %v462_v25 = vadd.f32 %v461_v52, %v373_v33  ;;  %1626 = vmatpush.msra.mxu1 %v7400_v57 }
 0x169   :  { %v7506_v58 = vand.u32 4294901760, %v749_v4  ;;  %v822_v9 = vand.u32 4294901760, %v821_v15 }
 0x16a   :  { %v543_v11 = vadd.f32 %v542_v54, %v462_v25  ;;  %v639_v59 = vpop.f32.mrf.mxu0  ;;  %1628 = vmatpush.msra.mxu1 %v7418_v21 }
 0x16b   :  { %v7510_v3 = vsub.f32 %v749_v4, %v7506_v58  ;;  %823 = vmatmul.f32.gmra.mxu2 %v822_v9  ;;  %924 = vmatmul.f32.gmra.mxu3 %v7506_v58 }
 0x16c   :  { %v640_v31 = vadd.f32 %v639_v59, %v543_v11 }
 0x16d   :  { %996 = vmatmul.f32.gmra.mxu0 %v7510_v3  ;;  %v7516_v50 = vand.u32 4294901760, %v7510_v3 }
 0x16e   :  { %v705_v7 = vadd.f32 %v704_v61, %v640_v31 }
 0x16f   :  { %1068 = vmatmul.f32.gmra.mxu1 %v7516_v50  ;;  %v829_v2 = vsub.f32 %v7510_v3, %v7516_v50 }
 0x170   :  { %v752_v8 = vsel %vm729_vm2, %v705_v7, 0 }
 0x171   :  { %v7524_v14 = vand.u32 4294901760, %v752_v8  ;;  %v830_v40 = vand.u32 4294901760, %v829_v2 }
 0x173   :  { %v7527_v30 = vsub.f32 %v752_v8, %v7524_v14  ;;  %831 = vmatmul.f32.gmra.mxu2 %v830_v40  ;;  %928 = vmatmul.f32.gmra.mxu3 %v7524_v14 }
 0x175   :  { %1001 = vmatmul.f32.gmra.mxu0 %v7527_v30  ;;  %v7532_v57 = vand.u32 4294901760, %v7527_v30 }
 0x177   :  { %1074 = vmatmul.f32.gmra.mxu1 %v7532_v57  ;;  %v837_v43 = vsub.f32 %v7527_v30, %v7532_v57 }
 0x179   :  { %v838_v21 = vand.u32 4294901760, %v837_v43 }
 0x17b   :  { %839 = vmatmul.f32.gmra.mxu2 %v838_v21  ;;  %1176 = vmatmul.f32.vlgmr.msrb.gmra.mxu3 %v7275_v56 }
 0x17d   :  { %1237 = vmatmul.f32.vlgmr.msrb.gmra.mxu0 %v7306_v44 }
 0x17f   :  { %1354 = vmatmul.f32.vlgmr.msrb.gmra.mxu1 %v7275_v56 }
 0x183   :  { %1119 = vmatmul.f32.vlgmr.msrb.gmra.mxu2 %v7275_v56  ;;  %1180 = vmatmul.f32.gmra.mxu3 %v7304_v42 }
 0x185   :  { %1245 = vmatmul.f32.gmra.mxu0 %v7341_v23 }
 0x187   :  { %1358 = vmatmul.f32.gmra.mxu1 %v7304_v42 }
 0x18b   :  { %1123 = vmatmul.f32.gmra.mxu2 %v7304_v42  ;;  %1184 = vmatmul.f32.gmra.mxu3 %v7339_v16 }
 0x18d   :  { %1253 = vmatmul.f32.gmra.mxu0 %v7388_v39 }
 0x18f   :  { %1362 = vmatmul.f32.gmra.mxu1 %v7339_v16 }
 0x193   :  { %1127 = vmatmul.f32.gmra.mxu2 %v7339_v16  ;;  %1188 = vmatmul.f32.gmra.mxu3 %v7386_v38 }
 0x195   :  { %1261 = vmatmul.f32.gmra.mxu0 %v7449_v34 }
 0x197   :  { %1366 = vmatmul.f32.gmra.mxu1 %v7386_v38 }
 0x19b   :  { %1131 = vmatmul.f32.gmra.mxu2 %v7386_v38  ;;  %1192 = vmatmul.f32.gmra.mxu3 %v7447_v1 }
 0x19d   :  { %1269 = vmatmul.f32.gmra.mxu0 %v7481_v13 }
 0x19f   :  { %1370 = vmatmul.f32.gmra.mxu1 %v7447_v1 }
 0x1a3   :  { %1135 = vmatmul.f32.gmra.mxu2 %v7447_v1  ;;  %1196 = vmatmul.f32.gmra.mxu3 %v7479_v62 }
 0x1a5   :  { %1277 = vmatmul.f32.gmra.mxu0 %v822_v9 }
 0x1a7   :  { %1374 = vmatmul.f32.gmra.mxu1 %v7479_v62 }
 0x1ab   :  { %1139 = vmatmul.f32.gmra.mxu2 %v7479_v62  ;;  %1200 = vmatmul.f32.gmra.mxu3 %v7506_v58 }
 0x1ad   :  { %1285 = vmatmul.f32.gmra.mxu0 %v830_v40 }
 0x1af   :  { %1378 = vmatmul.f32.gmra.mxu1 %v7506_v58 }
 0x1b3   :  { %1143 = vmatmul.f32.gmra.mxu2 %v7506_v58  ;;  %1204 = vmatmul.f32.gmra.mxu3 %v7524_v14 }
 0x1b5   :  { %1293 = vmatmul.f32.gmra.mxu0 %v838_v21 }
 0x1b7   :  { %1382 = vmatmul.f32.gmra.mxu1 %v7524_v14 }
 0x1ba   :  { %v7565_v44 = vpop.f32.mrf.mxu0 }
 0x1bb   :  { %1147 = vmatmul.f32.gmra.mxu2 %v7524_v14  ;;  %1486 = vmatmul.f32.vlgmr.msra.gmra.mxu3 %v7292_v29 }
 0x1bc   :  { %v7569_v23 = vpop.f32.mrf.mxu1 }
 0x1bd   :  { %1573 = vmatmul.f32.vlgmr.msra.gmra.mxu0 %v7275_v56 }
 0x1be   :  { %v7572_v39 = vpop.f32.mrf.mxu3 }
 0x1bf   :  { %1630 = vmatmul.f32.vlgmr.msra.gmra.mxu1 %v7275_v56 }
 0x1c2   :  { %v7575_v34 = vpop.f32.mrf.mxu0 }
 0x1c3   :  { %1420 = vmatmul.f32.vlgmr.msra.gmra.mxu2 %v7281_v0  ;;  %1492 = vmatmul.f32.gmra.mxu3 %v7324_v5 }
 0x1c4   :  { %v7579_v45 = vpop.f32.mrf.mxu1 }
 0x1c5   :  { %1577 = vmatmul.f32.gmra.mxu0 %v7304_v42 }
 0x1c6   :  { %v784_v46 = vpop.f32.mrf.mxu2  ;;  %v7582_v29 = vpop.f32.mrf.mxu3 }
 0x1c7   :  { %1634 = vmatmul.f32.gmra.mxu1 %v7304_v42  ;;  %v785_v13 = vadd.f32 %v784_v46, %v7649_v41 }
 0x1c9   :  { %v902_v18 = vadd.f32 %v7572_v39, %v785_v13 }
 0x1ca   :  { %v7585_v48 = vpop.f32.mrf.mxu0 }
 0x1cb   :  { %1425 = vmatmul.f32.gmra.mxu2 %v7312_v51  ;;  %1498 = vmatmul.f32.gmra.mxu3 %v7359_v53  ;;  %v968_v33 = vadd.f32 %v7565_v44, %v902_v18 }
 0x1cc   :  { %v7589_v56 = vpop.f32.mrf.mxu1 }
 0x1cd   :  { %1581 = vmatmul.f32.gmra.mxu0 %v7339_v16  ;;  %v1034_v4 = vadd.f32 %v7569_v23, %v968_v33 }
 0x1ce   :  { %v792_v0 = vpop.f32.mrf.mxu2  ;;  %v7592_v5 = vpop.f32.mrf.mxu3 }
 0x1cf   :  { %1638 = vmatmul.f32.gmra.mxu1 %v7339_v16 }
 0x1d2   :  { %v7595_v19 = vpop.f32.mrf.mxu0 }
 0x1d3   :  { %1430 = vmatmul.f32.gmra.mxu2 %v7348_v27  ;;  %1504 = vmatmul.f32.gmra.mxu3 %v7423_v24 }
 0x1d4   :  { %v7599_v42 = vpop.f32.mrf.mxu1 }
 0x1d5   :  { %1585 = vmatmul.f32.gmra.mxu0 %v7386_v38 }
 0x1d6   :  { %v800_v51 = vpop.f32.mrf.mxu2  ;;  %v7602_v53 = vpop.f32.mrf.mxu3 }
 0x1d7   :  { %1642 = vmatmul.f32.gmra.mxu1 %v7386_v38  ;;  %v801_v9 = vadd.f32 %v800_v51, %v7649_v41 }
 0x1d9   :  { %v910_v61 = vadd.f32 %v7592_v5, %v801_v9 }
 0x1da   :  { %v7605_v12 = vpop.f32.mrf.mxu0 }
 0x1db   :  { %1435 = vmatmul.f32.gmra.mxu2 %v7404_v63  ;;  %1510 = vmatmul.f32.gmra.mxu3 %v7466_v55 }
 0x1dc   :  { %v7609_v16 = vpop.f32.mrf.mxu1 }
 0x1dd   :  { %1589 = vmatmul.f32.gmra.mxu0 %v7447_v1 }
 0x1de   :  { %v808_v27 = vpop.f32.mrf.mxu2  ;;  %v7612_v24 = vpop.f32.mrf.mxu3 }
 0x1df   :  { %1646 = vmatmul.f32.gmra.mxu1 %v7447_v1 }
 0x1e2   :  { %v7615_v47 = vpop.f32.mrf.mxu0 }
 0x1e3   :  { %1440 = vmatmul.f32.gmra.mxu2 %v7458_v6  ;;  %1516 = vmatmul.f32.gmra.mxu3 %v7496_v32  ;;  %v793_v32 = vadd.f32 %v792_v0, %v7649_v41 }
 0x1e4   :  { %v7619_v38 = vpop.f32.mrf.mxu1 }
 0x1e5   :  { %1593 = vmatmul.f32.gmra.mxu0 %v7479_v62  ;;  %v906_v15 = vadd.f32 %v7582_v29, %v793_v32 }
 0x1e6   :  { %v816_v63 = vpop.f32.mrf.mxu2  ;;  %v7622_v55 = vpop.f32.mrf.mxu3 }
 0x1e7   :  { %1650 = vmatmul.f32.gmra.mxu1 %v7479_v62  ;;  %v973_v59 = vadd.f32 %v7575_v34, %v906_v15 }
 0x1ea   :  { %v7625_v17 = vpop.f32.mrf.mxu0 }
 0x1eb   :  { %1445 = vmatmul.f32.gmra.mxu2 %v7487_v49  ;;  %1522 = vmatmul.f32.gmra.mxu3 %v7516_v50  ;;  %v1040_v50 = vadd.f32 %v7579_v45, %v973_v59  ;;  %v817_v45 = vadd.f32 %v816_v63, %v7649_v41 }
 0x1ec   :  { %v7629_v1 = vpop.f32.mrf.mxu1 }
 0x1ed   :  { %1597 = vmatmul.f32.gmra.mxu0 %v7506_v58  ;;  %v918_v5 = vadd.f32 %v7612_v24, %v817_v45 }
 0x1ee   :  { %v7632_v6 = vpop.f32.mrf.mxu2  ;;  %v7634_v22 = vpop.f32.mrf.mxu3 }
 0x1ef   :  { %1654 = vmatmul.f32.gmra.mxu1 %v7506_v58  ;;  %v825_v13 = vadd.f32 %v7632_v6, %v7649_v41  ;;  %v988_v63 = vadd.f32 %v7605_v12, %v918_v5 }
 0x1f1   :  { %v922_v32 = vadd.f32 %v7622_v55, %v825_v13  ;;  %v1058_v24 = vadd.f32 %v7609_v16, %v988_v63 }
 0x1f2   :  { %v7642_v28 = vpop.f32.mrf.mxu0 }
 0x1f3   :  { %1450 = vmatmul.f32.gmra.mxu2 %v7510_v3  ;;  %1528 = vmatmul.f32.gmra.mxu3 %v7532_v57  ;;  %v993_v6 = vadd.f32 %v7615_v47, %v922_v32 }
 0x1f4   :  { %v7646_v35 = vpop.f32.mrf.mxu1 }
 0x1f5   :  { %1601 = vmatmul.f32.gmra.mxu0 %v7524_v14  ;;  %v1064_v55 = vadd.f32 %v7619_v38, %v993_v6 }
 0x1f6   :  { %v7652_v37 = vpop.f32.mrf.mxu2  ;;  %v7654_v62 = vpop.f32.mrf.mxu3 }
 0x1f7   :  { %1658 = vmatmul.f32.gmra.mxu1 %v7524_v14  ;;  %v809_v14 = vadd.f32 %v808_v27, %v7649_v41 }
 0x1f9   :  { %v914_v21 = vadd.f32 %v7602_v53, %v809_v14 }
 0x1fa   :  { %v7658_v10 = vpop.f32.mrf.mxu0 }
 0x1fb   :  { %1455 = vmatmul.f32.gmra.mxu2 %v7527_v30  ;;  %v978_v30 = vadd.f32 %v7585_v48, %v910_v61  ;;  %v983_v29 = vadd.f32 %v7595_v19, %v914_v21 }
 0x1fc   :  { %v7661_v20 = vpop.f32.mrf.mxu1 }
 0x1fd   :  { %v1046_v44 = vadd.f32 %v7589_v56, %v978_v30  ;;  %v1052_v51 = vadd.f32 %v7599_v42, %v983_v29 }
 0x1fe   :  { %v7664_v49 = vpop.f32.mrf.mxu2  ;;  %v1177_v60 = vpop.f32.mrf.mxu3 }
 0x1ff   :  { %v841_v59 = vadd.f32 %v7664_v49, %v7649_v41  ;;  %v7727_v49 = vperm.slane %v7640_v26, 1 }
 0x202   :  { %v7668_v36 = vpop.f32.mrf.mxu0 }
 0x203   :  { %v1247_v26 = vadd.f32 %v7668_v36, %v7727_v49 }
 0x204   :  { %v7670_v52 = vpop.f32.mrf.mxu1 }
 0x206   :  { %v1120_v25 = vpop.f32.mrf.mxu2  ;;  %v1181_v54 = vpop.f32.mrf.mxu3 }
 0x207   :  { %v1121_v58 = vadd.f32 %v1120_v25, %v1034_v4  ;;  %v833_v4 = vadd.f32 %v7652_v37, %v7649_v41 }
 0x209   :  { %v1178_v11 = vadd.f32 %v1177_v60, %v1121_v58  ;;  %v926_v58 = vadd.f32 %v7634_v22, %v833_v4 }
 0x20a   :  { %v7676_v3 = vpop.f32.mrf.mxu0 }
 0x20b   :  { %1662 = vst [vmem:[#allocation2] sm:$0xff] %v1178_v11  ;;  %v998_v37 = vadd.f32 %v7625_v17, %v926_v58 }
 0x20c   :  { %v7678_v31 = vpop.f32.mrf.mxu1 }
 0x20d   :  { %v1070_v22 = vadd.f32 %v7629_v1, %v998_v37  ;;  %v1239_v1 = vadd.f32 %v7658_v10, %v7727_v49 }
 0x20e   :  { %v1124_v7 = vpop.f32.mrf.mxu2  ;;  %v1185_v2 = vpop.f32.mrf.mxu3 }
 0x20f   :  { %v1125_v8 = vadd.f32 %v1124_v7, %v1040_v50  ;;  %v930_v7 = vadd.f32 %v7654_v62, %v841_v59 }
 0x211   :  { %v1182_v40 = vadd.f32 %v1181_v54, %v1125_v8 }
 0x212   :  { %v7684_v57 = vpop.f32.mrf.mxu0 }
 0x213   :  { %1664 = vst [vmem:[#allocation2 + $0x10] sm:$0xff] %v1182_v40  ;;  %v1003_v40 = vadd.f32 %v7642_v28, %v930_v7 }
 0x214   :  { %v7686_v43 = vpop.f32.mrf.mxu1 }
 0x215   :  { %v1076_v30 = vadd.f32 %v7646_v35, %v1003_v40 }
 0x216   :  { %v1128_v23 = vpop.f32.mrf.mxu2  ;;  %v1189_v39 = vpop.f32.mrf.mxu3 }
 0x217   :  { %v1129_v34 = vadd.f32 %v1128_v23, %v1046_v44 }
 0x219   :  { %v1186_v46 = vadd.f32 %v1185_v2, %v1129_v34 }
 0x21a   :  { %v7692_v0 = vpop.f32.mrf.mxu0 }
 0x21b   :  { %1666 = vst [vmem:[#allocation2 + $0x20] sm:$0xff] %v1186_v46 }
 0x21c   :  { %v7694_v48 = vpop.f32.mrf.mxu1 }
 0x21e   :  { %v1132_v53 = vpop.f32.mrf.mxu2  ;;  %v1193_v27 = vpop.f32.mrf.mxu3 }
 0x21f   :  { %v1133_v56 = vadd.f32 %v1132_v53, %v1052_v51  ;;  %v1360_v51 = vadd.f32 %v7670_v52, %v1247_v26 }
 0x221   :  { %v1190_v18 = vadd.f32 %v1189_v39, %v1133_v56  ;;  %v1356_v39 = vadd.f32 %v7661_v20, %v1239_v1  ;;  %v1255_v20 = vadd.f32 %v7676_v3, %v7727_v49  ;;  %v7796_v1 = vld [vmem:[%s9131_s4 + $0x38] sm:$0xff] }
 0x222   :  { %v7701_v60 = vpop.f32.mrf.mxu0  ;;  %9244 = vst [vmem:[#allocation13_spill] sm:$0xff] %v7796_v1 }
 0x223   :  { %1668 = vst [vmem:[#allocation2 + $0x30] sm:$0xff] %v1190_v18 }
 0x224   :  { %v7703_v19 = vpop.f32.mrf.mxu1 }
 0x226   :  { %v1136_v33 = vpop.f32.mrf.mxu2  ;;  %v1197_v42 = vpop.f32.mrf.mxu3 }
 0x227   :  { %v1137_v15 = vadd.f32 %v1136_v33, %v1058_v24  ;;  %v1364_v24 = vadd.f32 %v7678_v31, %v1255_v20 }
 0x229   :  { %v1194_v25 = vadd.f32 %v1193_v27, %v1137_v15  ;;  %v1263_v15 = vadd.f32 %v7684_v57, %v7727_v49 }
 0x22a   :  { %v7710_v54 = vpop.f32.mrf.mxu0 }
 0x22b   :  { %1670 = vst [vmem:[#allocation2 + $0x40] sm:$0xff] %v1194_v25  ;;  %v1368_v3 = vadd.f32 %v7686_v43, %v1263_v15  ;;  %v1694_v43 = vld [vmem:[%s9130_s5] sm:$0x3] }
 0x22c   :  { %v7712_v12 = vpop.f32.mrf.mxu1  ;;  %v7769_v40 = vperm.slane %v1694_v43, 1 }
 0x22e   :  { %v1140_v9 = vpop.f32.mrf.mxu2  ;;  %v1201_v16 = vpop.f32.mrf.mxu3  ;;  %9239 = vst [vmem:[#allocation8_spill] sm:$0xff] %v7769_v40 }
 0x22f   :  { %v1141_v11 = vadd.f32 %v1140_v9, %v1064_v55 }
 0x231   :  { %v1198_v61 = vadd.f32 %v1197_v42, %v1141_v11 }
 0x232   :  { %v7719_v50 = vpop.f32.mrf.mxu0 }
 0x233   :  { %1672 = vst [vmem:[#allocation2 + $0x50] sm:$0xff] %v1198_v61 }
 0x234   :  { %v7721_v47 = vpop.f32.mrf.mxu1 }
 0x236   :  { %v1144_v2 = vpop.f32.mrf.mxu2  ;;  %v1205_v38 = vpop.f32.mrf.mxu3 }
 0x237   :  { %v1145_v8 = vadd.f32 %v1144_v2, %v1070_v22 }
 0x239   :  { %v1202_v14 = vadd.f32 %v1201_v16, %v1145_v8  ;;  %v1271_v16 = vadd.f32 %v7692_v0, %v7727_v49  ;;  %v7755_v0 = vld [vmem:[%s9131_s4] sm:$0xff]  ;;  %v7760_v8 = vld [vmem:[%s9131_s4 + $0x8] sm:$0xff] }
 0x23a   :  { %v1574_v41 = vpop.f32.mrf.mxu0  ;;  %9235 = vst [vmem:[#allocation4_spill] sm:$0xff] %v7755_v0 }
 0x23b   :  { %1674 = vst [vmem:[#allocation2 + $0x60] sm:$0xff] %v1202_v14  ;;  %v1372_v57 = vadd.f32 %v7694_v48, %v1271_v16  ;;  %v7765_v48 = vld [vmem:[%s9131_s4 + $0x10] sm:$0xff]  ;;  %v7767_v14 = vperm.slane %v1694_v43, 0 }
 0x23c   :  { %v1631_v17 = vpop.f32.mrf.mxu1  ;;  %9236 = vst [vmem:[#allocation5_spill] sm:$0xff] %v7760_v8 }
 0x23d   :  { %9237 = vst [vmem:[#allocation6_spill] sm:$0xff] %v7765_v48 }
 0x23e   :  { %v1148_v21 = vpop.f32.mrf.mxu2  ;;  %v1487_v44 = vpop.f32.mrf.mxu3  ;;  %9238 = vst [vmem:[#allocation7_spill] sm:$0xff] %v7767_v14 }
 0x23f   :  { %v1149_v23 = vadd.f32 %v1148_v21, %v1076_v30  ;;  %v7784_v30 = vld [vmem:[%s9131_s4 + $0x28] sm:$0xff]  ;;  %v1279_v21 = vadd.f32 %v7701_v60, %v7727_v49 }
 0x240   :  { %9242 = vst [vmem:[#allocation11_spill] sm:$0xff] %v7784_v30  ;;  %v7806_v60 = vld [vmem:[%s9131_s4 + $0x48] sm:$0xff] }
 0x241   :  { %v1206_v62 = vadd.f32 %v1205_v38, %v1149_v23  ;;  %v7791_v23 = vld [vmem:[%s9131_s4 + $0x30] sm:$0xff]  ;;  %9246 = vst [vmem:[#allocation15_spill] sm:$0xff] %v7806_v60 }
 0x242   :  { %v1578_v34 = vpop.f32.mrf.mxu0  ;;  %9243 = vst [vmem:[#allocation12_spill] sm:$0xff] %v7791_v23 }
 0x243   :  { %1676 = vst [vmem:[#allocation2 + $0x70] sm:$0xff] %v1206_v62  ;;  %v7801_v62 = vld [vmem:[%s9131_s4 + $0x40] sm:$0xff] }
 0x244   :  { %v1635_v29 = vpop.f32.mrf.mxu1  ;;  %9245 = vst [vmem:[#allocation14_spill] sm:$0xff] %v7801_v62 }
 0x246   :  { %v1421_v28 = vpop.f32.mrf.mxu2  ;;  %v1493_v45 = vpop.f32.mrf.mxu3 }
 0x247   :  { %v1422_v46 = vadd.f32 %v1421_v28, %v1356_v39  ;;  %v7811_v39 = vld [vmem:[%s9131_s4 + $0x50] sm:$0xff] }
 0x248   :  { %9247 = vst [vmem:[#allocation16_spill] sm:$0xff] %v7811_v39 }
 0x249   :  { %v1488_v5 = vadd.f32 %v1487_v44, %v1422_v46  ;;  %v7826_v46 = vld [vmem:[%s9131_s4 + $0x68] sm:$0xff] }
 0x24a   :  { %v1582_v13 = vpop.f32.mrf.mxu0  ;;  %9250 = vst [vmem:[#allocation19_spill] sm:$0xff] %v7826_v46 }
 0x24b   :  { %v1575_v35 = vadd.f32 %v1574_v41, %v1488_v5  ;;  %v7774_v41 = vld [vmem:[%s9131_s4 + $0x18] sm:$0xff] }
 0x24c   :  { %v1639_v63 = vpop.f32.mrf.mxu1  ;;  %9240 = vst [vmem:[#allocation9_spill] sm:$0xff] %v7774_v41  ;;  %v7836_v5 = vld [vmem:[%s9131_s4 + $0x78] sm:$0xff] }
 0x24d   :  { %v1632_v53 = vadd.f32 %v1631_v17, %v1575_v35  ;;  %v7779_v17 = vld [vmem:[%s9131_s4 + $0x20] sm:$0xff]  ;;  %9252 = vst [vmem:[#allocation21_spill] sm:$0xff] %v7836_v5  ;;  %v1376_v35 = vadd.f32 %v7703_v19, %v1279_v21 }
 0x24e   :  { %v1426_v27 = vpop.f32.mrf.mxu2  ;;  %v1499_v56 = vpop.f32.mrf.mxu3  ;;  %9241 = vst [vmem:[#allocation10_spill] sm:$0xff] %v7779_v17 }
 0x24f   :  { %1663 = vst.msk [vmem:[#allocation2 + $0x8] sm:$0xff] %vm729_vm2, %v1632_v53  ;;  %v1427_v10 = vadd.f32 %v1426_v27, %v1360_v51 }
 0x251   :  { %v1494_v18 = vadd.f32 %v1493_v45, %v1427_v10  ;;  %v7821_v45 = vld [vmem:[%s9131_s4 + $0x60] sm:$0xff] }
 0x252   :  { %v1586_v25 = vpop.f32.mrf.mxu0  ;;  %9249 = vst [vmem:[#allocation18_spill] sm:$0xff] %v7821_v45 }
 0x253   :  { %v1579_v32 = vadd.f32 %v1578_v34, %v1494_v18  ;;  %v7816_v34 = vld [vmem:[%s9131_s4 + $0x58] sm:$0xff] }
 0x254   :  { %v1643_v58 = vpop.f32.mrf.mxu1  ;;  %9248 = vst [vmem:[#allocation17_spill] sm:$0xff] %v7816_v34 }
 0x255   :  { %v1636_v36 = vadd.f32 %v1635_v29, %v1579_v32  ;;  %v7831_v29 = vld [vmem:[%s9131_s4 + $0x70] sm:$0xff]  ;;  %s7851_s4 = smov 0  }
 0x256   :  { %v1431_v33 = vpop.f32.mrf.mxu2  ;;  %v1505_v42 = vpop.f32.mrf.mxu3  ;;  %9251 = vst [vmem:[#allocation20_spill] sm:$0xff] %v7831_v29 }
 0x257   :  { %1665 = vst.msk [vmem:[#allocation2 + $0x18] sm:$0xff] %vm729_vm2, %v1636_v36  ;;  %v1432_v52 = vadd.f32 %v1431_v33, %v1364_v24 }
 0x259   :  { %v1500_v4 = vadd.f32 %v1499_v56, %v1432_v52  ;;  %v1295_v52 = vadd.f32 %v7719_v50, %v7727_v49 }
 0x25a   :  { %v1590_v37 = vpop.f32.mrf.mxu0 }
 0x25b   :  { %v1583_v6 = vadd.f32 %v1582_v13, %v1500_v4  ;;  %v1287_v13 = vadd.f32 %v7710_v54, %v7727_v49 }
 0x25c   :  { %v1647_v22 = vpop.f32.mrf.mxu1 }
 0x25d   :  { %v1640_v55 = vadd.f32 %v1639_v63, %v1583_v6  ;;  %v1380_v63 = vadd.f32 %v7712_v12, %v1287_v13 }
 0x25e   :  { %v1436_v9 = vpop.f32.mrf.mxu2  ;;  %v1511_v59 = vpop.f32.mrf.mxu3 }
 0x25f   :  { %1667 = vst.msk [vmem:[#allocation2 + $0x28] sm:$0xff] %vm729_vm2, %v1640_v55  ;;  %v1437_v31 = vadd.f32 %v1436_v9, %v1368_v3 }
 0x261   :  { %v1506_v11 = vadd.f32 %v1505_v42, %v1437_v31 }
 0x262   :  { %v1594_v53 = vpop.f32.mrf.mxu0 }
 0x263   :  { %v1587_v61 = vadd.f32 %v1586_v25, %v1506_v11  ;;  %v1384_v25 = vadd.f32 %v7721_v47, %v1295_v52  ;;  %v7849_v11 = vmov 0.0  }
 0x264   :  { %v1651_v10 = vpop.f32.mrf.mxu1 }
 0x265   :  { %v1644_v7 = vadd.f32 %v1643_v58, %v1587_v61 }
 0x266   :  { %v1441_v2 = vpop.f32.mrf.mxu2  ;;  %v1517_v26 = vpop.f32.mrf.mxu3 }
 0x267   :  { %1669 = vst.msk [vmem:[#allocation2 + $0x38] sm:$0xff] %vm729_vm2, %v1644_v7  ;;  %v1442_v38 = vadd.f32 %v1441_v2, %v1372_v57 }
 0x269   :  { %v1512_v44 = vadd.f32 %v1511_v59, %v1442_v38 }
 0x26a   :  { %v1598_v33 = vpop.f32.mrf.mxu0 }
 0x26b   :  { %v1591_v28 = vadd.f32 %v1590_v37, %v1512_v44 }
 0x26c   :  { %v1655_v15 = vpop.f32.mrf.mxu1 }
 0x26d   :  { %v1648_v51 = vadd.f32 %v1647_v22, %v1591_v28 }
 0x26e   :  { %v1446_v27 = vpop.f32.mrf.mxu2  ;;  %v1523_v24 = vpop.f32.mrf.mxu3 }
 0x26f   :  { %1671 = vst.msk [vmem:[#allocation2 + $0x48] sm:$0xff] %vm729_vm2, %v1648_v51  ;;  %v1447_v56 = vadd.f32 %v1446_v27, %v1376_v35 }
 0x271   :  { %v1518_v20 = vadd.f32 %v1517_v26, %v1447_v56 }
 0x272   :  { %v1602_v55 = vpop.f32.mrf.mxu0 }
 0x273   :  { %v1595_v18 = vadd.f32 %v1594_v53, %v1518_v20 }
 0x274   :  { %v1659_v31 = vpop.f32.mrf.mxu1 }
 0x275   :  { %v1652_v32 = vadd.f32 %v1651_v10, %v1595_v18 }
 0x276   :  { %v1451_v36 = vpop.f32.mrf.mxu2  ;;  %v1529_v58 = vpop.f32.mrf.mxu3 }
 0x277   :  { %1673 = vst.msk [vmem:[#allocation2 + $0x58] sm:$0xff] %vm729_vm2, %v1652_v32  ;;  %v1452_v19 = vadd.f32 %v1451_v36, %v1380_v63 }
 0x279   :  { %v1524_v42 = vadd.f32 %v1523_v24, %v1452_v19 }
 0x27b   :  { %v1599_v4 = vadd.f32 %v1598_v33, %v1524_v42 }
 0x27d   :  { %v1656_v54 = vadd.f32 %v1655_v15, %v1599_v4 }
 0x27e   :  { %v1456_v6 = vpop.f32.mrf.mxu2 }
 0x27f   :  { %1675 = vst.msk [vmem:[#allocation2 + $0x68] sm:$0xff] %vm729_vm2, %v1656_v54  ;;  %v1457_v12 = vadd.f32 %v1456_v6, %v1384_v25 }
 0x281   :  { %v1530_v3 = vadd.f32 %v1529_v58, %v1457_v12 }
 0x283   :  { %v1603_v9 = vadd.f32 %v1602_v55, %v1530_v3 }
 0x285   :  { %v1660_v16 = vadd.f32 %v1659_v31, %v1603_v9 }
 0x287   :  { %1677 = vst.msk [vmem:[#allocation2 + $0x78] sm:$0xff] %vm729_vm2, %v1660_v16 }
 0x288 LB: > { %v9253_v8 = vld [vmem:[#allocation5_spill] sm:$0xff]  ;;  %v9255_v30 = vld [vmem:[#allocation11_spill] sm:$0xff]  ;;  %v9256_v62 = vld [vmem:[#allocation14_spill] sm:$0xff]  ;;  %9269 = vst [vmem:[#allocation22_spill] sm:$0xff] %v6572_v11  ;;  %v1718_v4 = vrot.slane %v6572_v11, 6  ;;  %s6425_s16 = sshll.u32 %s6576_s4, 4  ;;  %s6576_s4 = sphi %s7851_s4, %s1705_s4   ;;  %v6572_v11 = vphi %v7849_v11, %v5889_v11  }
 0x289   : > { %v9254_v41 = vld [vmem:[#allocation9_spill] sm:$0xff]  ;;  %v9257_v60 = vld [vmem:[#allocation15_spill] sm:$0xff]  ;;  %v9258_v48 = vld [vmem:[#allocation6_spill] sm:$0xff]  ;;  %v7869_v59 = vand.u32 4294901760, %v9256_v62  ;;  %s1708_s17 = sshra.s32 %s6425_s16, 3  ;;  %s6582_s1 = smov 64  }
 0x28a   : > { %v9259_v1 = vld [vmem:[#allocation13_spill] sm:$0xff]  ;;  %v9260_v46 = vld [vmem:[#allocation19_spill] sm:$0xff]  ;;  %v9261_v45 = vld [vmem:[#allocation18_spill] sm:$0xff]  ;;  %v7878_v57 = vand.u32 4294901760, %v9258_v48  ;;  %v1719_v55 = vsel %vm729_vm2, %v1718_v4, 0  ;;  %v8000_v9 = vand.u32 4294901760, %v9257_v60 }
 0x28b   : > { %v9262_v39 = vld [vmem:[#allocation16_spill] sm:$0xff]  ;;  %v9263_v34 = vld [vmem:[#allocation17_spill] sm:$0xff]  ;;  %v9266_v17 = vld [vmem:[#allocation10_spill] sm:$0xff]  ;;  %v7863_v47 = vand.u32 4294901760, %v9261_v45  ;;  %v7896_v43 = vsub.f32 %v9256_v62, %v7869_v59  ;;  %v7969_v42 = vand.u32 4294901760, %v9260_v46  ;;  %v8006_v16 = vand.u32 4294901760, %v1719_v55 }
 0x28c   : > { %v9264_v29 = vld [vmem:[#allocation20_spill] sm:$0xff]  ;;  %v9267_v5 = vld [vmem:[#allocation21_spill] sm:$0xff]  ;;  %v7866_v49 = vand.u32 4294901760, %v9262_v39  ;;  %v7875_v37 = vand.u32 4294901760, %v9266_v17  ;;  %9271 = vst [vmem:[#allocation24_spill] sm:$0xff] %v7878_v57  ;;  %v7929_v27 = vsub.f32 %v9258_v48, %v7878_v57  ;;  %v7978_v25 = vand.u32 4294901760, %v9263_v34 }
 0x28d   : > { %v9265_v23 = vld [vmem:[#allocation12_spill] sm:$0xff]  ;;  %v7860_v50 = vand.u32 4294901760, %v9264_v29  ;;  %v7887_v22 = vsub.f32 %v9261_v45, %v7863_v47  ;;  %v7921_v51 = vand.u32 4294901760, %v7896_v43  ;;  %v7966_v52 = vand.u32 4294901760, %v9267_v5  ;;  %s6439_s18 = sshll.u32 %s1708_s17, 4  ;;  %s5898_s20 = ssub.s32 3, %s6576_s4 }
 0x28e   : > { %v9268_v0 = vld [vmem:[#allocation4_spill] sm:$0xff]  ;;  %v7872_v61 = vand.u32 4294901760, %v9265_v23  ;;  %9270 = vst [vmem:[#allocation23_spill] sm:$0xff] %v7875_v37  ;;  %v7891_v2 = vsub.f32 %v9262_v39, %v7866_v49  ;;  %v7918_v35 = vsub.f32 %v9266_v17, %v7875_v37  ;;  %v7959_v19 = vand.u32 4294901760, %v7929_v27  ;;  %s8267_s19 = scalar_lea.vmem [#allocation2], %s6439_s18  ;;  %s6436_s21 = sshll.u32 %s6576_s4, 1 }
 0x28f   : > { %1730 = vmatpush.msra.mxu0 %v7860_v50  ;;  %v7883_v7 = vsub.f32 %v9264_v29, %v7860_v50  ;;  %1862 = vmatpush.msra.mxu3 %v7860_v50  ;;  %v7903_v21 = vand.u32 4294901760, %v9268_v0  ;;  %v7910_v28 = vand.u32 4294901760, %v7887_v22  ;;  %9277 = vst [vmem:[#allocation30_spill] sm:$0xff] %v7921_v51  ;;  %v1783_v32 = vsub.f32 %v7896_v43, %v7921_v51  ;;  %s6437_s22 = sshll.u32 %s5898_s20, 1  ;;  %s5895_s23 = scalar_lea.vmem [#allocation3], %s6436_s21 }
 0x290   : > { %v7900_v38 = vsub.f32 %v9265_v23, %v7872_v61  ;;  %v7914_v26 = vand.u32 4294901760, %v7891_v2  ;;  %9276 = vst [vmem:[#allocation29_spill] sm:$0xff] %v7918_v35  ;;  %v7953_v24 = vand.u32 4294901760, %v7918_v35  ;;  %v7988_v12 = vsub.f32 %v9267_v5, %v7966_v52  ;;  %s5900_s24 = scalar_lea.vmem [#allocation3], %s6437_s22  ;;  %s1705_s4 = sadd.s32 1, %s6576_s4  }
 0x291   : > { %9272 = vst [vmem:[#allocation25_spill] sm:$0xff] %v7903_v21  ;;  %1732 = vmatpush.msra.mxu0 %v7863_v47  ;;  %v7907_v44 = vand.u32 4294901760, %v7883_v7  ;;  %1825 = vmatpush.msra.mxu2 %v7883_v7  ;;  %v1771_v10 = vsub.f32 %v7887_v22, %v7910_v28  ;;  %v7942_v20 = vsub.f32 %v9268_v0, %v7903_v21  ;;  %v7981_v54 = vand.u32 4294901760, %v1783_v32  ;;  %p1702_p0 = scmp.ge.s32.totalorder %s1705_s4, 4  }
 0x292   : > { %9274 = vst [vmem:[#allocation27_spill] sm:$0xff] %v7910_v28  ;;  %1864 = vmatpush.msra.mxu3 %v7863_v47  ;;  %v7925_v53 = vand.u32 4294901760, %v7900_v38  ;;  %v1777_v13 = vsub.f32 %v7891_v2, %v7914_v26  ;;  %v1795_v6 = vsub.f32 %v7918_v35, %v7953_v24  ;;  %v7992_v58 = vsub.f32 %v9260_v46, %v7969_v42 }
 0x293   : > { %9273 = vst [vmem:[#allocation26_spill] sm:$0xff] %v7907_v44  ;;  %v1765_v56 = vsub.f32 %v7883_v7, %v7907_v44  ;;  %1734 = vmatpush.msra.mxu0 %v7866_v49  ;;  %1828 = vmatpush.msra.mxu2 %v7887_v22  ;;  %v7946_v63 = vand.u32 4294901760, %v1771_v10  ;;  %v7974_v15 = vand.u32 4294901760, %v7942_v20  ;;  %v1801_v3 = vsub.f32 %v7929_v27, %v7959_v19 }
 0x294   : > { %9275 = vst [vmem:[#allocation28_spill] sm:$0xff] %v7914_v26  ;;  %1866 = vmatpush.msra.mxu3 %v7866_v49  ;;  %v1789_v36 = vsub.f32 %v7900_v38, %v7925_v53  ;;  %v7962_v33 = vand.u32 4294901760, %v1777_v13  ;;  %v8013_v10 = vsub.f32 %v9263_v34, %v7978_v25  ;;  %v8020_v32 = vand.u32 4294901760, %v9259_v1 }
 0x295   : > { %9278 = vst [vmem:[#allocation31_spill] sm:$0xff] %v7925_v53  ;;  %v7944_v18 = vand.u32 4294901760, %v1765_v56  ;;  %1736 = vmatpush.msra.mxu0 %v7869_v59  ;;  %1831 = vmatpush.msra.mxu2 %v7891_v2  ;;  %v8009_v56 = vand.u32 4294901760, %v7988_v12  ;;  %v1807_v13 = vsub.f32 %v7942_v20, %v7974_v15  ;;  %v8027_v4 = vsub.f32 %v1719_v55, %v8006_v16 }
 0x296   : > { %9279 = vst [vmem:[#allocation32_spill] sm:$0xff] %v7929_v27  ;;  %1868 = vmatpush.msra.mxu3 %v7869_v59  ;;  %v8003_v31 = vand.u32 4294901760, %v1789_v36  ;;  %v8023_v36 = vand.u32 4294901760, %v1795_v6  ;;  %v8032_v5 = vand.u32 4294901760, %v7992_v58  ;;  %v8038_v17 = vsub.f32 %v9257_v60, %v8000_v9 }
 0x297   : > { %9280 = vst [vmem:[#allocation33_spill] sm:$0xff] %v7942_v20  ;;  %1767 = vmatpush.msra.mxu1 %v7944_v18  ;;  %1738 = vmatpush.msra.mxu0 %v7872_v61  ;;  %v2002_v0 = vsub.f32 %v7988_v12, %v8009_v56  ;;  %v8041_v6 = vand.u32 4294901760, %v9255_v30  ;;  %v8044_v55 = vand.u32 4294901760, %v1801_v3  ;;  %v8048_v23 = vand.u32 4294901760, %v8027_v4 }
 0x298   : > { %9281 = vst [vmem:[#allocation34_spill] sm:$0xff] %v7953_v24  ;;  %1834 = vmatpush.msra.mxu2 %v7896_v43  ;;  %1870 = vmatpush.msra.mxu3 %v7872_v61  ;;  %v8051_v29 = vand.u32 4294901760, %v8013_v10  ;;  %v8059_v39 = vsub.f32 %v9259_v1, %v8020_v32  ;;  %v8062_v3 = vand.u32 4294901760, %v9254_v41  ;;  %v8065_v45 = vand.u32 4294901760, %v1807_v13 }
 0x299   : > { %9282 = vst [vmem:[#allocation35_spill] sm:$0xff] %v7959_v19  ;;  %1773 = vmatpush.msra.mxu1 %v7946_v63  ;;  %1740 = vmatpush.msra.mxu0 %v7875_v37  ;;  %v8055_v34 = vand.u32 4294901760, %v2002_v0  ;;  %v1748_v46 = vsub.f32 %v8027_v4, %v8048_v23  ;;  %v2008_v0 = vsub.f32 %v7992_v58, %v8032_v5  ;;  %v8075_v1 = vand.u32 4294901760, %v8038_v17 }
 0x29a   : > { %9283 = vst [vmem:[#allocation36_spill] sm:$0xff] %v7974_v15  ;;  %1837 = vmatpush.msra.mxu2 %v7900_v38  ;;  %1872 = vmatpush.msra.mxu3 %v7875_v37  ;;  %v8079_v48 = vsub.f32 %v9255_v30, %v8041_v6  ;;  %v8082_v13 = vand.u32 4294901760, %v9253_v8  ;;  %v2014_v62 = vsub.f32 %v8013_v10, %v8051_v29  ;;  %v8091_v11 = vand.u32 4294901760, %v8059_v39 }
 0x29b   : > { %1779 = vmatpush.msra.mxu1 %v7962_v33  ;;  %1742 = vmatpush.msra.mxu0 %v7878_v57  ;;  %9284 = vst [vmem:[#allocation37_spill] sm:$0xff] %v8044_v55  ;;  %v1749_v60 = vand.u32 4294901760, %v1748_v46  ;;  %v8095_v30 = vsub.f32 %v9254_v41, %v8062_v3  ;;  %v8098_v46 = vand.u32 4294901760, %v2008_v0  ;;  %v2020_v40 = vsub.f32 %v8038_v17, %v8075_v1 }
 0x29c   : > { %1840 = vmatpush.msra.mxu2 %v7918_v35  ;;  %1874 = vmatpush.msra.mxu3 %v7878_v57  ;;  %9285 = vst [vmem:[#allocation38_spill] sm:$0xff] %v8055_v34  ;;  %v8105_v14 = vand.u32 4294901760, %v8079_v48  ;;  %v8113_v0 = vand.u32 4294901760, %v2014_v62  ;;  %v2026_v41 = vsub.f32 %v8059_v39, %v8091_v11 }
 0x29d   : > { %1785 = vmatpush.msra.mxu1 %v7981_v54  ;;  %1744 = vmatpush.msra.mxu0 %v7903_v21  ;;  %9286 = vst [vmem:[#allocation39_spill] sm:$0xff] %v8065_v45  ;;  %v8126_v62 = vand.u32 4294901760, %v2020_v40 }
 0x29e   : > { %1843 = vmatpush.msra.mxu2 %v7929_v27  ;;  %1876 = vmatpush.msra.mxu3 %v7903_v21  ;;  %9287 = vst [vmem:[#allocation40_spill] sm:$0xff] %v8098_v46 }
 0x29f   : > { %1895 = vmatpush.msrb.mxu0 %v7907_v44  ;;  %1791 = vmatpush.msra.mxu1 %v8003_v31  ;;  %9288 = vst [vmem:[#allocation41_spill] sm:$0xff] %v8113_v0 }
 0x2a0   : > { %1846 = vmatpush.msra.mxu2 %v7942_v20  ;;  %1880 = vmatmul.f32.vlgmr.msra.gmra.mxu3 %v8048_v23  ;;  %9289 = vst [vmem:[#allocation42_spill] sm:$0xff] %v8126_v62 }
 0x2a1   : > { %1899 = vmatpush.msrb.mxu0 %v7910_v28  ;;  %1797 = vmatpush.msra.mxu1 %v8023_v36 }
 0x2a2   : > { %1849 = vmatmul.f32.vlgmr.msra.gmra.mxu2 %v8027_v4  ;;  %2004 = vmatpush.msrb.mxu3 %v8055_v34 }
 0x2a3   : > { %1903 = vmatpush.msrb.mxu0 %v7914_v26  ;;  %1803 = vmatpush.msra.mxu1 %v8044_v55  ;;  %v8137_v26 = vand.u32 4294901760, %v2026_v41 }
 0x2a4   : > { %1967 = vmatpush.msrb.mxu2 %v7966_v52  ;;  %1750 = vmatmul.f32.vlgmr.msra.gmra.mxu0 %v1749_v60 }
 0x2a5   : > { %1907 = vmatpush.msrb.mxu0 %v7921_v51  ;;  %1809 = vmatpush.msra.mxu1 %v8065_v45  ;;  %v8109_v51 = vsub.f32 %v9253_v8, %v8082_v13  ;;  %v2032_v8 = vsub.f32 %v8079_v48, %v8105_v14  ;;  %9290 = vst [vmem:[#allocation43_spill] sm:$0xff] %v8137_v26 }
 0x2a6   : > { %1811 = vmatmul.f32.vlgmr.msra.gmra.mxu1 %v8006_v16  ;;  %1969 = vmatpush.msrb.mxu2 %v7969_v42 }
 0x2a7   : > { %1938 = vmatpush.msrb.mxu1 %v7860_v50  ;;  %1911 = vmatpush.msrb.mxu0 %v7925_v53  ;;  %v8120_v53 = vand.u32 4294901760, %v8095_v30 }
 0x2a8   : > { %1971 = vmatpush.msrb.mxu2 %v7978_v25  ;;  %2010 = vmatpush.msrb.mxu3 %v8098_v46 }
 0x2a9   : > { %1940 = vmatpush.msrb.mxu1 %v7863_v47  ;;  %1915 = vmatpush.msrb.mxu0 %v7953_v24  ;;  %v8131_v24 = vand.u32 4294901760, %v8109_v51  ;;  %v2038_v40 = vsub.f32 %v8095_v30, %v8120_v53 }
 0x2aa   : > { %1973 = vmatpush.msrb.mxu2 %v8000_v9  ;;  %2016 = vmatpush.msrb.mxu3 %v8113_v0 }
 0x2ab   : > { %1942 = vmatpush.msrb.mxu1 %v7866_v49  ;;  %1919 = vmatpush.msrb.mxu0 %v7959_v19  ;;  %v8145_v19 = vand.u32 4294901760, %v2032_v8  ;;  %v2044_v28 = vsub.f32 %v8109_v51, %v8131_v24  ;;  %v8153_v41 = vand.u32 4294901760, %v2038_v40  ;;  %v9299_v40 = vld [vmem:[#allocation35_spill] sm:$0xff] }
 0x2ac   : > { %1975 = vmatpush.msrb.mxu2 %v8020_v32  ;;  %2022 = vmatpush.msrb.mxu3 %v8126_v62 }
 0x2ad   : > { %1944 = vmatpush.msrb.mxu1 %v7869_v59  ;;  %1923 = vmatpush.msrb.mxu0 %v7974_v15  ;;  %9291 = vst [vmem:[#allocation44_spill] sm:$0xff] %v8145_v19  ;;  %v8159_v8 = vand.u32 4294901760, %v2044_v28  ;;  %v9296_v28 = vld [vmem:[#allocation30_spill] sm:$0xff] }
 0x2ae   : > { %1925 = vmatmul.f32.vlgmr.msrb.gmra.mxu0 %v8006_v16  ;;  %1977 = vmatpush.msrb.mxu2 %v8041_v6  ;;  %9292 = vst [vmem:[#allocation45_spill] sm:$0xff] %v8153_v41 }
 0x2af   : > { %1946 = vmatpush.msrb.mxu1 %v7872_v61  ;;  %2062 = vmatpush.msra.mxu0 %v7988_v12  ;;  %9293 = vst [vmem:[#allocation46_spill] sm:$0xff] %v8159_v8 }
 0x2b0   : > { %2028 = vmatpush.msrb.mxu3 %v8137_v26  ;;  %1979 = vmatpush.msrb.mxu2 %v8062_v3 }
 0x2b1   : > { %1948 = vmatpush.msrb.mxu1 %v7875_v37  ;;  %2065 = vmatpush.msra.mxu0 %v7992_v58 }
 0x2b2   : > { %2034 = vmatpush.msrb.mxu3 %v8145_v19  ;;  %1981 = vmatpush.msrb.mxu2 %v8082_v13 }
 0x2b3   : > { %1950 = vmatpush.msrb.mxu1 %v7878_v57  ;;  %2068 = vmatpush.msra.mxu0 %v8013_v10 }
 0x2b4   : > { %2040 = vmatpush.msrb.mxu3 %v8153_v41  ;;  %2132 = vmatpush.msra.mxu2 %v8009_v56 }
 0x2b5   : > { %1952 = vmatpush.msrb.mxu1 %v7903_v21  ;;  %1987 = vmatmul.f32.vlgmr.msrb.gmra.mxu2 %v1749_v60  ;;  %v9295_v60 = vld [vmem:[#allocation28_spill] sm:$0xff] }
 0x2b6   : > { %1954 = vmatmul.f32.vlgmr.msrb.gmra.mxu1 %v8006_v16  ;;  %2046 = vmatpush.msrb.mxu3 %v8159_v8 }
 0x2b7   : > { %2099 = vmatpush.msra.mxu1 %v7966_v52  ;;  %2136 = vmatpush.msra.mxu2 %v8032_v5 }
 0x2b8   : > { %2175 = vmatpush.msra.mxu3 %v7966_v52  ;;  %2071 = vmatpush.msra.mxu0 %v8038_v17 }
 0x2b9   : > { %2101 = vmatpush.msra.mxu1 %v7969_v42  ;;  %2140 = vmatpush.msra.mxu2 %v8051_v29 }
 0x2ba   : > { %2177 = vmatpush.msra.mxu3 %v7969_v42  ;;  %2074 = vmatpush.msra.mxu0 %v8059_v39 }
 0x2bb   : > { %2103 = vmatpush.msra.mxu1 %v7978_v25  ;;  %2144 = vmatpush.msra.mxu2 %v8075_v1 }
 0x2bc   : > { %2179 = vmatpush.msra.mxu3 %v7978_v25  ;;  %2077 = vmatpush.msra.mxu0 %v8079_v48 }
 0x2bd   : > { %2048 = vmatmul.f32.vlgmr.msrb.gmra.mxu3 %v8006_v16  ;;  %2148 = vmatpush.msra.mxu2 %v8091_v11 }
 0x2be   : > { %2181 = vmatpush.msra.mxu3 %v8000_v9  ;;  %2105 = vmatpush.msra.mxu1 %v8000_v9 }
 0x2bf   : > { %2152 = vmatpush.msra.mxu2 %v8105_v14  ;;  %2080 = vmatpush.msra.mxu0 %v8095_v30 }
 0x2c0   : > { %2183 = vmatpush.msra.mxu3 %v8020_v32  ;;  %2107 = vmatpush.msra.mxu1 %v8020_v32 }
 0x2c1   : > { %2156 = vmatpush.msra.mxu2 %v8120_v53  ;;  %2083 = vmatpush.msra.mxu0 %v8109_v51 }
 0x2c2   : > { %2185 = vmatpush.msra.mxu3 %v8041_v6  ;;  %2109 = vmatpush.msra.mxu1 %v8041_v6 }
 0x2c3   : > { %2160 = vmatpush.msra.mxu2 %v8131_v24  ;;  %2086 = vmatmul.f32.vlgmr.msra.gmra.mxu0 %v8027_v4  ;;  %v9298_v4 = vld [vmem:[#allocation34_spill] sm:$0xff] }
 0x2c4   : > { %2187 = vmatpush.msra.mxu3 %v8062_v3  ;;  %2162 = vmatmul.f32.vlgmr.msra.gmra.mxu2 %v8006_v16 }
 0x2c5   : > { %2111 = vmatpush.msra.mxu1 %v8062_v3  ;;  %2340 = vmatpush.msrb.mxu2 %v7883_v7 }
 0x2c6   : > { %2189 = vmatpush.msra.mxu3 %v8082_v13  ;;  %2245 = vmatpush.msrb.mxu0 %v7860_v50 }
 0x2c7   : > { %2191 = vmatmul.f32.vlgmr.msra.gmra.mxu3 %v8006_v16  ;;  %2113 = vmatpush.msra.mxu1 %v8082_v13  ;;  %v9297_v16 = vld [vmem:[#allocation31_spill] sm:$0xff] }
 0x2c8   : > { %2117 = vmatmul.f32.vlgmr.msra.gmra.mxu1 %v8048_v23  ;;  %2377 = vmatpush.msrb.mxu3 %v7860_v50  ;;  %v9294_v23 = vld [vmem:[#allocation27_spill] sm:$0xff] }
 0x2c9   : > { %2282 = vmatpush.msrb.mxu1 %v7944_v18  ;;  %2343 = vmatpush.msrb.mxu2 %v7887_v22 }
 0x2ca   : > { %2379 = vmatpush.msrb.mxu3 %v7863_v47  ;;  %2247 = vmatpush.msrb.mxu0 %v7863_v47 }
 0x2cb   : > { %2288 = vmatpush.msrb.mxu1 %v7946_v63  ;;  %2346 = vmatpush.msrb.mxu2 %v7891_v2 }
 0x2cc   : > { %2381 = vmatpush.msrb.mxu3 %v7866_v49  ;;  %2249 = vmatpush.msrb.mxu0 %v7866_v49 }
 0x2cd   : > { %2294 = vmatpush.msrb.mxu1 %v7962_v33  ;;  %2349 = vmatpush.msrb.mxu2 %v7896_v43 }
 0x2ce   : > { %2383 = vmatpush.msrb.mxu3 %v7869_v59  ;;  %2251 = vmatpush.msrb.mxu0 %v7869_v59 }
 0x2cf   : > { %2300 = vmatpush.msrb.mxu1 %v7981_v54  ;;  %2352 = vmatpush.msrb.mxu2 %v7900_v38 }
 0x2d0   : > { %2385 = vmatpush.msrb.mxu3 %v7872_v61  ;;  %2253 = vmatpush.msrb.mxu0 %v7872_v61 }
 0x2d1   : > { %2306 = vmatpush.msrb.mxu1 %v8003_v31  ;;  %2355 = vmatpush.msrb.mxu2 %v7918_v35 }
 0x2d2   : > { %2387 = vmatpush.msrb.mxu3 %v7875_v37  ;;  %2255 = vmatpush.msrb.mxu0 %v7875_v37 }
 0x2d3   : > { %2312 = vmatpush.msrb.mxu1 %v8023_v36  ;;  %2358 = vmatpush.msrb.mxu2 %v7929_v27 }
 0x2d4   : > { %2389 = vmatpush.msrb.mxu3 %v7878_v57  ;;  %2257 = vmatpush.msrb.mxu0 %v7878_v57 }
 0x2d5   : > { %2318 = vmatpush.msrb.mxu1 %v8044_v55  ;;  %2361 = vmatpush.msrb.mxu2 %v7942_v20 }
 0x2d6   : > { %2391 = vmatpush.msrb.mxu3 %v7903_v21  ;;  %2259 = vmatpush.msrb.mxu0 %v7903_v21 }
 0x2d7   : > { %2324 = vmatpush.msrb.mxu1 %v8065_v45  ;;  %2482 = vmatpush.msra.mxu2 %v7966_v52 }
 0x2d8   : > { %2519 = vmatpush.msra.mxu3 %v8055_v34  ;;  %2410 = vmatpush.msra.mxu0 %v7907_v44 }
 0x2d9   : > { %2453 = vmatpush.msra.mxu1 %v7860_v50  ;;  %2484 = vmatpush.msra.mxu2 %v7969_v42 }
 0x2da   : > { %2525 = vmatpush.msra.mxu3 %v8098_v46  ;;  %2414 = vmatpush.msra.mxu0 %v9294_v23 }
 0x2db   : > { %2455 = vmatpush.msra.mxu1 %v7863_v47  ;;  %2486 = vmatpush.msra.mxu2 %v7978_v25 }
 0x2dc   : > { %2531 = vmatpush.msra.mxu3 %v8113_v0  ;;  %2418 = vmatpush.msra.mxu0 %v9295_v60 }
 0x2dd   : > { %2457 = vmatpush.msra.mxu1 %v7866_v49  ;;  %2488 = vmatpush.msra.mxu2 %v8000_v9 }
 0x2de   : > { %2537 = vmatpush.msra.mxu3 %v8126_v62  ;;  %2422 = vmatpush.msra.mxu0 %v9296_v28 }
 0x2df   : > { %2459 = vmatpush.msra.mxu1 %v7869_v59  ;;  %2490 = vmatpush.msra.mxu2 %v8020_v32 }
 0x2e0   : > { %2543 = vmatpush.msra.mxu3 %v8137_v26  ;;  %2426 = vmatpush.msra.mxu0 %v9297_v16 }
 0x2e1   : > { %2461 = vmatpush.msra.mxu1 %v7872_v61  ;;  %2492 = vmatpush.msra.mxu2 %v8041_v6 }
 0x2e2   : > { %2549 = vmatpush.msra.mxu3 %v8145_v19  ;;  %2430 = vmatpush.msra.mxu0 %v9298_v4  ;;  %v9300_v19 = vld [vmem:[#allocation7_spill] sm:$0xff] }
 0x2e3   : > { %2463 = vmatpush.msra.mxu1 %v7875_v37  ;;  %2494 = vmatpush.msra.mxu2 %v8062_v3 }
 0x2e4   : > { %2555 = vmatpush.msra.mxu3 %v8153_v41  ;;  %2434 = vmatpush.msra.mxu0 %v9299_v40  ;;  %v8270_v40 = vld [vmem:[%s8267_s19] sm:$0xff] }
 0x2e5   : > { %2465 = vmatpush.msra.mxu1 %v7878_v57  ;;  %2496 = vmatpush.msra.mxu2 %v8082_v13  ;;  %9301 = vst [vmem:[#allocation47_spill] sm:$0xff] %v8270_v40 }
 0x2e6   : > { %2561 = vmatpush.msra.mxu3 %v8159_v8  ;;  %2438 = vmatpush.msra.mxu0 %v7974_v15 }
 0x2e7   : > { %2467 = vmatpush.msra.mxu1 %v7903_v21 }
 0x321   : > { %v1751_v28 = vpop.f32.mrf.mxu0 }
 0x322   : > { %v1752_v26 = vadd.f32 %v1751_v28, %v9300_v19 }
 0x323   : > { %v1812_v60 = vpop.f32.mrf.mxu1  ;;  %v1881_v0 = vpop.f32.mrf.mxu3 }
 0x324   : > { %v1813_v16 = vadd.f32 %v1812_v60, %v1752_v26  ;;  %v9302_v60 = vld [vmem:[#allocation8_spill] sm:$0xff] }
 0x325   : > { %v1850_v62 = vpop.f32.mrf.mxu2 }
 0x326   : > { %v1851_v23 = vadd.f32 %v1850_v62, %v1813_v16 }
 0x328   : > { %v1882_v41 = vadd.f32 %v1881_v0, %v1851_v23 }
 0x32b   : > { %v1926_v44 = vpop.f32.mrf.mxu0 }
 0x32c   : > { %v1927_v4 = vadd.f32 %v1926_v44, %v1882_v41 }
 0x333   : > { %v1955_v15 = vpop.f32.mrf.mxu1 }
 0x334   : > { %v1956_v8 = vadd.f32 %v1955_v15, %v1927_v4 }
 0x336   : > { %v2195_v28 = vadd.f32 %v1956_v8, %v8270_v40 }
 0x338   : > { %v6428_v19 = vmul.f32 -1.442695, %v2195_v28  ;;  %v1988_v26 = vpop.f32.mrf.mxu2 }
 0x339   : > { %v1989_v62 = vadd.f32 %v1988_v26, %v9302_v60 }
 0x33a   : > { %6506 = vpow2.f32 %v6428_v19 }
 0x340   : > { %v6507_v16 = vpop.eup %6506  ;;  %v2049_v46 = vpop.f32.mrf.mxu3 }
 0x341   : > { %v2199_v0 = vadd.f32 1.0, %v6507_v16  ;;  %v2050_v23 = vadd.f32 %v2049_v46, %v1989_v62  ;;  %v2087_v44 = vpop.f32.mrf.mxu0  ;;  %v8275_v16 = vld [vmem:[%s8267_s19 + $0x8] sm:$0xff] }
 0x343   : > { %6508 = vrcp.f32 %v2199_v0  ;;  %v2088_v41 = vadd.f32 %v2087_v44, %v2050_v23  ;;  %v2211_v19 = vand.u32 2147483648, %v2199_v0  ;;  %v2209_v26 = vand.u32 2147483647, %v2199_v0 }
 0x344   : > { %vm2205_vm8 = vweird.f32 %v2199_v0 }
 0x345   : > { %v2118_v34 = vpop.f32.mrf.mxu1  ;;  %v2212_v46 = vor.u32 1.1754944e-38, %v2211_v19  ;;  %vm2210_vm12 = vcmp.eq.f32.partialorder %v2209_v26, 8.507059e+37 }
 0x346   : > { %v2119_v21 = vadd.f32 %v2118_v34, %v2088_v41  ;;  %v9303_v41 = vld [vmem:[#allocation22_spill] sm:$0xff] }
 0x347   : > { %v2163_v57 = vpop.f32.mrf.mxu2 }
 0x348   : > { %v2164_v4 = vadd.f32 %v2163_v57, %v2119_v21 }
 0x349   : > { %v6509_v20 = vpop.eup %6508 }
 0x34a   : > { %v2201_v15 = vmul.f32 %v6509_v20, %v2199_v0  ;;  %v2192_v28 = vpop.f32.mrf.mxu3  ;;  %vm2206_vm7 = vweird.f32 %v6509_v20 }
 0x34b   : > { %v2193_v60 = vadd.f32 %v2192_v28, %v2164_v4  ;;  %vm2207_vm11 = vmor %vm2205_vm8, %vm2206_vm7 }
 0x34c   : > { %v2202_v8 = vsub.f32 1.0, %v2201_v15 }
 0x34e   : > { %v2203_v40 = vmul.f32 %v6509_v20, %v2202_v8 }
 0x350   : > { %v2204_v27 = vadd.f32 %v6509_v20, %v2203_v40 }
 0x352   : > { %v2208_v62 = vsel %vm2207_vm11, %v6509_v20, %v2204_v27 }
 0x353   : > { %v2213_v34 = vsel %vm2210_vm12, %v2212_v46, %v2208_v62  ;;  %v9304_v62 = vld [vmem:[#allocation32_spill] sm:$0xff] }
 0x354   : > { %v2215_v23 = vmul.f32 %v2213_v34, %v2193_v60 }
 0x356   : > { %v2216_v44 = vadd.f32 %v2215_v23, %v8275_v16  ;;  %v9306_v23 = vld [vmem:[#allocation33_spill] sm:$0xff] }
 0x358   : > { %6510 = vtanh.f32 %v2216_v44  ;;  %v9307_v44 = vld [vmem:[#allocation25_spill] sm:$0xff] }
 0x35e   : > { %v6511_v57 = vpop.eup %6510 }
 0x35f   : > { %v2219_v21 = vrot.slane %v6511_v57, 2 }
 0x361   : > { %v2221_v15 = vsub.f32 %v9303_v41, %v2219_v21  ;;  %v9309_v21 = vld [vmem:[#allocation40_spill] sm:$0xff]  ;;  %v9310_v41 = vld [vmem:[#allocation26_spill] sm:$0xff] }
 0x363   : > { %v2223_v8 = vrot.slane %v2221_v15, 6  ;;  %v9311_v15 = vld [vmem:[#allocation41_spill] sm:$0xff] }
 0x365   : > { %2224 = vrot.lane.b32.xlu0 %v2223_v8, %s6582_s1  ;;  %v9312_v8 = vld [vmem:[#allocation27_spill] sm:$0xff] }
 0x3d7   : > { %v2225_v40 = vpop.permute.xlu0 %2224 }
 0x3d8   : > { %v2227_v0 = vmul.f32 %v2225_v40, %v2213_v34  ;;  %v9305_v34 = vld [vmem:[#allocation24_spill] sm:$0xff]  ;;  %v9313_v40 = vld [vmem:[#allocation42_spill] sm:$0xff] }
 0x3da   : > { %2229 = vrot.lane.b32.xlu0 %v2227_v0, %s6582_s1  ;;  %v9314_v0 = vld [vmem:[#allocation28_spill] sm:$0xff] }
 0x44c   : > { %v2230_v27 = vpop.permute.xlu0 %2229 }
 0x44d   : > { %v8281_v20 = vadd.f32 %v6511_v57, %v2230_v27  ;;  %v9308_v57 = vld [vmem:[#allocation38_spill] sm:$0xff]  ;;  %v9315_v27 = vld [vmem:[#allocation43_spill] sm:$0xff] }
 0x44f   : > { %v2234_v60 = vsel %vm729_vm2, %v8281_v20, 0 }
 0x450   : > { %v2260_v4 = vand.u32 4294901760, %v2234_v60 }
 0x452   : > { %v2261_v28 = vsub.f32 %v2234_v60, %v2260_v4  ;;  %2326 = vmatmul.f32.vlgmr.msrb.gmra.mxu1 %v2260_v4  ;;  %v9316_v60 = vld [vmem:[#allocation30_spill] sm:$0xff] }
 0x453   : > { %2614 = vmatpush.msrb.mxu1 %v7966_v52 }
 0x454   : > { %2364 = vmatmul.f32.vlgmr.msrb.gmra.mxu2 %v2261_v28  ;;  %v2262_v19 = vand.u32 4294901760, %v2261_v28 }
 0x455   : > { %2616 = vmatpush.msrb.mxu1 %v7969_v42  ;;  %2647 = vmatpush.msrb.mxu2 %v8009_v56 }
 0x456   : > { %2395 = vmatmul.f32.vlgmr.msrb.gmra.mxu3 %v2262_v19  ;;  %v2263_v26 = vsub.f32 %v2261_v28, %v2262_v19 }
 0x457   : > { %2618 = vmatpush.msrb.mxu1 %v7978_v25  ;;  %2651 = vmatpush.msrb.mxu2 %v8032_v5 }
 0x458   : > { %2690 = vmatpush.msrb.mxu3 %v7966_v52  ;;  %v2264_v46 = vand.u32 4294901760, %v2263_v26  ;;  %v9320_v26 = vld [vmem:[#allocation34_spill] sm:$0xff] }
 0x459   : > { %2620 = vmatpush.msrb.mxu1 %v8000_v9  ;;  %2655 = vmatpush.msrb.mxu2 %v8051_v29 }
 0x45a   : > { %2692 = vmatpush.msrb.mxu3 %v7969_v42  ;;  %2265 = vmatmul.f32.vlgmr.msrb.gmra.mxu0 %v2264_v46 }
 0x45b   : > { %2469 = vmatmul.f32.vlgmr.msra.gmra.mxu1 %v2260_v4  ;;  %2577 = vmatpush.msrb.mxu0 %v7988_v12 }
 0x45c   : > { %2622 = vmatpush.msrb.mxu1 %v8020_v32  ;;  %2659 = vmatpush.msrb.mxu2 %v8075_v1 }
 0x45d   : > { %2694 = vmatpush.msrb.mxu3 %v7978_v25  ;;  %2502 = vmatmul.f32.vlgmr.msra.gmra.mxu2 %v2264_v46  ;;  %v9321_v46 = vld [vmem:[#allocation46_spill] sm:$0xff] }
 0x45e   : > { %2580 = vmatpush.msrb.mxu0 %v7992_v58  ;;  %2624 = vmatpush.msrb.mxu1 %v8041_v6 }
 0x45f   : > { %2663 = vmatpush.msrb.mxu2 %v8091_v11  ;;  %2696 = vmatpush.msrb.mxu3 %v8000_v9 }
 0x460   : > { %2563 = vmatmul.f32.vlgmr.msra.gmra.mxu3 %v2260_v4  ;;  %2583 = vmatpush.msrb.mxu0 %v8013_v10 }
 0x461   : > { %2626 = vmatpush.msrb.mxu1 %v8062_v3  ;;  %2667 = vmatpush.msrb.mxu2 %v8105_v14 }
 0x462   : > { %2698 = vmatpush.msrb.mxu3 %v8020_v32  ;;  %2586 = vmatpush.msrb.mxu0 %v8038_v17 }
 0x463   : > { %2628 = vmatpush.msrb.mxu1 %v8082_v13  ;;  %2671 = vmatpush.msrb.mxu2 %v8120_v53 }
 0x464   : > { %2700 = vmatpush.msrb.mxu3 %v8041_v6  ;;  %2440 = vmatmul.f32.vlgmr.msra.gmra.mxu0 %v2260_v4 }
 0x465   : > { %2632 = vmatmul.f32.vlgmr.msrb.gmra.mxu1 %v2262_v19  ;;  %2589 = vmatpush.msrb.mxu0 %v8059_v39  ;;  %v9319_v19 = vld [vmem:[#allocation45_spill] sm:$0xff] }
 0x466   : > { %2675 = vmatpush.msrb.mxu2 %v8131_v24  ;;  %2702 = vmatpush.msrb.mxu3 %v8062_v3 }
 0x467   : > { %2677 = vmatmul.f32.vlgmr.msrb.gmra.mxu2 %v2260_v4  ;;  %2592 = vmatpush.msrb.mxu0 %v8079_v48 }
 0x468   : > { %2704 = vmatpush.msrb.mxu3 %v8082_v13  ;;  %2806 = vmatpush.msra.mxu1 %v7944_v18 }
 0x469   : > { %2706 = vmatmul.f32.vlgmr.msrb.gmra.mxu3 %v2260_v4  ;;  %2595 = vmatpush.msrb.mxu0 %v8095_v30  ;;  %v9317_v4 = vld [vmem:[#allocation44_spill] sm:$0xff] }
 0x46a   : > { %2812 = vmatpush.msra.mxu1 %v7946_v63  ;;  %2864 = vmatpush.msra.mxu2 %v7883_v7 }
 0x46b   : > { %2598 = vmatpush.msrb.mxu0 %v8109_v51  ;;  %2901 = vmatpush.msra.mxu3 %v7860_v50 }
 0x46c   : > { %2601 = vmatmul.f32.vlgmr.msrb.gmra.mxu0 %v2261_v28  ;;  %2818 = vmatpush.msra.mxu1 %v7962_v33  ;;  %v9318_v28 = vld [vmem:[#allocation31_spill] sm:$0xff] }
 0x46d   : > { %2867 = vmatpush.msra.mxu2 %v7887_v22  ;;  %2903 = vmatpush.msra.mxu3 %v7863_v47 }
 0x46e   : > { %2824 = vmatpush.msra.mxu1 %v7981_v54  ;;  %2769 = vmatpush.msra.mxu0 %v7860_v50 }
 0x46f   : > { %2870 = vmatpush.msra.mxu2 %v7891_v2  ;;  %2905 = vmatpush.msra.mxu3 %v7866_v49 }
 0x470   : > { %2830 = vmatpush.msra.mxu1 %v8003_v31  ;;  %2771 = vmatpush.msra.mxu0 %v7863_v47 }
 0x471   : > { %2873 = vmatpush.msra.mxu2 %v7896_v43  ;;  %2907 = vmatpush.msra.mxu3 %v7869_v59 }
 0x472   : > { %2836 = vmatpush.msra.mxu1 %v8023_v36  ;;  %2773 = vmatpush.msra.mxu0 %v7866_v49 }
 0x473   : > { %2876 = vmatpush.msra.mxu2 %v7900_v38  ;;  %2909 = vmatpush.msra.mxu3 %v7872_v61 }
 0x474   : > { %2842 = vmatpush.msra.mxu1 %v8044_v55  ;;  %2775 = vmatpush.msra.mxu0 %v7869_v59 }
 0x475   : > { %2879 = vmatpush.msra.mxu2 %v7918_v35  ;;  %2911 = vmatpush.msra.mxu3 %v7875_v37 }
 0x476   : > { %2848 = vmatpush.msra.mxu1 %v8065_v45  ;;  %2777 = vmatpush.msra.mxu0 %v7872_v61 }
 0x477   : > { %2882 = vmatpush.msra.mxu2 %v9304_v62  ;;  %2913 = vmatpush.msra.mxu3 %v9305_v34  ;;  %v9325_v62 = vld [vmem:[#allocation47_spill] sm:$0xff] }
 0x478   : > { %2977 = vmatpush.msrb.mxu1 %v7860_v50  ;;  %2779 = vmatpush.msra.mxu0 %v7875_v37 }
 0x479   : > { %2885 = vmatpush.msra.mxu2 %v9306_v23  ;;  %2915 = vmatpush.msra.mxu3 %v9307_v44 }
 0x47a   : > { %2979 = vmatpush.msrb.mxu1 %v7863_v47  ;;  %2781 = vmatpush.msra.mxu0 %v9305_v34 }
 0x47b   : > { %3006 = vmatpush.msrb.mxu2 %v7966_v52  ;;  %3043 = vmatpush.msrb.mxu3 %v9308_v57 }
 0x47c   : > { %2981 = vmatpush.msrb.mxu1 %v7866_v49  ;;  %2783 = vmatpush.msra.mxu0 %v9307_v44 }
 0x47d   : > { %3008 = vmatpush.msrb.mxu2 %v7969_v42  ;;  %3049 = vmatpush.msrb.mxu3 %v9309_v21 }
 0x47e   : > { %2983 = vmatpush.msrb.mxu1 %v7869_v59  ;;  %2934 = vmatpush.msrb.mxu0 %v9310_v41 }
 0x47f   : > { %3010 = vmatpush.msrb.mxu2 %v7978_v25  ;;  %3055 = vmatpush.msrb.mxu3 %v9311_v15 }
 0x480   : > { %2985 = vmatpush.msrb.mxu1 %v7872_v61  ;;  %2938 = vmatpush.msrb.mxu0 %v9312_v8 }
 0x481   : > { %3012 = vmatpush.msrb.mxu2 %v8000_v9  ;;  %3061 = vmatpush.msrb.mxu3 %v9313_v40  ;;  %v9324_v40 = vld [vmem:[#allocation7_spill] sm:$0xff] }
 0x482   : > { %2987 = vmatpush.msrb.mxu1 %v7875_v37  ;;  %2942 = vmatpush.msrb.mxu0 %v9314_v0  ;;  %v9322_v0 = vld [vmem:[#allocation35_spill] sm:$0xff] }
 0x483   : > { %3014 = vmatpush.msrb.mxu2 %v8020_v32  ;;  %3067 = vmatpush.msrb.mxu3 %v9315_v27  ;;  %v9323_v27 = vld [vmem:[#allocation36_spill] sm:$0xff] }
 0x484   : > { %2989 = vmatpush.msrb.mxu1 %v9305_v34  ;;  %2946 = vmatpush.msrb.mxu0 %v9316_v60 }
 0x485   : > { %3016 = vmatpush.msrb.mxu2 %v8041_v6  ;;  %3073 = vmatpush.msrb.mxu3 %v9317_v4 }
 0x486   : > { %2991 = vmatpush.msrb.mxu1 %v9307_v44  ;;  %2950 = vmatpush.msrb.mxu0 %v9318_v28 }
 0x487   : > { %3018 = vmatpush.msrb.mxu2 %v8062_v3  ;;  %3079 = vmatpush.msrb.mxu3 %v9319_v19 }
 0x488   : > { %2954 = vmatpush.msrb.mxu0 %v9320_v26 }
 0x489   : > { %3020 = vmatpush.msrb.mxu2 %v8082_v13  ;;  %3085 = vmatpush.msrb.mxu3 %v9321_v46 }
 0x48a   : > { %2958 = vmatpush.msrb.mxu0 %v9322_v0 }
 0x48c   : > { %2962 = vmatpush.msrb.mxu0 %v9323_v27  ;;  %v9326_v27 = vld [vmem:[#allocation8_spill] sm:$0xff] }
 0x4cf   : > { %v2327_v15 = vpop.f32.mrf.mxu1 }
 0x4d7   : > { %v2266_v60 = vpop.f32.mrf.mxu0  ;;  %v2365_v4 = vpop.f32.mrf.mxu2 }
 0x4d8   : > { %v2267_v8 = vadd.f32 %v2266_v60, %v9324_v40  ;;  %v2470_v19 = vpop.f32.mrf.mxu1 }
 0x4d9   : > { %v2396_v28 = vpop.f32.mrf.mxu3 }
 0x4da   : > { %v2328_v41 = vadd.f32 %v2327_v15, %v2267_v8 }
 0x4dc   : > { %v2366_v21 = vadd.f32 %v2365_v4, %v2328_v41 }
 0x4de   : > { %v2397_v57 = vadd.f32 %v2396_v28, %v2366_v21 }
 0x4e0   : > { %v2503_v0 = vpop.f32.mrf.mxu2 }
 0x4e1   : > { %v2441_v44 = vpop.f32.mrf.mxu0  ;;  %v2504_v37 = vadd.f32 %v2503_v0, %v9326_v27 }
 0x4e2   : > { %v2442_v23 = vadd.f32 %v2441_v44, %v2397_v57  ;;  %v2633_v21 = vpop.f32.mrf.mxu1 }
 0x4e3   : > { %v2564_v35 = vpop.f32.mrf.mxu3 }
 0x4e4   : > { %v2471_v34 = vadd.f32 %v2470_v19, %v2442_v23  ;;  %v2565_v15 = vadd.f32 %v2564_v35, %v2504_v37 }
 0x4e6   : > { %v2711_v26 = vrot.slane %v2471_v34, 6 }
 0x4e8   : > { %v2713_v46 = vadd.f32 %v2711_v26, %v9325_v62 }
 0x4e9   : > { %v2602_v60 = vpop.f32.mrf.mxu0 }
 0x4ea   : > { %v6429_v45 = vmul.f32 -1.442695, %v2713_v46  ;;  %v2603_v41 = vadd.f32 %v2602_v60, %v2565_v15  ;;  %v2678_v57 = vpop.f32.mrf.mxu2 }
 0x4ec   : > { %6512 = vpow2.f32 %v6429_v45  ;;  %v2634_v4 = vadd.f32 %v2633_v21, %v2603_v41  ;;  %v2707_v19 = vpop.f32.mrf.mxu3 }
 0x4ee   : > { %v2679_v23 = vadd.f32 %v2678_v57, %v2634_v4 }
 0x4f0   : > { %v2708_v46 = vadd.f32 %v2707_v19, %v2679_v23 }
 0x4f2   : > { %v6513_v40 = vpop.eup %6512 }
 0x4f3   : > { %v2717_v8 = vadd.f32 1.0, %v6513_v40  ;;  %v2734_v40 = vrot.slane %v2708_v46, 6 }
 0x4f5   : > { %6514 = vrcp.f32 %v2717_v8  ;;  %v2729_v26 = vand.u32 2147483648, %v2717_v8  ;;  %v2727_v0 = vand.u32 2147483647, %v2717_v8  ;;  %vm2723_vm14 = vweird.f32 %v2717_v8 }
 0x4f7   : > { %v2730_v37 = vor.u32 1.1754944e-38, %v2729_v26  ;;  %vm2728_vm0 = vcmp.eq.f32.partialorder %v2727_v0, 8.507059e+37 }
 0x4fb   : > { %v6515_v44 = vpop.eup %6514 }
 0x4fc   : > { %v2719_v34 = vmul.f32 %v6515_v44, %v2717_v8  ;;  %vm2724_vm13 = vweird.f32 %v6515_v44 }
 0x4fd   : > { %vm2725_vm15 = vmor %vm2723_vm14, %vm2724_vm13 }
 0x4fe   : > { %v2720_v28 = vsub.f32 1.0, %v2719_v34 }
 0x500   : > { %v2721_v45 = vmul.f32 %v6515_v44, %v2720_v28 }
 0x502   : > { %v2722_v27 = vadd.f32 %v6515_v44, %v2721_v45 }
 0x504   : > { %v2726_v35 = vsel %vm2725_vm15, %v6515_v44, %v2722_v27 }
 0x505   : > { %v2731_v60 = vsel %vm2728_vm0, %v2730_v37, %v2726_v35  ;;  %v9327_v35 = vld [vmem:[#allocation29_spill] sm:$0xff] }
 0x506   : > { %v2736_v15 = vmul.f32 %v2734_v40, %v2731_v60  ;;  %v9328_v40 = vld [vmem:[#allocation23_spill] sm:$0xff] }
 0x508   : > { %v2737_v41 = vadd.f32 %v2736_v15, %v8275_v16  ;;  %v9330_v15 = vld [vmem:[#allocation32_spill] sm:$0xff] }
 0x50a   : > { %6516 = vtanh.f32 %v2737_v41  ;;  %v9331_v41 = vld [vmem:[#allocation24_spill] sm:$0xff] }
 0x510   : > { %v6517_v21 = vpop.eup %6516 }
 0x511   : > { %v2740_v4 = vrot.slane %v6517_v21, 2 }
 0x513   : > { %v2742_v57 = vsub.f32 %v8281_v20, %v2740_v4  ;;  %v9333_v4 = vld [vmem:[#allocation25_spill] sm:$0xff] }
 0x515   : > { %v2744_v23 = vrot.slane %v2742_v57, 6  ;;  %v9334_v57 = vld [vmem:[#allocation38_spill] sm:$0xff] }
 0x517   : > { %2745 = vrot.lane.b32.xlu1 %v2744_v23, %s6582_s1  ;;  %v9335_v23 = vld [vmem:[#allocation40_spill] sm:$0xff] }
 0x589   : > { %v2746_v34 = vpop.permute.xlu1 %2745 }
 0x58a   : > { %v2748_v28 = vmul.f32 %v2746_v34, %v2731_v60  ;;  %v9329_v60 = vld [vmem:[#allocation39_spill] sm:$0xff]  ;;  %v9336_v34 = vld [vmem:[#allocation26_spill] sm:$0xff] }
 0x58c   : > { %2750 = vrot.lane.b32.xlu1 %v2748_v28, %s6582_s1  ;;  %v9337_v28 = vld [vmem:[#allocation41_spill] sm:$0xff] }
 0x5fe   : > { %v2751_v8 = vpop.permute.xlu1 %2750 }
 0x5ff   : > { %v8388_v27 = vadd.f32 %v6517_v21, %v2751_v8  ;;  %v9332_v21 = vld [vmem:[#allocation33_spill] sm:$0xff]  ;;  %v9338_v8 = vld [vmem:[#allocation27_spill] sm:$0xff] }
 0x601   : > { %v9201_v44 = vrot.slane %v8388_v27, 2 }
 0x603   : > { %v2758_v19 = vsel %vm729_vm2, %v9201_v44, 0  ;;  %v9345_v44 = vld [vmem:[#allocation45_spill] sm:$0xff] }
 0x604   : > { %v2784_v26 = vand.u32 4294901760, %v2758_v19 }
 0x606   : > { %v2785_v46 = vsub.f32 %v2758_v19, %v2784_v26  ;;  %2850 = vmatmul.f32.vlgmr.msra.gmra.mxu1 %v2784_v26  ;;  %v9339_v19 = vld [vmem:[#allocation42_spill] sm:$0xff] }
 0x607   : > { %3138 = vmatpush.msra.mxu1 %v7966_v52 }
 0x608   : > { %2888 = vmatmul.f32.vlgmr.msra.gmra.mxu2 %v2785_v46  ;;  %v2786_v45 = vand.u32 4294901760, %v2785_v46 }
 0x609   : > { %3140 = vmatpush.msra.mxu1 %v7969_v42  ;;  %3171 = vmatpush.msra.mxu2 %v8009_v56 }
 0x60a   : > { %2919 = vmatmul.f32.vlgmr.msra.gmra.mxu3 %v2786_v45  ;;  %v2787_v0 = vsub.f32 %v2785_v46, %v2786_v45 }
 0x60b   : > { %3142 = vmatpush.msra.mxu1 %v7978_v25  ;;  %3175 = vmatpush.msra.mxu2 %v8032_v5 }
 0x60c   : > { %3214 = vmatpush.msra.mxu3 %v7966_v52  ;;  %v2788_v37 = vand.u32 4294901760, %v2787_v0  ;;  %v9343_v0 = vld [vmem:[#allocation44_spill] sm:$0xff] }
 0x60d   : > { %3144 = vmatpush.msra.mxu1 %v8000_v9  ;;  %3179 = vmatpush.msra.mxu2 %v8051_v29 }
 0x60e   : > { %3216 = vmatpush.msra.mxu3 %v7969_v42  ;;  %2789 = vmatmul.f32.vlgmr.msra.gmra.mxu0 %v2788_v37 }
 0x60f   : > { %2993 = vmatmul.f32.vlgmr.msrb.gmra.mxu1 %v2784_v26  ;;  %3101 = vmatpush.msra.mxu0 %v7988_v12 }
 0x610   : > { %3146 = vmatpush.msra.mxu1 %v8020_v32  ;;  %3183 = vmatpush.msra.mxu2 %v8075_v1 }
 0x611   : > { %3218 = vmatpush.msra.mxu3 %v7978_v25  ;;  %3026 = vmatmul.f32.vlgmr.msrb.gmra.mxu2 %v2788_v37  ;;  %v9344_v37 = vld [vmem:[#allocation31_spill] sm:$0xff] }
 0x612   : > { %3104 = vmatpush.msra.mxu0 %v7992_v58  ;;  %3148 = vmatpush.msra.mxu1 %v8041_v6 }
 0x613   : > { %3187 = vmatpush.msra.mxu2 %v8091_v11  ;;  %3220 = vmatpush.msra.mxu3 %v8000_v9 }
 0x614   : > { %3087 = vmatmul.f32.vlgmr.msrb.gmra.mxu3 %v2784_v26  ;;  %3107 = vmatpush.msra.mxu0 %v8013_v10 }
 0x615   : > { %3150 = vmatpush.msra.mxu1 %v8062_v3  ;;  %3191 = vmatpush.msra.mxu2 %v8105_v14 }
 0x616   : > { %3222 = vmatpush.msra.mxu3 %v8020_v32  ;;  %3110 = vmatpush.msra.mxu0 %v8038_v17 }
 0x617   : > { %3152 = vmatpush.msra.mxu1 %v8082_v13  ;;  %3195 = vmatpush.msra.mxu2 %v8120_v53 }
 0x618   : > { %3224 = vmatpush.msra.mxu3 %v8041_v6  ;;  %2964 = vmatmul.f32.vlgmr.msrb.gmra.mxu0 %v2784_v26 }
 0x619   : > { %3156 = vmatmul.f32.vlgmr.msra.gmra.mxu1 %v2786_v45  ;;  %3113 = vmatpush.msra.mxu0 %v8059_v39  ;;  %v9342_v45 = vld [vmem:[#allocation30_spill] sm:$0xff] }
 0x61a   : > { %3199 = vmatpush.msra.mxu2 %v8131_v24  ;;  %3226 = vmatpush.msra.mxu3 %v8062_v3 }
 0x61b   : > { %3201 = vmatmul.f32.vlgmr.msra.gmra.mxu2 %v2784_v26  ;;  %3116 = vmatpush.msra.mxu0 %v8079_v48 }
 0x61c   : > { %3228 = vmatpush.msra.mxu3 %v8082_v13  ;;  %3330 = vmatpush.msrb.mxu1 %v7944_v18 }
 0x61d   : > { %3230 = vmatmul.f32.vlgmr.msra.gmra.mxu3 %v2784_v26  ;;  %3119 = vmatpush.msra.mxu0 %v8095_v30  ;;  %v9340_v26 = vld [vmem:[#allocation28_spill] sm:$0xff] }
 0x61e   : > { %3336 = vmatpush.msrb.mxu1 %v7946_v63  ;;  %3388 = vmatpush.msrb.mxu2 %v7883_v7 }
 0x61f   : > { %3122 = vmatpush.msra.mxu0 %v8109_v51  ;;  %3425 = vmatpush.msrb.mxu3 %v7860_v50 }
 0x620   : > { %3125 = vmatmul.f32.vlgmr.msra.gmra.mxu0 %v2785_v46  ;;  %3342 = vmatpush.msrb.mxu1 %v7962_v33  ;;  %v9341_v46 = vld [vmem:[#allocation43_spill] sm:$0xff] }
 0x621   : > { %3391 = vmatpush.msrb.mxu2 %v7887_v22  ;;  %3427 = vmatpush.msrb.mxu3 %v7863_v47 }
 0x622   : > { %3348 = vmatpush.msrb.mxu1 %v7981_v54  ;;  %3293 = vmatpush.msrb.mxu0 %v7860_v50 }
 0x623   : > { %3394 = vmatpush.msrb.mxu2 %v7891_v2  ;;  %3429 = vmatpush.msrb.mxu3 %v7866_v49 }
 0x624   : > { %3354 = vmatpush.msrb.mxu1 %v8003_v31  ;;  %3295 = vmatpush.msrb.mxu0 %v7863_v47 }
 0x625   : > { %3397 = vmatpush.msrb.mxu2 %v7896_v43  ;;  %3431 = vmatpush.msrb.mxu3 %v7869_v59 }
 0x626   : > { %3360 = vmatpush.msrb.mxu1 %v8023_v36  ;;  %3297 = vmatpush.msrb.mxu0 %v7866_v49 }
 0x627   : > { %3400 = vmatpush.msrb.mxu2 %v7900_v38  ;;  %3433 = vmatpush.msrb.mxu3 %v7872_v61 }
 0x628   : > { %3366 = vmatpush.msrb.mxu1 %v8044_v55  ;;  %3299 = vmatpush.msrb.mxu0 %v7869_v59 }
 0x629   : > { %3403 = vmatpush.msrb.mxu2 %v9327_v35  ;;  %3435 = vmatpush.msrb.mxu3 %v9328_v40 }
 0x62a   : > { %3372 = vmatpush.msrb.mxu1 %v9329_v60  ;;  %3301 = vmatpush.msrb.mxu0 %v7872_v61 }
 0x62b   : > { %3406 = vmatpush.msrb.mxu2 %v9330_v15  ;;  %3437 = vmatpush.msrb.mxu3 %v9331_v41 }
 0x62c   : > { %3501 = vmatpush.msra.mxu1 %v7860_v50  ;;  %3303 = vmatpush.msrb.mxu0 %v9328_v40 }
 0x62d   : > { %3409 = vmatpush.msrb.mxu2 %v9332_v21  ;;  %3439 = vmatpush.msrb.mxu3 %v9333_v4 }
 0x62e   : > { %3503 = vmatpush.msra.mxu1 %v7863_v47  ;;  %3305 = vmatpush.msrb.mxu0 %v9331_v41 }
 0x62f   : > { %3530 = vmatpush.msra.mxu2 %v7966_v52  ;;  %3567 = vmatpush.msra.mxu3 %v9334_v57 }
 0x630   : > { %3505 = vmatpush.msra.mxu1 %v7866_v49  ;;  %3307 = vmatpush.msrb.mxu0 %v9333_v4 }
 0x631   : > { %3532 = vmatpush.msra.mxu2 %v7969_v42  ;;  %3573 = vmatpush.msra.mxu3 %v9335_v23 }
 0x632   : > { %3507 = vmatpush.msra.mxu1 %v7869_v59  ;;  %3458 = vmatpush.msra.mxu0 %v9336_v34 }
 0x633   : > { %3534 = vmatpush.msra.mxu2 %v7978_v25  ;;  %3579 = vmatpush.msra.mxu3 %v9337_v28  ;;  %v9350_v28 = vld [vmem:[#allocation7_spill] sm:$0xff] }
 0x634   : > { %3509 = vmatpush.msra.mxu1 %v7872_v61  ;;  %3462 = vmatpush.msra.mxu0 %v9338_v8  ;;  %v9348_v8 = vld [vmem:[#allocation35_spill] sm:$0xff] }
 0x635   : > { %3536 = vmatpush.msra.mxu2 %v8000_v9  ;;  %3585 = vmatpush.msra.mxu3 %v9339_v19  ;;  %v9347_v19 = vld [vmem:[#allocation46_spill] sm:$0xff] }
 0x636   : > { %3511 = vmatpush.msra.mxu1 %v9328_v40  ;;  %3466 = vmatpush.msra.mxu0 %v9340_v26  ;;  %v9346_v26 = vld [vmem:[#allocation34_spill] sm:$0xff] }
 0x637   : > { %3538 = vmatpush.msra.mxu2 %v8020_v32  ;;  %3591 = vmatpush.msra.mxu3 %v9341_v46  ;;  %v9349_v46 = vld [vmem:[#allocation36_spill] sm:$0xff] }
 0x638   : > { %3513 = vmatpush.msra.mxu1 %v9331_v41  ;;  %3470 = vmatpush.msra.mxu0 %v9342_v45 }
 0x639   : > { %3540 = vmatpush.msra.mxu2 %v8041_v6  ;;  %3597 = vmatpush.msra.mxu3 %v9343_v0 }
 0x63a   : > { %3515 = vmatpush.msra.mxu1 %v9333_v4  ;;  %3474 = vmatpush.msra.mxu0 %v9344_v37 }
 0x63b   : > { %3542 = vmatpush.msra.mxu2 %v8062_v3  ;;  %3603 = vmatpush.msra.mxu3 %v9345_v44 }
 0x63c   : > { %3478 = vmatpush.msra.mxu0 %v9346_v26 }
 0x63d   : > { %3544 = vmatpush.msra.mxu2 %v8082_v13  ;;  %3609 = vmatpush.msra.mxu3 %v9347_v19 }
 0x63e   : > { %3482 = vmatpush.msra.mxu0 %v9348_v8 }
 0x640   : > { %3486 = vmatpush.msra.mxu0 %v9349_v46  ;;  %v9351_v46 = vld [vmem:[#allocation8_spill] sm:$0xff] }
 0x683   : > { %v2851_v23 = vpop.f32.mrf.mxu1 }
 0x68b   : > { %v2790_v45 = vpop.f32.mrf.mxu0  ;;  %v2889_v0 = vpop.f32.mrf.mxu2 }
 0x68c   : > { %v2791_v34 = vadd.f32 %v2790_v45, %v9350_v28  ;;  %v2994_v44 = vpop.f32.mrf.mxu1 }
 0x68d   : > { %v2920_v37 = vpop.f32.mrf.mxu3 }
 0x68e   : > { %v2852_v57 = vadd.f32 %v2851_v23, %v2791_v34 }
 0x690   : > { %v2890_v4 = vadd.f32 %v2889_v0, %v2852_v57 }
 0x692   : > { %v2921_v21 = vadd.f32 %v2920_v37, %v2890_v4 }
 0x694   : > { %v3027_v8 = vpop.f32.mrf.mxu2 }
 0x695   : > { %v2965_v41 = vpop.f32.mrf.mxu0  ;;  %v3028_v35 = vadd.f32 %v3027_v8, %v9351_v46 }
 0x696   : > { %v2966_v15 = vadd.f32 %v2965_v41, %v2921_v21  ;;  %v3157_v4 = vpop.f32.mrf.mxu1 }
 0x697   : > { %v3088_v55 = vpop.f32.mrf.mxu3 }
 0x698   : > { %v2995_v60 = vadd.f32 %v2994_v44, %v2966_v15  ;;  %v3089_v23 = vadd.f32 %v3088_v55, %v3028_v35 }
 0x69a   : > { %v3235_v26 = vrot.slane %v2995_v60, 4 }
 0x69c   : > { %v3237_v19 = vadd.f32 %v3235_v26, %v9325_v62 }
 0x69d   : > { %v3126_v45 = vpop.f32.mrf.mxu0 }
 0x69e   : > { %v6430_v40 = vmul.f32 -1.442695, %v3237_v19  ;;  %v3127_v57 = vadd.f32 %v3126_v45, %v3089_v23  ;;  %v3202_v21 = vpop.f32.mrf.mxu2 }
 0x6a0   : > { %6518 = vpow2.f32 %v6430_v40  ;;  %v3158_v0 = vadd.f32 %v3157_v4, %v3127_v57  ;;  %v3231_v62 = vpop.f32.mrf.mxu3 }
 0x6a2   : > { %v3203_v44 = vadd.f32 %v3202_v21, %v3158_v0 }
 0x6a4   : > { %v3232_v26 = vadd.f32 %v3231_v62, %v3203_v44  ;;  %v9352_v62 = vrot.slane %v8388_v27, 2 }
 0x6a6   : > { %v6519_v28 = vpop.eup %6518 }
 0x6a7   : > { %v3241_v34 = vadd.f32 1.0, %v6519_v28  ;;  %v3258_v28 = vrot.slane %v3232_v26, 4 }
 0x6a9   : > { %6520 = vrcp.f32 %v3241_v34  ;;  %v3253_v19 = vand.u32 2147483648, %v3241_v34  ;;  %v3251_v8 = vand.u32 2147483647, %v3241_v34  ;;  %vm3247_vm3 = vweird.f32 %v3241_v34 }
 0x6ab   : > { %v3254_v55 = vor.u32 1.1754944e-38, %v3253_v19  ;;  %vm3252_vm5 = vcmp.eq.f32.partialorder %v3251_v8, 8.507059e+37  ;;  %v2757_v19 = vmax.f32 %v8281_v20, %v9352_v62  ;;  %v9365_v62 = vld [vmem:[#allocation27_spill] sm:$0xff] }
 0x6af   : > { %v6521_v41 = vpop.eup %6520 }
 0x6b0   : > { %v3243_v60 = vmul.f32 %v6521_v41, %v3241_v34  ;;  %vm3248_vm1 = vweird.f32 %v6521_v41 }
 0x6b1   : > { %vm3249_vm4 = vmor %vm3247_vm3, %vm3248_vm1 }
 0x6b2   : > { %v3244_v15 = vsub.f32 1.0, %v3243_v60 }
 0x6b4   : > { %v3245_v40 = vmul.f32 %v6521_v41, %v3244_v15 }
 0x6b6   : > { %v3246_v37 = vadd.f32 %v6521_v41, %v3245_v40 }
 0x6b8   : > { %v3250_v35 = vsel %vm3249_vm4, %v6521_v41, %v3246_v37 }
 0x6b9   : > { %v3255_v45 = vsel %vm3252_vm5, %v3254_v55, %v3250_v35  ;;  %v9353_v35 = vld [vmem:[#allocation37_spill] sm:$0xff] }
 0x6ba   : > { %v3260_v23 = vmul.f32 %v3258_v28, %v3255_v45  ;;  %v9354_v28 = vld [vmem:[#allocation29_spill] sm:$0xff] }
 0x6bc   : > { %v3261_v57 = vadd.f32 %v3260_v23, %v8275_v16  ;;  %v9356_v23 = vld [vmem:[#allocation39_spill] sm:$0xff] }
 0x6be   : > { %6522 = vtanh.f32 %v3261_v57  ;;  %v9357_v57 = vld [vmem:[#allocation32_spill] sm:$0xff] }
 0x6c4   : > { %v6523_v4 = vpop.eup %6522 }
 0x6c5   : > { %v3264_v0 = vrot.slane %v6523_v4, 2 }
 0x6c7   : > { %v3266_v21 = vsub.f32 %v8388_v27, %v3264_v0  ;;  %v9359_v0 = vld [vmem:[#allocation33_spill] sm:$0xff] }
 0x6c9   : > { %v3268_v44 = vrot.slane %v3266_v21, 6  ;;  %v9360_v21 = vld [vmem:[#allocation25_spill] sm:$0xff] }
 0x6cb   : > { %3269 = vrot.lane.b32.xlu2 %v3268_v44, %s6582_s1  ;;  %v9361_v44 = vld [vmem:[#allocation38_spill] sm:$0xff] }
 0x725   : > { %v3270_v60 = vpop.permute.xlu2 %3269 }
 0x726   : > { %v3272_v15 = vmul.f32 %v3270_v60, %v3255_v45  ;;  %v9355_v45 = vld [vmem:[#allocation23_spill] sm:$0xff]  ;;  %v9362_v60 = vld [vmem:[#allocation40_spill] sm:$0xff] }
 0x728   : > { %3274 = vrot.lane.b32.xlu2 %v3272_v15, %s6582_s1  ;;  %v9363_v15 = vld [vmem:[#allocation26_spill] sm:$0xff] }
 0x782   : > { %v3275_v34 = vpop.permute.xlu2 %3274 }
 0x783   : > { %v8497_v41 = vadd.f32 %v6523_v4, %v3275_v34  ;;  %v9358_v4 = vld [vmem:[#allocation24_spill] sm:$0xff]  ;;  %v9364_v34 = vld [vmem:[#allocation41_spill] sm:$0xff] }
 0x785   : > { %v3279_v16 = vrot.slane %v8497_v41, 4 }
 0x787   : > { %v8503_v26 = vmax.f32 %v2757_v19, %v3279_v16  ;;  %v3282_v40 = vsel %vm729_vm2, %v3279_v16, 0  ;;  %v9366_v19 = vld [vmem:[#allocation42_spill] sm:$0xff]  ;;  %v9367_v16 = vld [vmem:[#allocation28_spill] sm:$0xff] }
 0x788   : > { %v3308_v8 = vand.u32 4294901760, %v3282_v40 }
 0x78a   : > { %v3309_v37 = vsub.f32 %v3282_v40, %v3308_v8  ;;  %3374 = vmatmul.f32.vlgmr.msrb.gmra.mxu1 %v3308_v8  ;;  %v9368_v40 = vld [vmem:[#allocation43_spill] sm:$0xff] }
 0x78b   : > { %3662 = vmatpush.msrb.mxu1 %v7966_v52 }
 0x78c   : > { %3412 = vmatmul.f32.vlgmr.msrb.gmra.mxu2 %v3309_v37  ;;  %v3310_v55 = vand.u32 4294901760, %v3309_v37 }
 0x78d   : > { %3664 = vmatpush.msrb.mxu1 %v7969_v42  ;;  %3695 = vmatpush.msrb.mxu2 %v8009_v56 }
 0x78e   : > { %3443 = vmatmul.f32.vlgmr.msrb.gmra.mxu3 %v3310_v55  ;;  %v3311_v27 = vsub.f32 %v3309_v37, %v3310_v55 }
 0x78f   : > { %3666 = vmatpush.msrb.mxu1 %v7978_v25  ;;  %3699 = vmatpush.msrb.mxu2 %v8032_v5 }
 0x790   : > { %3738 = vmatpush.msrb.mxu3 %v7966_v52  ;;  %v3312_v20 = vand.u32 4294901760, %v3311_v27  ;;  %v9372_v27 = vld [vmem:[#allocation45_spill] sm:$0xff] }
 0x791   : > { %3668 = vmatpush.msrb.mxu1 %v8000_v9  ;;  %3703 = vmatpush.msrb.mxu2 %v8051_v29 }
 0x792   : > { %3740 = vmatpush.msrb.mxu3 %v7969_v42  ;;  %3313 = vmatmul.f32.vlgmr.msrb.gmra.mxu0 %v3312_v20 }
 0x793   : > { %3517 = vmatmul.f32.vlgmr.msra.gmra.mxu1 %v3308_v8  ;;  %3625 = vmatpush.msrb.mxu0 %v7988_v12 }
 0x794   : > { %3670 = vmatpush.msrb.mxu1 %v8020_v32  ;;  %3707 = vmatpush.msrb.mxu2 %v8075_v1 }
 0x795   : > { %3742 = vmatpush.msrb.mxu3 %v7978_v25  ;;  %3550 = vmatmul.f32.vlgmr.msra.gmra.mxu2 %v3312_v20  ;;  %v9373_v20 = vld [vmem:[#allocation34_spill] sm:$0xff] }
 0x796   : > { %3628 = vmatpush.msrb.mxu0 %v7992_v58  ;;  %3672 = vmatpush.msrb.mxu1 %v8041_v6 }
 0x797   : > { %3711 = vmatpush.msrb.mxu2 %v8091_v11  ;;  %3744 = vmatpush.msrb.mxu3 %v8000_v9 }
 0x798   : > { %3611 = vmatmul.f32.vlgmr.msra.gmra.mxu3 %v3308_v8  ;;  %3631 = vmatpush.msrb.mxu0 %v8013_v10 }
 0x799   : > { %3674 = vmatpush.msrb.mxu1 %v8062_v3  ;;  %3715 = vmatpush.msrb.mxu2 %v8105_v14 }
 0x79a   : > { %3746 = vmatpush.msrb.mxu3 %v8020_v32  ;;  %3634 = vmatpush.msrb.mxu0 %v8038_v17 }
 0x79b   : > { %3676 = vmatpush.msrb.mxu1 %v8082_v13  ;;  %3719 = vmatpush.msrb.mxu2 %v8120_v53 }
 0x79c   : > { %3748 = vmatpush.msrb.mxu3 %v8041_v6  ;;  %3488 = vmatmul.f32.vlgmr.msra.gmra.mxu0 %v3308_v8 }
 0x79d   : > { %3680 = vmatmul.f32.vlgmr.msrb.gmra.mxu1 %v3310_v55  ;;  %3637 = vmatpush.msrb.mxu0 %v8059_v39  ;;  %v9371_v55 = vld [vmem:[#allocation31_spill] sm:$0xff] }
 0x79e   : > { %3723 = vmatpush.msrb.mxu2 %v8131_v24  ;;  %3750 = vmatpush.msrb.mxu3 %v8062_v3 }
 0x79f   : > { %3725 = vmatmul.f32.vlgmr.msrb.gmra.mxu2 %v3308_v8  ;;  %3640 = vmatpush.msrb.mxu0 %v8079_v48 }
 0x7a0   : > { %3752 = vmatpush.msrb.mxu3 %v8082_v13  ;;  %3854 = vmatpush.msra.mxu1 %v7944_v18 }
 0x7a1   : > { %3754 = vmatmul.f32.vlgmr.msrb.gmra.mxu3 %v3308_v8  ;;  %3643 = vmatpush.msrb.mxu0 %v8095_v30  ;;  %v9369_v8 = vld [vmem:[#allocation30_spill] sm:$0xff] }
 0x7a2   : > { %3860 = vmatpush.msra.mxu1 %v7946_v63  ;;  %3912 = vmatpush.msra.mxu2 %v7883_v7 }
 0x7a3   : > { %3646 = vmatpush.msrb.mxu0 %v8109_v51  ;;  %3949 = vmatpush.msra.mxu3 %v7860_v50 }
 0x7a4   : > { %3649 = vmatmul.f32.vlgmr.msrb.gmra.mxu0 %v3309_v37  ;;  %3866 = vmatpush.msra.mxu1 %v7962_v33  ;;  %v9370_v37 = vld [vmem:[#allocation44_spill] sm:$0xff] }
 0x7a5   : > { %3915 = vmatpush.msra.mxu2 %v7887_v22  ;;  %3951 = vmatpush.msra.mxu3 %v7863_v47 }
 0x7a6   : > { %3872 = vmatpush.msra.mxu1 %v7981_v54  ;;  %3817 = vmatpush.msra.mxu0 %v7860_v50 }
 0x7a7   : > { %3918 = vmatpush.msra.mxu2 %v7891_v2  ;;  %3953 = vmatpush.msra.mxu3 %v7866_v49 }
 0x7a8   : > { %3878 = vmatpush.msra.mxu1 %v8003_v31  ;;  %3819 = vmatpush.msra.mxu0 %v7863_v47 }
 0x7a9   : > { %3921 = vmatpush.msra.mxu2 %v7896_v43  ;;  %3955 = vmatpush.msra.mxu3 %v7869_v59 }
 0x7aa   : > { %3884 = vmatpush.msra.mxu1 %v8023_v36  ;;  %3821 = vmatpush.msra.mxu0 %v7866_v49 }
 0x7ab   : > { %3924 = vmatpush.msra.mxu2 %v7900_v38  ;;  %3957 = vmatpush.msra.mxu3 %v7872_v61 }
 0x7ac   : > { %3890 = vmatpush.msra.mxu1 %v9353_v35  ;;  %3823 = vmatpush.msra.mxu0 %v7869_v59 }
 0x7ad   : > { %3927 = vmatpush.msra.mxu2 %v9354_v28  ;;  %3959 = vmatpush.msra.mxu3 %v9355_v45 }
 0x7ae   : > { %3896 = vmatpush.msra.mxu1 %v9356_v23  ;;  %3825 = vmatpush.msra.mxu0 %v7872_v61 }
 0x7af   : > { %3930 = vmatpush.msra.mxu2 %v9357_v57  ;;  %3961 = vmatpush.msra.mxu3 %v9358_v4 }
 0x7b0   : > { %4025 = vmatpush.msrb.mxu1 %v7860_v50  ;;  %3827 = vmatpush.msra.mxu0 %v9355_v45 }
 0x7b1   : > { %3933 = vmatpush.msra.mxu2 %v9359_v0  ;;  %3963 = vmatpush.msra.mxu3 %v9360_v21 }
 0x7b2   : > { %4027 = vmatpush.msrb.mxu1 %v7863_v47  ;;  %3829 = vmatpush.msra.mxu0 %v9358_v4 }
 0x7b3   : > { %4054 = vmatpush.msrb.mxu2 %v7966_v52  ;;  %4091 = vmatpush.msrb.mxu3 %v9361_v44 }
 0x7b4   : > { %4029 = vmatpush.msrb.mxu1 %v7866_v49  ;;  %3831 = vmatpush.msra.mxu0 %v9360_v21 }
 0x7b5   : > { %4056 = vmatpush.msrb.mxu2 %v7969_v42  ;;  %4097 = vmatpush.msrb.mxu3 %v9362_v60 }
 0x7b6   : > { %4031 = vmatpush.msrb.mxu1 %v7869_v59  ;;  %3982 = vmatpush.msrb.mxu0 %v9363_v15 }
 0x7b7   : > { %4058 = vmatpush.msrb.mxu2 %v7978_v25  ;;  %4103 = vmatpush.msrb.mxu3 %v9364_v34 }
 0x7b8   : > { %4033 = vmatpush.msrb.mxu1 %v7872_v61  ;;  %3986 = vmatpush.msrb.mxu0 %v9365_v62  ;;  %v9377_v62 = vld [vmem:[#allocation7_spill] sm:$0xff] }
 0x7b9   : > { %4060 = vmatpush.msrb.mxu2 %v8000_v9  ;;  %4109 = vmatpush.msrb.mxu3 %v9366_v19  ;;  %v9375_v19 = vld [vmem:[#allocation35_spill] sm:$0xff] }
 0x7ba   : > { %4035 = vmatpush.msrb.mxu1 %v9355_v45  ;;  %3990 = vmatpush.msrb.mxu0 %v9367_v16  ;;  %v9374_v16 = vld [vmem:[#allocation46_spill] sm:$0xff] }
 0x7bb   : > { %4062 = vmatpush.msrb.mxu2 %v8020_v32  ;;  %4115 = vmatpush.msrb.mxu3 %v9368_v40 }
 0x7bc   : > { %4037 = vmatpush.msrb.mxu1 %v9358_v4  ;;  %3994 = vmatpush.msrb.mxu0 %v9369_v8  ;;  %v9376_v8 = vld [vmem:[#allocation36_spill] sm:$0xff] }
 0x7bd   : > { %4064 = vmatpush.msrb.mxu2 %v8041_v6  ;;  %4121 = vmatpush.msrb.mxu3 %v9370_v37 }
 0x7be   : > { %4039 = vmatpush.msrb.mxu1 %v9360_v21  ;;  %3998 = vmatpush.msrb.mxu0 %v9371_v55 }
 0x7bf   : > { %4066 = vmatpush.msrb.mxu2 %v8062_v3  ;;  %4127 = vmatpush.msrb.mxu3 %v9372_v27 }
 0x7c0   : > { %4002 = vmatpush.msrb.mxu0 %v9373_v20 }
 0x7c1   : > { %4068 = vmatpush.msrb.mxu2 %v8082_v13  ;;  %4133 = vmatpush.msrb.mxu3 %v9374_v16  ;;  %v6554_v16 = vld [vmem:[%s8267_s19] sm:$0xff] }
 0x7c2   : > { %4006 = vmatpush.msrb.mxu0 %v9375_v19 }
 0x7c4   : > { %4010 = vmatpush.msrb.mxu0 %v9376_v8 }
 0x807   : > { %v3375_v15 = vpop.f32.mrf.mxu1 }
 0x80f   : > { %v3314_v40 = vpop.f32.mrf.mxu0  ;;  %v3413_v60 = vpop.f32.mrf.mxu2 }
 0x810   : > { %v3315_v34 = vadd.f32 %v3314_v40, %v9377_v62  ;;  %v3518_v4 = vpop.f32.mrf.mxu1 }
 0x811   : > { %v3444_v44 = vpop.f32.mrf.mxu3 }
 0x812   : > { %v3376_v37 = vadd.f32 %v3375_v15, %v3315_v34 }
 0x814   : > { %v3414_v55 = vadd.f32 %v3413_v60, %v3376_v37 }
 0x816   : > { %v3445_v21 = vadd.f32 %v3444_v44, %v3414_v55 }
 0x818   : > { %v3551_v19 = vpop.f32.mrf.mxu2 }
 0x819   : > { %v3489_v0 = vpop.f32.mrf.mxu0  ;;  %v3552_v8 = vadd.f32 %v3551_v19, %v9351_v46 }
 0x81a   : > { %v3490_v27 = vadd.f32 %v3489_v0, %v3445_v21  ;;  %v3681_v44 = vpop.f32.mrf.mxu1 }
 0x81b   : > { %v3612_v28 = vpop.f32.mrf.mxu3 }
 0x81c   : > { %v3519_v20 = vadd.f32 %v3518_v4, %v3490_v27  ;;  %v3613_v15 = vadd.f32 %v3612_v28, %v3552_v8 }
 0x81e   : > { %v3759_v57 = vrot.slane %v3519_v20, 2 }
 0x820   : > { %v3761_v23 = vadd.f32 %v6554_v16, %v3759_v57 }
 0x821   : > { %v3650_v40 = vpop.f32.mrf.mxu0 }
 0x822   : > { %v6431_v45 = vmul.f32 -1.442695, %v3761_v23  ;;  %v3651_v60 = vadd.f32 %v3650_v40, %v3613_v15  ;;  %v3726_v21 = vpop.f32.mrf.mxu2 }
 0x824   : > { %6524 = vpow2.f32 %v6431_v45  ;;  %v3682_v37 = vadd.f32 %v3681_v44, %v3651_v60  ;;  %v3755_v23 = vpop.f32.mrf.mxu3  ;;  %v6555_v60 = vld [vmem:[%s8267_s19 + $0x8] sm:$0xff] }
 0x826   : > { %v3727_v4 = vadd.f32 %v3726_v21, %v3682_v37 }
 0x828   : > { %v3756_v45 = vadd.f32 %v3755_v23, %v3727_v4 }
 0x82a   : > { %v6525_v62 = vpop.eup %6524  ;;  %v3782_v8 = vrot.slane %v3756_v45, 2 }
 0x82b   : > { %v3765_v34 = vadd.f32 1.0, %v6525_v62 }
 0x82d   : > { %6526 = vrcp.f32 %v3765_v34  ;;  %v3777_v57 = vand.u32 2147483648, %v3765_v34  ;;  %v3775_v19 = vand.u32 2147483647, %v3765_v34  ;;  %vm3771_vm9 = vweird.f32 %v3765_v34 }
 0x82f   : > { %v3778_v28 = vor.u32 1.1754944e-38, %v3777_v57  ;;  %vm3776_vm7 = vcmp.eq.f32.partialorder %v3775_v19, 8.507059e+37 }
 0x833   : > { %v6527_v0 = vpop.eup %6526 }
 0x834   : > { %v3767_v55 = vmul.f32 %v6527_v0, %v3765_v34  ;;  %vm3772_vm6 = vweird.f32 %v6527_v0 }
 0x835   : > { %vm3773_vm10 = vmor %vm3771_vm9, %vm3772_vm6 }
 0x836   : > { %v3768_v27 = vsub.f32 1.0, %v3767_v55 }
 0x838   : > { %v3769_v16 = vmul.f32 %v6527_v0, %v3768_v27 }
 0x83a   : > { %v3770_v20 = vadd.f32 %v6527_v0, %v3769_v16 }
 0x83c   : > { %v3774_v62 = vsel %vm3773_vm10, %v6527_v0, %v3770_v20 }
 0x83d   : > { %v3779_v40 = vsel %vm3776_vm7, %v3778_v28, %v3774_v62  ;;  %v9379_v62 = vld [vmem:[#allocation29_spill] sm:$0xff] }
 0x83e   : > { %v3784_v15 = vmul.f32 %v3782_v8, %v3779_v40  ;;  %v9380_v8 = vld [vmem:[#allocation23_spill] sm:$0xff] }
 0x840   : > { %v3785_v44 = vadd.f32 %v6555_v60, %v3784_v15  ;;  %v9382_v15 = vld [vmem:[#allocation32_spill] sm:$0xff] }
 0x841   : > { %v9383_v60 = vld [vmem:[#allocation24_spill] sm:$0xff] }
 0x842   : > { %6528 = vtanh.f32 %v3785_v44  ;;  %v9384_v44 = vld [vmem:[#allocation33_spill] sm:$0xff] }
 0x848   : > { %v6529_v37 = vpop.eup %6528 }
 0x849   : > { %v3788_v21 = vrot.slane %v6529_v37, 2 }
 0x84b   : > { %v3790_v55 = vsub.f32 %v8497_v41, %v3788_v21  ;;  %v9386_v21 = vld [vmem:[#allocation38_spill] sm:$0xff] }
 0x84d   : > { %v3792_v4 = vrot.slane %v3790_v55, 6  ;;  %v9387_v55 = vld [vmem:[#allocation40_spill] sm:$0xff] }
 0x84f   : > { %3793 = vrot.lane.b32.xlu0 %v3792_v4, %s6582_s1  ;;  %v9388_v4 = vld [vmem:[#allocation26_spill] sm:$0xff] }
 0x8c1   : > { %v3794_v27 = vpop.permute.xlu0 %3793 }
 0x8c2   : > { %v3796_v23 = vmul.f32 %v3794_v27, %v3779_v40  ;;  %v9381_v40 = vld [vmem:[#allocation39_spill] sm:$0xff]  ;;  %v9389_v27 = vld [vmem:[#allocation41_spill] sm:$0xff] }
 0x8c4   : > { %3798 = vrot.lane.b32.xlu1 %v3796_v23, %s6582_s1  ;;  %v9390_v23 = vld [vmem:[#allocation27_spill] sm:$0xff] }
 0x936   : > { %v3799_v34 = vpop.permute.xlu1 %3798 }
 0x937   : > { %v8609_v0 = vadd.f32 %v6529_v37, %v3799_v34  ;;  %v9385_v37 = vld [vmem:[#allocation25_spill] sm:$0xff]  ;;  %v9391_v34 = vld [vmem:[#allocation42_spill] sm:$0xff] }
 0x939   : > { %v3803_v57 = vrot.slane %v8609_v0, 6 }
 0x93b   : > { %v8613_v45 = vmax.f32 %v8503_v26, %v3803_v57  ;;  %v3806_v16 = vsel %vm729_vm2, %v3803_v57, 0  ;;  %v9392_v57 = vld [vmem:[#allocation28_spill] sm:$0xff] }
 0x93c   : > { %v3832_v19 = vand.u32 4294901760, %v3806_v16 }
 0x93d   : > { %9378 = vst [vmem:[#allocation22_spill] sm:$0xff] %v8613_v45  ;;  %v9399_v45 = vld [vmem:[#allocation46_spill] sm:$0xff] }
 0x93e   : > { %v3833_v20 = vsub.f32 %v3806_v16, %v3832_v19  ;;  %3898 = vmatmul.f32.vlgmr.msra.gmra.mxu1 %v3832_v19  ;;  %v9393_v16 = vld [vmem:[#allocation43_spill] sm:$0xff] }
 0x93f   : > { %4186 = vmatpush.msra.mxu1 %v7966_v52 }
 0x940   : > { %3936 = vmatmul.f32.vlgmr.msra.gmra.mxu2 %v3833_v20  ;;  %v3834_v41 = vand.u32 4294901760, %v3833_v20 }
 0x941   : > { %4188 = vmatpush.msra.mxu1 %v7969_v42  ;;  %4219 = vmatpush.msra.mxu2 %v8009_v56 }
 0x942   : > { %3967 = vmatmul.f32.vlgmr.msra.gmra.mxu3 %v3834_v41  ;;  %v3835_v28 = vsub.f32 %v3833_v20, %v3834_v41 }
 0x943   : > { %4190 = vmatpush.msra.mxu1 %v7978_v25  ;;  %4223 = vmatpush.msra.mxu2 %v8032_v5 }
 0x944   : > { %4262 = vmatpush.msra.mxu3 %v7966_v52  ;;  %v3836_v26 = vand.u32 4294901760, %v3835_v28  ;;  %v9397_v28 = vld [vmem:[#allocation45_spill] sm:$0xff] }
 0x945   : > { %4192 = vmatpush.msra.mxu1 %v8000_v9  ;;  %4227 = vmatpush.msra.mxu2 %v8051_v29 }
 0x946   : > { %4264 = vmatpush.msra.mxu3 %v7969_v42  ;;  %3837 = vmatmul.f32.vlgmr.msra.gmra.mxu0 %v3836_v26 }
 0x947   : > { %4041 = vmatmul.f32.vlgmr.msrb.gmra.mxu1 %v3832_v19  ;;  %4149 = vmatpush.msra.mxu0 %v7988_v12 }
 0x948   : > { %4194 = vmatpush.msra.mxu1 %v8020_v32  ;;  %4231 = vmatpush.msra.mxu2 %v8075_v1 }
 0x949   : > { %4266 = vmatpush.msra.mxu3 %v7978_v25  ;;  %4074 = vmatmul.f32.vlgmr.msrb.gmra.mxu2 %v3836_v26  ;;  %v9398_v26 = vld [vmem:[#allocation34_spill] sm:$0xff] }
 0x94a   : > { %4152 = vmatpush.msra.mxu0 %v7992_v58  ;;  %4196 = vmatpush.msra.mxu1 %v8041_v6 }
 0x94b   : > { %4235 = vmatpush.msra.mxu2 %v8091_v11  ;;  %4268 = vmatpush.msra.mxu3 %v8000_v9 }
 0x94c   : > { %4135 = vmatmul.f32.vlgmr.msrb.gmra.mxu3 %v3832_v19  ;;  %4155 = vmatpush.msra.mxu0 %v8013_v10 }
 0x94d   : > { %4198 = vmatpush.msra.mxu1 %v8062_v3  ;;  %4239 = vmatpush.msra.mxu2 %v8105_v14 }
 0x94e   : > { %4270 = vmatpush.msra.mxu3 %v8020_v32  ;;  %4158 = vmatpush.msra.mxu0 %v8038_v17 }
 0x94f   : > { %4200 = vmatpush.msra.mxu1 %v8082_v13  ;;  %4243 = vmatpush.msra.mxu2 %v8120_v53 }
 0x950   : > { %4272 = vmatpush.msra.mxu3 %v8041_v6  ;;  %4012 = vmatmul.f32.vlgmr.msrb.gmra.mxu0 %v3832_v19 }
 0x951   : > { %4204 = vmatmul.f32.vlgmr.msra.gmra.mxu1 %v3834_v41  ;;  %4161 = vmatpush.msra.mxu0 %v8059_v39  ;;  %v9396_v41 = vld [vmem:[#allocation31_spill] sm:$0xff] }
 0x952   : > { %4247 = vmatpush.msra.mxu2 %v8131_v24  ;;  %4274 = vmatpush.msra.mxu3 %v8062_v3 }
 0x953   : > { %4249 = vmatmul.f32.vlgmr.msra.gmra.mxu2 %v3832_v19  ;;  %4164 = vmatpush.msra.mxu0 %v8079_v48 }
 0x954   : > { %4276 = vmatpush.msra.mxu3 %v8082_v13  ;;  %4370 = vmatpush.msrb.mxu1 %v7944_v18 }
 0x955   : > { %4278 = vmatmul.f32.vlgmr.msra.gmra.mxu3 %v3832_v19  ;;  %4167 = vmatpush.msra.mxu0 %v8095_v30  ;;  %v9394_v19 = vld [vmem:[#allocation30_spill] sm:$0xff] }
 0x956   : > { %4376 = vmatpush.msrb.mxu1 %v7946_v63  ;;  %4428 = vmatpush.msrb.mxu2 %v7883_v7 }
 0x957   : > { %4170 = vmatpush.msra.mxu0 %v8109_v51  ;;  %4465 = vmatpush.msrb.mxu3 %v7860_v50 }
 0x958   : > { %4173 = vmatmul.f32.vlgmr.msra.gmra.mxu0 %v3833_v20  ;;  %4382 = vmatpush.msrb.mxu1 %v7962_v33  ;;  %v9395_v20 = vld [vmem:[#allocation44_spill] sm:$0xff] }
 0x959   : > { %4431 = vmatpush.msrb.mxu2 %v7887_v22  ;;  %4467 = vmatpush.msrb.mxu3 %v7863_v47 }
 0x95a   : > { %4388 = vmatpush.msrb.mxu1 %v7981_v54  ;;  %4333 = vmatpush.msrb.mxu0 %v7860_v50 }
 0x95b   : > { %4434 = vmatpush.msrb.mxu2 %v7891_v2  ;;  %4469 = vmatpush.msrb.mxu3 %v7866_v49 }
 0x95c   : > { %4394 = vmatpush.msrb.mxu1 %v8003_v31  ;;  %4335 = vmatpush.msrb.mxu0 %v7863_v47 }
 0x95d   : > { %4437 = vmatpush.msrb.mxu2 %v7896_v43  ;;  %4471 = vmatpush.msrb.mxu3 %v7869_v59 }
 0x95e   : > { %4400 = vmatpush.msrb.mxu1 %v8023_v36  ;;  %4337 = vmatpush.msrb.mxu0 %v7866_v49 }
 0x95f   : > { %4440 = vmatpush.msrb.mxu2 %v7900_v38  ;;  %4473 = vmatpush.msrb.mxu3 %v7872_v61 }
 0x960   : > { %4406 = vmatpush.msrb.mxu1 %v9353_v35  ;;  %4339 = vmatpush.msrb.mxu0 %v7869_v59 }
 0x961   : > { %4443 = vmatpush.msrb.mxu2 %v9379_v62  ;;  %4475 = vmatpush.msrb.mxu3 %v9380_v8 }
 0x962   : > { %4412 = vmatpush.msrb.mxu1 %v9381_v40  ;;  %4341 = vmatpush.msrb.mxu0 %v7872_v61 }
 0x963   : > { %4446 = vmatpush.msrb.mxu2 %v9382_v15  ;;  %4477 = vmatpush.msrb.mxu3 %v9383_v60 }
 0x964   : > { %4541 = vmatpush.msra.mxu1 %v7860_v50  ;;  %4343 = vmatpush.msrb.mxu0 %v9380_v8 }
 0x965   : > { %4449 = vmatpush.msrb.mxu2 %v9384_v44  ;;  %4479 = vmatpush.msrb.mxu3 %v9385_v37 }
 0x966   : > { %4543 = vmatpush.msra.mxu1 %v7863_v47  ;;  %4345 = vmatpush.msrb.mxu0 %v9383_v60 }
 0x967   : > { %4570 = vmatpush.msra.mxu2 %v7966_v52  ;;  %4607 = vmatpush.msra.mxu3 %v9386_v21 }
 0x968   : > { %4545 = vmatpush.msra.mxu1 %v7866_v49  ;;  %4347 = vmatpush.msrb.mxu0 %v9385_v37 }
 0x969   : > { %4572 = vmatpush.msra.mxu2 %v7969_v42  ;;  %4613 = vmatpush.msra.mxu3 %v9387_v55 }
 0x96a   : > { %4547 = vmatpush.msra.mxu1 %v7869_v59  ;;  %4498 = vmatpush.msra.mxu0 %v9388_v4 }
 0x96b   : > { %4574 = vmatpush.msra.mxu2 %v7978_v25  ;;  %4619 = vmatpush.msra.mxu3 %v9389_v27 }
 0x96c   : > { %4549 = vmatpush.msra.mxu1 %v7872_v61  ;;  %4502 = vmatpush.msra.mxu0 %v9390_v23 }
 0x96d   : > { %4576 = vmatpush.msra.mxu2 %v8000_v9  ;;  %4625 = vmatpush.msra.mxu3 %v9391_v34  ;;  %v9402_v34 = vld [vmem:[#allocation7_spill] sm:$0xff] }
 0x96e   : > { %4551 = vmatpush.msra.mxu1 %v9380_v8  ;;  %4506 = vmatpush.msra.mxu0 %v9392_v57 }
 0x96f   : > { %4578 = vmatpush.msra.mxu2 %v8020_v32  ;;  %4631 = vmatpush.msra.mxu3 %v9393_v16  ;;  %v9400_v16 = vld [vmem:[#allocation35_spill] sm:$0xff] }
 0x970   : > { %4553 = vmatpush.msra.mxu1 %v9383_v60  ;;  %4510 = vmatpush.msra.mxu0 %v9394_v19  ;;  %v9401_v19 = vld [vmem:[#allocation36_spill] sm:$0xff]  ;;  %v8714_v60 = vld [vmem:[%s8267_s19 + $0x10] sm:$0xff] }
 0x971   : > { %4580 = vmatpush.msra.mxu2 %v8041_v6  ;;  %4637 = vmatpush.msra.mxu3 %v9395_v20  ;;  %9403 = vst [vmem:[#allocation47_spill] sm:$0xff] %v8714_v60 }
 0x972   : > { %4555 = vmatpush.msra.mxu1 %v9385_v37  ;;  %4514 = vmatpush.msra.mxu0 %v9396_v41 }
 0x973   : > { %4582 = vmatpush.msra.mxu2 %v8062_v3  ;;  %4643 = vmatpush.msra.mxu3 %v9397_v28 }
 0x974   : > { %4518 = vmatpush.msra.mxu0 %v9398_v26 }
 0x975   : > { %4584 = vmatpush.msra.mxu2 %v8082_v13  ;;  %4649 = vmatpush.msra.mxu3 %v9399_v45 }
 0x976   : > { %4522 = vmatpush.msra.mxu0 %v9400_v16 }
 0x978   : > { %4526 = vmatpush.msra.mxu0 %v9401_v19 }
 0x9bb   : > { %v3899_v27 = vpop.f32.mrf.mxu1 }
 0x9c3   : > { %v3838_v57 = vpop.f32.mrf.mxu0  ;;  %v3937_v4 = vpop.f32.mrf.mxu2 }
 0x9c4   : > { %v3839_v23 = vadd.f32 %v3838_v57, %v9402_v34  ;;  %v4042_v44 = vpop.f32.mrf.mxu1 }
 0x9c5   : > { %v3968_v55 = vpop.f32.mrf.mxu3 }
 0x9c6   : > { %v3900_v20 = vadd.f32 %v3899_v27, %v3839_v23 }
 0x9c8   : > { %v3938_v41 = vadd.f32 %v3937_v4, %v3900_v20 }
 0x9ca   : > { %v3969_v21 = vadd.f32 %v3968_v55, %v3938_v41 }
 0x9cc   : > { %v4075_v19 = vpop.f32.mrf.mxu2 }
 0x9cd   : > { %v4013_v37 = vpop.f32.mrf.mxu0  ;;  %v4076_v57 = vadd.f32 %v4075_v19, %v9351_v46 }
 0x9ce   : > { %v4014_v28 = vadd.f32 %v4013_v37, %v3969_v21  ;;  %v4205_v37 = vpop.f32.mrf.mxu1 }
 0x9cf   : > { %v4136_v27 = vpop.f32.mrf.mxu3 }
 0x9d0   : > { %v4043_v26 = vadd.f32 %v4042_v44, %v4014_v28  ;;  %v4137_v23 = vadd.f32 %v4136_v27, %v4076_v57  ;;  %v8719_v27 = vld [vmem:[%s8267_s19 + $0x18] sm:$0xff] }
 0x9d2   : > { %v4282_v45 = vadd.f32 %v4043_v26, %v8714_v60 }
 0x9d4   : > { %v6432_v16 = vmul.f32 -1.442695, %v4282_v45 }
 0x9d5   : > { %v4174_v4 = vpop.f32.mrf.mxu0 }
 0x9d6   : > { %6530 = vpow2.f32 %v6432_v16  ;;  %v4175_v55 = vadd.f32 %v4174_v4, %v4137_v23  ;;  %v4250_v28 = vpop.f32.mrf.mxu2 }
 0x9d8   : > { %v4206_v21 = vadd.f32 %v4205_v37, %v4175_v55 }
 0x9da   : > { %v4251_v45 = vadd.f32 %v4250_v28, %v4206_v21 }
 0x9dc   : > { %v6531_v15 = vpop.eup %6530 }
 0x9dd   : > { %v4286_v34 = vadd.f32 1.0, %v6531_v15  ;;  %v4279_v15 = vpop.f32.mrf.mxu3 }
 0x9de   : > { %v4280_v46 = vadd.f32 %v4279_v15, %v4251_v45  ;;  %v9404_v15 = vld [vmem:[#allocation39_spill] sm:$0xff] }
 0x9df   : > { %6532 = vrcp.f32 %v4286_v34  ;;  %v4298_v26 = vand.u32 2147483648, %v4286_v34  ;;  %v4296_v60 = vand.u32 2147483647, %v4286_v34  ;;  %vm4292_vm11 = vweird.f32 %v4286_v34 }
 0x9e1   : > { %v4299_v19 = vor.u32 1.1754944e-38, %v4298_v26  ;;  %vm4297_vm13 = vcmp.eq.f32.partialorder %v4296_v60, 8.507059e+37 }
 0x9e5   : > { %v6533_v20 = vpop.eup %6532 }
 0x9e6   : > { %v4288_v41 = vmul.f32 %v6533_v20, %v4286_v34  ;;  %vm4293_vm8 = vweird.f32 %v6533_v20 }
 0x9e7   : > { %vm4294_vm12 = vmor %vm4292_vm11, %vm4293_vm8  ;;  %vm5896_vm11 = vcmask 254976  }
 0x9e8   : > { %v4289_v44 = vsub.f32 1.0, %v4288_v41 }
 0x9ea   : > { %v4290_v16 = vmul.f32 %v6533_v20, %v4289_v44 }
 0x9ec   : > { %v4291_v40 = vadd.f32 %v6533_v20, %v4290_v16 }
 0x9ee   : > { %v4295_v57 = vsel %vm4294_vm12, %v6533_v20, %v4291_v40  ;;  %vm5901_vm12 = vcmask 517376  }
 0x9ef   : > { %v4300_v4 = vsel %vm4297_vm13, %v4299_v19, %v4295_v57  ;;  %v9405_v19 = vld [vmem:[#allocation32_spill] sm:$0xff] }
 0x9f0   : > { %v4302_v23 = vmul.f32 %v4300_v4, %v4280_v46  ;;  %v9406_v57 = vld [vmem:[#allocation24_spill] sm:$0xff] }
 0x9f2   : > { %v4303_v55 = vadd.f32 %v4302_v23, %v8719_v27  ;;  %v9408_v23 = vld [vmem:[#allocation25_spill] sm:$0xff] }
 0x9f4   : > { %6534 = vtanh.f32 %v4303_v55  ;;  %v9409_v55 = vld [vmem:[#allocation38_spill] sm:$0xff] }
 0x9fa   : > { %v6535_v37 = vpop.eup %6534 }
 0x9fb   : > { %v4306_v21 = vrot.slane %v6535_v37, 2 }
 0x9fd   : > { %v4308_v41 = vsub.f32 %v8609_v0, %v4306_v21  ;;  %v9411_v21 = vld [vmem:[#allocation26_spill] sm:$0xff] }
 0x9ff   : > { %v4310_v44 = vrot.slane %v4308_v41, 6  ;;  %v9412_v41 = vld [vmem:[#allocation41_spill] sm:$0xff] }
 0xa01   : > { %4311 = vrot.lane.b32.xlu2 %v4310_v44, %s6582_s1  ;;  %v9413_v44 = vld [vmem:[#allocation27_spill] sm:$0xff] }
 0xa5b   : > { %v4312_v34 = vpop.permute.xlu2 %4311 }
 0xa5c   : > { %v4314_v28 = vmul.f32 %v4312_v34, %v4300_v4  ;;  %v9407_v4 = vld [vmem:[#allocation33_spill] sm:$0xff]  ;;  %v9414_v34 = vld [vmem:[#allocation42_spill] sm:$0xff] }
 0xa5e   : > { %4316 = vrot.lane.b32.xlu0 %v4314_v28, %s6582_s1  ;;  %v9415_v28 = vld [vmem:[#allocation28_spill] sm:$0xff] }
 0xad0   : > { %v4317_v40 = vpop.permute.xlu0 %4316 }
 0xad1   : > { %v8725_v60 = vadd.f32 %v6535_v37, %v4317_v40  ;;  %v9410_v37 = vld [vmem:[#allocation40_spill] sm:$0xff]  ;;  %v9416_v40 = vld [vmem:[#allocation43_spill] sm:$0xff] }
 0xad3   : > { %v4322_v46 = vsel %vm729_vm2, %v8725_v60, 0 }
 0xad4   : > { %v4348_v20 = vand.u32 4294901760, %v4322_v46 }
 0xad6   : > { %v4349_v26 = vsub.f32 %v4322_v46, %v4348_v20  ;;  %4414 = vmatmul.f32.vlgmr.msrb.gmra.mxu1 %v4348_v20  ;;  %v9417_v46 = vld [vmem:[#allocation30_spill] sm:$0xff] }
 0xad7   : > { %4702 = vmatpush.msrb.mxu1 %v7966_v52 }
 0xad8   : > { %4452 = vmatmul.f32.vlgmr.msrb.gmra.mxu2 %v4349_v26  ;;  %v4350_v0 = vand.u32 4294901760, %v4349_v26 }
 0xad9   : > { %4704 = vmatpush.msrb.mxu1 %v7969_v42  ;;  %4735 = vmatpush.msrb.mxu2 %v8009_v56 }
 0xada   : > { %4483 = vmatmul.f32.vlgmr.msrb.gmra.mxu3 %v4350_v0  ;;  %v4351_v45 = vsub.f32 %v4349_v26, %v4350_v0 }
 0xadb   : > { %4706 = vmatpush.msrb.mxu1 %v7978_v25  ;;  %4739 = vmatpush.msrb.mxu2 %v8032_v5 }
 0xadc   : > { %4778 = vmatpush.msrb.mxu3 %v7966_v52  ;;  %v4352_v16 = vand.u32 4294901760, %v4351_v45  ;;  %v9421_v45 = vld [vmem:[#allocation34_spill] sm:$0xff] }
 0xadd   : > { %4708 = vmatpush.msrb.mxu1 %v8000_v9  ;;  %4743 = vmatpush.msrb.mxu2 %v8051_v29 }
 0xade   : > { %4780 = vmatpush.msrb.mxu3 %v7969_v42  ;;  %4353 = vmatmul.f32.vlgmr.msrb.gmra.mxu0 %v4352_v16 }
 0xadf   : > { %4557 = vmatmul.f32.vlgmr.msra.gmra.mxu1 %v4348_v20  ;;  %4665 = vmatpush.msrb.mxu0 %v7988_v12 }
 0xae0   : > { %4710 = vmatpush.msrb.mxu1 %v8020_v32  ;;  %4747 = vmatpush.msrb.mxu2 %v8075_v1 }
 0xae1   : > { %4782 = vmatpush.msrb.mxu3 %v7978_v25  ;;  %4590 = vmatmul.f32.vlgmr.msra.gmra.mxu2 %v4352_v16  ;;  %v9422_v16 = vld [vmem:[#allocation46_spill] sm:$0xff] }
 0xae2   : > { %4668 = vmatpush.msrb.mxu0 %v7992_v58  ;;  %4712 = vmatpush.msrb.mxu1 %v8041_v6 }
 0xae3   : > { %4751 = vmatpush.msrb.mxu2 %v8091_v11  ;;  %4784 = vmatpush.msrb.mxu3 %v8000_v9 }
 0xae4   : > { %4651 = vmatmul.f32.vlgmr.msra.gmra.mxu3 %v4348_v20  ;;  %4671 = vmatpush.msrb.mxu0 %v8013_v10 }
 0xae5   : > { %4714 = vmatpush.msrb.mxu1 %v8062_v3  ;;  %4755 = vmatpush.msrb.mxu2 %v8105_v14 }
 0xae6   : > { %4786 = vmatpush.msrb.mxu3 %v8020_v32  ;;  %4674 = vmatpush.msrb.mxu0 %v8038_v17 }
 0xae7   : > { %4716 = vmatpush.msrb.mxu1 %v8082_v13  ;;  %4759 = vmatpush.msrb.mxu2 %v8120_v53 }
 0xae8   : > { %4788 = vmatpush.msrb.mxu3 %v8041_v6  ;;  %4528 = vmatmul.f32.vlgmr.msra.gmra.mxu0 %v4348_v20 }
 0xae9   : > { %4720 = vmatmul.f32.vlgmr.msrb.gmra.mxu1 %v4350_v0  ;;  %4677 = vmatpush.msrb.mxu0 %v8059_v39  ;;  %v9420_v0 = vld [vmem:[#allocation45_spill] sm:$0xff] }
 0xaea   : > { %4763 = vmatpush.msrb.mxu2 %v8131_v24  ;;  %4790 = vmatpush.msrb.mxu3 %v8062_v3 }
 0xaeb   : > { %4765 = vmatmul.f32.vlgmr.msrb.gmra.mxu2 %v4348_v20  ;;  %4680 = vmatpush.msrb.mxu0 %v8079_v48 }
 0xaec   : > { %4792 = vmatpush.msrb.mxu3 %v8082_v13  ;;  %4894 = vmatpush.msra.mxu1 %v7944_v18 }
 0xaed   : > { %4794 = vmatmul.f32.vlgmr.msrb.gmra.mxu3 %v4348_v20  ;;  %4683 = vmatpush.msrb.mxu0 %v8095_v30  ;;  %v9418_v20 = vld [vmem:[#allocation44_spill] sm:$0xff] }
 0xaee   : > { %4900 = vmatpush.msra.mxu1 %v7946_v63  ;;  %4952 = vmatpush.msra.mxu2 %v7883_v7 }
 0xaef   : > { %4686 = vmatpush.msrb.mxu0 %v8109_v51  ;;  %4989 = vmatpush.msra.mxu3 %v7860_v50 }
 0xaf0   : > { %4689 = vmatmul.f32.vlgmr.msrb.gmra.mxu0 %v4349_v26  ;;  %4906 = vmatpush.msra.mxu1 %v7962_v33  ;;  %v9419_v26 = vld [vmem:[#allocation31_spill] sm:$0xff] }
 0xaf1   : > { %4955 = vmatpush.msra.mxu2 %v7887_v22  ;;  %4991 = vmatpush.msra.mxu3 %v7863_v47 }
 0xaf2   : > { %4912 = vmatpush.msra.mxu1 %v7981_v54  ;;  %4857 = vmatpush.msra.mxu0 %v7860_v50 }
 0xaf3   : > { %4958 = vmatpush.msra.mxu2 %v7891_v2  ;;  %4993 = vmatpush.msra.mxu3 %v7866_v49 }
 0xaf4   : > { %4918 = vmatpush.msra.mxu1 %v8003_v31  ;;  %4859 = vmatpush.msra.mxu0 %v7863_v47 }
 0xaf5   : > { %4961 = vmatpush.msra.mxu2 %v7896_v43  ;;  %4995 = vmatpush.msra.mxu3 %v7869_v59 }
 0xaf6   : > { %4924 = vmatpush.msra.mxu1 %v8023_v36  ;;  %4861 = vmatpush.msra.mxu0 %v7866_v49 }
 0xaf7   : > { %4964 = vmatpush.msra.mxu2 %v7900_v38  ;;  %4997 = vmatpush.msra.mxu3 %v7872_v61 }
 0xaf8   : > { %4930 = vmatpush.msra.mxu1 %v9353_v35  ;;  %4863 = vmatpush.msra.mxu0 %v7869_v59 }
 0xaf9   : > { %4967 = vmatpush.msra.mxu2 %v9379_v62  ;;  %4999 = vmatpush.msra.mxu3 %v9380_v8 }
 0xafa   : > { %4936 = vmatpush.msra.mxu1 %v9404_v15  ;;  %4865 = vmatpush.msra.mxu0 %v7872_v61 }
 0xafb   : > { %4970 = vmatpush.msra.mxu2 %v9405_v19  ;;  %5001 = vmatpush.msra.mxu3 %v9406_v57  ;;  %v9426_v19 = vld [vmem:[#allocation47_spill] sm:$0xff] }
 0xafc   : > { %5065 = vmatpush.msrb.mxu1 %v7860_v50  ;;  %4867 = vmatpush.msra.mxu0 %v9380_v8 }
 0xafd   : > { %4973 = vmatpush.msra.mxu2 %v9407_v4  ;;  %5003 = vmatpush.msra.mxu3 %v9408_v23 }
 0xafe   : > { %5067 = vmatpush.msrb.mxu1 %v7863_v47  ;;  %4869 = vmatpush.msra.mxu0 %v9406_v57 }
 0xaff   : > { %5094 = vmatpush.msrb.mxu2 %v7966_v52  ;;  %5131 = vmatpush.msrb.mxu3 %v9409_v55 }
 0xb00   : > { %5069 = vmatpush.msrb.mxu1 %v7866_v49  ;;  %4871 = vmatpush.msra.mxu0 %v9408_v23 }
 0xb01   : > { %5096 = vmatpush.msrb.mxu2 %v7969_v42  ;;  %5137 = vmatpush.msrb.mxu3 %v9410_v37 }
 0xb02   : > { %5071 = vmatpush.msrb.mxu1 %v7869_v59  ;;  %5022 = vmatpush.msrb.mxu0 %v9411_v21 }
 0xb03   : > { %5098 = vmatpush.msrb.mxu2 %v7978_v25  ;;  %5143 = vmatpush.msrb.mxu3 %v9412_v41 }
 0xb04   : > { %5073 = vmatpush.msrb.mxu1 %v7872_v61  ;;  %5026 = vmatpush.msrb.mxu0 %v9413_v44 }
 0xb05   : > { %5100 = vmatpush.msrb.mxu2 %v8000_v9  ;;  %5149 = vmatpush.msrb.mxu3 %v9414_v34  ;;  %v9425_v34 = vld [vmem:[#allocation7_spill] sm:$0xff] }
 0xb06   : > { %5075 = vmatpush.msrb.mxu1 %v9380_v8  ;;  %5030 = vmatpush.msrb.mxu0 %v9415_v28  ;;  %v9423_v28 = vld [vmem:[#allocation35_spill] sm:$0xff] }
 0xb07   : > { %5102 = vmatpush.msrb.mxu2 %v8020_v32  ;;  %5155 = vmatpush.msrb.mxu3 %v9416_v40  ;;  %v9424_v40 = vld [vmem:[#allocation36_spill] sm:$0xff] }
 0xb08   : > { %5077 = vmatpush.msrb.mxu1 %v9406_v57  ;;  %5034 = vmatpush.msrb.mxu0 %v9417_v46 }
 0xb09   : > { %5104 = vmatpush.msrb.mxu2 %v8041_v6  ;;  %5161 = vmatpush.msrb.mxu3 %v9418_v20 }
 0xb0a   : > { %5079 = vmatpush.msrb.mxu1 %v9408_v23  ;;  %5038 = vmatpush.msrb.mxu0 %v9419_v26 }
 0xb0b   : > { %5106 = vmatpush.msrb.mxu2 %v8062_v3  ;;  %5167 = vmatpush.msrb.mxu3 %v9420_v0 }
 0xb0c   : > { %5042 = vmatpush.msrb.mxu0 %v9421_v45 }
 0xb0d   : > { %5108 = vmatpush.msrb.mxu2 %v8082_v13  ;;  %5173 = vmatpush.msrb.mxu3 %v9422_v16 }
 0xb0e   : > { %5046 = vmatpush.msrb.mxu0 %v9423_v28 }
 0xb10   : > { %5050 = vmatpush.msrb.mxu0 %v9424_v40  ;;  %v9427_v40 = vld [vmem:[#allocation8_spill] sm:$0xff] }
 0xb53   : > { %v4415_v41 = vpop.f32.mrf.mxu1 }
 0xb5b   : > { %v4354_v46 = vpop.f32.mrf.mxu0  ;;  %v4453_v20 = vpop.f32.mrf.mxu2 }
 0xb5c   : > { %v4355_v44 = vadd.f32 %v4354_v46, %v9425_v34  ;;  %v4558_v0 = vpop.f32.mrf.mxu1 }
 0xb5d   : > { %v4484_v26 = vpop.f32.mrf.mxu3 }
 0xb5e   : > { %v4416_v21 = vadd.f32 %v4415_v41, %v4355_v44 }
 0xb60   : > { %v4454_v37 = vadd.f32 %v4453_v20, %v4416_v21 }
 0xb62   : > { %v4485_v55 = vadd.f32 %v4484_v26, %v4454_v37 }
 0xb64   : > { %v4591_v28 = vpop.f32.mrf.mxu2 }
 0xb65   : > { %v4529_v23 = vpop.f32.mrf.mxu0  ;;  %v4592_v8 = vadd.f32 %v4591_v28, %v9427_v40 }
 0xb66   : > { %v4530_v4 = vadd.f32 %v4529_v23, %v4485_v55  ;;  %v4721_v37 = vpop.f32.mrf.mxu1 }
 0xb67   : > { %v4652_v62 = vpop.f32.mrf.mxu3 }
 0xb68   : > { %v4559_v57 = vadd.f32 %v4558_v0, %v4530_v4  ;;  %v4653_v41 = vadd.f32 %v4652_v62, %v4592_v8 }
 0xb6a   : > { %v4799_v45 = vrot.slane %v4559_v57, 6 }
 0xb6c   : > { %v4801_v16 = vadd.f32 %v4799_v45, %v9426_v19 }
 0xb6d   : > { %v4690_v46 = vpop.f32.mrf.mxu0 }
 0xb6e   : > { %v6433_v15 = vmul.f32 -1.442695, %v4801_v16  ;;  %v4691_v21 = vadd.f32 %v4690_v46, %v4653_v41  ;;  %v4766_v55 = vpop.f32.mrf.mxu2 }
 0xb70   : > { %6536 = vpow2.f32 %v6433_v15  ;;  %v4722_v20 = vadd.f32 %v4721_v37, %v4691_v21  ;;  %v4795_v0 = vpop.f32.mrf.mxu3 }
 0xb72   : > { %v4767_v4 = vadd.f32 %v4766_v55, %v4722_v20 }
 0xb74   : > { %v4796_v16 = vadd.f32 %v4795_v0, %v4767_v4 }
 0xb76   : > { %v6537_v34 = vpop.eup %6536 }
 0xb77   : > { %v4805_v44 = vadd.f32 1.0, %v6537_v34  ;;  %v4822_v34 = vrot.slane %v4796_v16, 6 }
 0xb79   : > { %6538 = vrcp.f32 %v4805_v44  ;;  %v4817_v45 = vand.u32 2147483648, %v4805_v44  ;;  %v4815_v28 = vand.u32 2147483647, %v4805_v44  ;;  %vm4811_vm15 = vweird.f32 %v4805_v44 }
 0xb7b   : > { %v4818_v62 = vor.u32 1.1754944e-38, %v4817_v45  ;;  %vm4816_vm1 = vcmp.eq.f32.partialorder %v4815_v28, 8.507059e+37 }
 0xb7f   : > { %v6539_v23 = vpop.eup %6538 }
 0xb80   : > { %v4807_v57 = vmul.f32 %v6539_v23, %v4805_v44  ;;  %vm4812_vm14 = vweird.f32 %v6539_v23 }
 0xb81   : > { %vm4813_vm0 = vmor %vm4811_vm15, %vm4812_vm14 }
 0xb82   : > { %v4808_v26 = vsub.f32 1.0, %v4807_v57 }
 0xb84   : > { %v4809_v15 = vmul.f32 %v6539_v23, %v4808_v26 }
 0xb86   : > { %v4810_v40 = vadd.f32 %v6539_v23, %v4809_v15 }
 0xb88   : > { %v4814_v8 = vsel %vm4813_vm0, %v6539_v23, %v4810_v40  ;;  %v9428_v23 = vld [vmem:[#allocation22_spill] sm:$0xff]  ;;  %vm6373_vm0 = vcmask (%p1702_p0), 48128  }
 0xb89   : > { %v4819_v46 = vsel %vm4816_vm1, %v4818_v62, %v4814_v8  ;;  %v4320_v0 = vmax.f32 %v9428_v23, %v8725_v60 }
 0xb8a   : > { %v4824_v41 = vmul.f32 %v4822_v34, %v4819_v46 }
 0xb8c   : > { %v4825_v21 = vadd.f32 %v4824_v41, %v8719_v27  ;;  %v9447_v41 = vld [vmem:[#allocation45_spill] sm:$0xff] }
 0xb8e   : > { %6540 = vtanh.f32 %v4825_v21  ;;  %v9448_v21 = vld [vmem:[#allocation34_spill] sm:$0xff] }
 0xb94   : > { %v6541_v37 = vpop.eup %6540 }
 0xb95   : > { %v4828_v20 = vrot.slane %v6541_v37, 2 }
 0xb97   : > { %v4830_v55 = vsub.f32 %v8725_v60, %v4828_v20  ;;  %v9450_v20 = vld [vmem:[#allocation35_spill] sm:$0xff] }
 0xb99   : > { %v4832_v4 = vrot.slane %v4830_v55, 6  ;;  %v9451_v55 = vld [vmem:[#allocation36_spill] sm:$0xff] }
 0xb9b   : > { %4833 = vrot.lane.b32.xlu1 %v4832_v4, %s6582_s1 }
 0xc0d   : > { %v4834_v57 = vpop.permute.xlu1 %4833 }
 0xc0e   : > { %v4836_v26 = vmul.f32 %v4834_v57, %v4819_v46  ;;  %v9446_v46 = vld [vmem:[#allocation31_spill] sm:$0xff] }
 0xc0f   : > { %v9452_v57 = vld [vmem:[#allocation7_spill] sm:$0xff] }
 0xc10   : > { %4838 = vrot.lane.b32.xlu2 %v4836_v26, %s6582_s1 }
 0xc6a   : > { %v4839_v44 = vpop.permute.xlu2 %4838 }
 0xc6b   : > { %v8832_v40 = vadd.f32 %v6541_v37, %v4839_v44  ;;  %v9449_v37 = vld [vmem:[#allocation46_spill] sm:$0xff] }
 0xc6d   : > { %v4843_v45 = vrot.slane %v8832_v40, 2 }
 0xc6f   : > { %v8837_v16 = vmax.f32 %v4320_v0, %v4843_v45  ;;  %v4846_v15 = vsel %vm729_vm2, %v4843_v45, 0 }
 0xc70   : > { %v4872_v28 = vand.u32 4294901760, %v4846_v15 }
 0xc72   : > { %v4873_v62 = vsub.f32 %v4846_v15, %v4872_v28  ;;  %4938 = vmatmul.f32.vlgmr.msra.gmra.mxu1 %v4872_v28 }
 0xc73   : > { %5226 = vmatpush.msra.mxu1 %v7966_v52 }
 0xc74   : > { %4976 = vmatmul.f32.vlgmr.msra.gmra.mxu2 %v4873_v62  ;;  %v4874_v8 = vand.u32 4294901760, %v4873_v62 }
 0xc75   : > { %5228 = vmatpush.msra.mxu1 %v7969_v42  ;;  %5259 = vmatpush.msra.mxu2 %v8009_v56 }
 0xc76   : > { %5007 = vmatmul.f32.vlgmr.msra.gmra.mxu3 %v4874_v8  ;;  %v4875_v34 = vsub.f32 %v4873_v62, %v4874_v8 }
 0xc77   : > { %5230 = vmatpush.msra.mxu1 %v7978_v25  ;;  %5263 = vmatpush.msra.mxu2 %v8032_v5 }
 0xc78   : > { %5302 = vmatpush.msra.mxu3 %v7966_v52  ;;  %v4876_v60 = vand.u32 4294901760, %v4875_v34 }
 0xc79   : > { %5232 = vmatpush.msra.mxu1 %v8000_v9  ;;  %5267 = vmatpush.msra.mxu2 %v8051_v29 }
 0xc7a   : > { %5304 = vmatpush.msra.mxu3 %v7969_v42  ;;  %4877 = vmatmul.f32.vlgmr.msra.gmra.mxu0 %v4876_v60 }
 0xc7b   : > { %5081 = vmatmul.f32.vlgmr.msrb.gmra.mxu1 %v4872_v28  ;;  %5189 = vmatpush.msra.mxu0 %v7988_v12 }
 0xc7c   : > { %5234 = vmatpush.msra.mxu1 %v8020_v32  ;;  %5271 = vmatpush.msra.mxu2 %v8075_v1 }
 0xc7d   : > { %5306 = vmatpush.msra.mxu3 %v7978_v25  ;;  %5114 = vmatmul.f32.vlgmr.msrb.gmra.mxu2 %v4876_v60 }
 0xc7e   : > { %5192 = vmatpush.msra.mxu0 %v7992_v58  ;;  %5236 = vmatpush.msra.mxu1 %v8041_v6 }
 0xc7f   : > { %5275 = vmatpush.msra.mxu2 %v8091_v11  ;;  %5308 = vmatpush.msra.mxu3 %v8000_v9 }
 0xc80   : > { %5175 = vmatmul.f32.vlgmr.msrb.gmra.mxu3 %v4872_v28  ;;  %5195 = vmatpush.msra.mxu0 %v8013_v10 }
 0xc81   : > { %5238 = vmatpush.msra.mxu1 %v8062_v3  ;;  %5279 = vmatpush.msra.mxu2 %v8105_v14 }
 0xc82   : > { %5310 = vmatpush.msra.mxu3 %v8020_v32  ;;  %5198 = vmatpush.msra.mxu0 %v8038_v17 }
 0xc83   : > { %5240 = vmatpush.msra.mxu1 %v8082_v13  ;;  %5283 = vmatpush.msra.mxu2 %v8120_v53 }
 0xc84   : > { %5312 = vmatpush.msra.mxu3 %v8041_v6  ;;  %5052 = vmatmul.f32.vlgmr.msrb.gmra.mxu0 %v4872_v28 }
 0xc85   : > { %5244 = vmatmul.f32.vlgmr.msra.gmra.mxu1 %v4874_v8  ;;  %5201 = vmatpush.msra.mxu0 %v8059_v39 }
 0xc86   : > { %5287 = vmatpush.msra.mxu2 %v8131_v24  ;;  %5314 = vmatpush.msra.mxu3 %v8062_v3 }
 0xc87   : > { %5289 = vmatmul.f32.vlgmr.msra.gmra.mxu2 %v4872_v28  ;;  %5204 = vmatpush.msra.mxu0 %v8079_v48 }
 0xc88   : > { %5316 = vmatpush.msra.mxu3 %v8082_v13  ;;  %5418 = vmatpush.msrb.mxu1 %v7944_v18  ;;  %v9433_v18 = vld [vmem:[#allocation24_spill] sm:$0xff] }
 0xc89   : > { %5318 = vmatmul.f32.vlgmr.msra.gmra.mxu3 %v4872_v28  ;;  %5207 = vmatpush.msra.mxu0 %v8095_v30 }
 0xc8a   : > { %5424 = vmatpush.msrb.mxu1 %v7946_v63  ;;  %5476 = vmatpush.msrb.mxu2 %v7883_v7  ;;  %v9429_v7 = vld [vmem:[#allocation29_spill] sm:$0xff] }
 0xc8b   : > { %5210 = vmatpush.msra.mxu0 %v8109_v51  ;;  %5513 = vmatpush.msrb.mxu3 %v7860_v50  ;;  %v9435_v63 = vld [vmem:[#allocation25_spill] sm:$0xff] }
 0xc8c   : > { %5213 = vmatmul.f32.vlgmr.msra.gmra.mxu0 %v4873_v62  ;;  %5430 = vmatpush.msrb.mxu1 %v7962_v33  ;;  %v9436_v33 = vld [vmem:[#allocation38_spill] sm:$0xff] }
 0xc8d   : > { %5479 = vmatpush.msrb.mxu2 %v7887_v22  ;;  %5515 = vmatpush.msrb.mxu3 %v7863_v47  ;;  %v9430_v22 = vld [vmem:[#allocation23_spill] sm:$0xff] }
 0xc8e   : > { %5436 = vmatpush.msrb.mxu1 %v7981_v54  ;;  %5381 = vmatpush.msrb.mxu0 %v7860_v50  ;;  %v9440_v54 = vld [vmem:[#allocation27_spill] sm:$0xff] }
 0xc8f   : > { %5482 = vmatpush.msrb.mxu2 %v7891_v2  ;;  %5517 = vmatpush.msrb.mxu3 %v7866_v49  ;;  %v9431_v2 = vld [vmem:[#allocation39_spill] sm:$0xff] }
 0xc90   : > { %5442 = vmatpush.msrb.mxu1 %v8003_v31  ;;  %5383 = vmatpush.msrb.mxu0 %v7863_v47  ;;  %v9442_v31 = vld [vmem:[#allocation28_spill] sm:$0xff] }
 0xc91   : > { %5485 = vmatpush.msrb.mxu2 %v7896_v43  ;;  %5519 = vmatpush.msrb.mxu3 %v7869_v59  ;;  %v9432_v43 = vld [vmem:[#allocation32_spill] sm:$0xff] }
 0xc92   : > { %5448 = vmatpush.msrb.mxu1 %v8023_v36  ;;  %5385 = vmatpush.msrb.mxu0 %v7866_v49  ;;  %v9443_v36 = vld [vmem:[#allocation43_spill] sm:$0xff] }
 0xc93   : > { %5488 = vmatpush.msrb.mxu2 %v7900_v38  ;;  %5521 = vmatpush.msrb.mxu3 %v7872_v61  ;;  %v9434_v38 = vld [vmem:[#allocation33_spill] sm:$0xff] }
 0xc94   : > { %5454 = vmatpush.msrb.mxu1 %v9353_v35  ;;  %5387 = vmatpush.msrb.mxu0 %v7869_v59  ;;  %v9445_v35 = vld [vmem:[#allocation44_spill] sm:$0xff] }
 0xc95   : > { %5491 = vmatpush.msrb.mxu2 %v9429_v7  ;;  %5523 = vmatpush.msrb.mxu3 %v9430_v22 }
 0xc96   : > { %5460 = vmatpush.msrb.mxu1 %v9431_v2  ;;  %5389 = vmatpush.msrb.mxu0 %v7872_v61 }
 0xc97   : > { %5494 = vmatpush.msrb.mxu2 %v9432_v43  ;;  %5525 = vmatpush.msrb.mxu3 %v9433_v18 }
 0xc98   : > { %5589 = vmatpush.msra.mxu1 %v7860_v50  ;;  %5391 = vmatpush.msrb.mxu0 %v9430_v22  ;;  %v9437_v50 = vld [vmem:[#allocation40_spill] sm:$0xff] }
 0xc99   : > { %5497 = vmatpush.msrb.mxu2 %v9434_v38  ;;  %5527 = vmatpush.msrb.mxu3 %v9435_v63 }
 0xc9a   : > { %5591 = vmatpush.msra.mxu1 %v7863_v47  ;;  %5393 = vmatpush.msrb.mxu0 %v9433_v18  ;;  %v9438_v47 = vld [vmem:[#allocation26_spill] sm:$0xff] }
 0xc9b   : > { %5618 = vmatpush.msra.mxu2 %v7966_v52  ;;  %5655 = vmatpush.msra.mxu3 %v9436_v33 }
 0xc9c   : > { %5593 = vmatpush.msra.mxu1 %v7866_v49  ;;  %5395 = vmatpush.msrb.mxu0 %v9435_v63  ;;  %v9439_v49 = vld [vmem:[#allocation41_spill] sm:$0xff] }
 0xc9d   : > { %5620 = vmatpush.msra.mxu2 %v7969_v42  ;;  %5661 = vmatpush.msra.mxu3 %v9437_v50 }
 0xc9e   : > { %5595 = vmatpush.msra.mxu1 %v7869_v59  ;;  %5546 = vmatpush.msra.mxu0 %v9438_v47  ;;  %v9441_v59 = vld [vmem:[#allocation42_spill] sm:$0xff] }
 0xc9f   : > { %5622 = vmatpush.msra.mxu2 %v7978_v25  ;;  %5667 = vmatpush.msra.mxu3 %v9439_v49 }
 0xca0   : > { %5597 = vmatpush.msra.mxu1 %v7872_v61  ;;  %5550 = vmatpush.msra.mxu0 %v9440_v54  ;;  %v9444_v61 = vld [vmem:[#allocation30_spill] sm:$0xff] }
 0xca1   : > { %5624 = vmatpush.msra.mxu2 %v8000_v9  ;;  %5673 = vmatpush.msra.mxu3 %v9441_v59 }
 0xca2   : > { %5599 = vmatpush.msra.mxu1 %v9430_v22  ;;  %5554 = vmatpush.msra.mxu0 %v9442_v31 }
 0xca3   : > { %5626 = vmatpush.msra.mxu2 %v8020_v32  ;;  %5679 = vmatpush.msra.mxu3 %v9443_v36 }
 0xca4   : > { %5601 = vmatpush.msra.mxu1 %v9433_v18  ;;  %5558 = vmatpush.msra.mxu0 %v9444_v61  ;;  %v9453_v18 = vld [vmem:[#allocation8_spill] sm:$0xff] }
 0xca5   : > { %5628 = vmatpush.msra.mxu2 %v8041_v6  ;;  %5685 = vmatpush.msra.mxu3 %v9445_v35 }
 0xca6   : > { %5603 = vmatpush.msra.mxu1 %v9435_v63  ;;  %5562 = vmatpush.msra.mxu0 %v9446_v46 }
 0xca7   : > { %5630 = vmatpush.msra.mxu2 %v8062_v3  ;;  %5691 = vmatpush.msra.mxu3 %v9447_v41 }
 0xca8   : > { %5566 = vmatpush.msra.mxu0 %v9448_v21 }
 0xca9   : > { %5632 = vmatpush.msra.mxu2 %v8082_v13  ;;  %5697 = vmatpush.msra.mxu3 %v9449_v37 }
 0xcaa   : > { %5570 = vmatpush.msra.mxu0 %v9450_v20 }
 0xcac   : > { %5574 = vmatpush.msra.mxu0 %v9451_v55 }
 0xcef   : > { %v4939_v44 = vpop.f32.mrf.mxu1 }
 0xcf7   : > { %v4878_v4 = vpop.f32.mrf.mxu0  ;;  %v4977_v0 = vpop.f32.mrf.mxu2 }
 0xcf8   : > { %v4879_v26 = vadd.f32 %v4878_v4, %v9452_v57  ;;  %v5082_v34 = vpop.f32.mrf.mxu1 }
 0xcf9   : > { %v5008_v15 = vpop.f32.mrf.mxu3 }
 0xcfa   : > { %v4940_v23 = vadd.f32 %v4939_v44, %v4879_v26 }
 0xcfc   : > { %v4978_v45 = vadd.f32 %v4977_v0, %v4940_v23 }
 0xcfe   : > { %v5009_v28 = vadd.f32 %v5008_v15, %v4978_v45 }
 0xd00   : > { %v5115_v43 = vpop.f32.mrf.mxu2 }
 0xd01   : > { %v5053_v62 = vpop.f32.mrf.mxu0  ;;  %v5116_v38 = vadd.f32 %v5115_v43, %v9453_v18 }
 0xd02   : > { %v5054_v8 = vadd.f32 %v5053_v62, %v5009_v28  ;;  %v5245_v59 = vpop.f32.mrf.mxu1 }
 0xd03   : > { %v5176_v63 = vpop.f32.mrf.mxu3 }
 0xd04   : > { %v5083_v60 = vadd.f32 %v5082_v34, %v5054_v8  ;;  %v5177_v47 = vadd.f32 %v5176_v63, %v5116_v38 }
 0xd06   : > { %v5323_v7 = vrot.slane %v5083_v60, 4 }
 0xd08   : > { %v5325_v22 = vadd.f32 %v5323_v7, %v9426_v19 }
 0xd09   : > { %v5214_v33 = vpop.f32.mrf.mxu0 }
 0xd0a   : > { %v6434_v2 = vmul.f32 -1.442695, %v5325_v22  ;;  %v5215_v54 = vadd.f32 %v5214_v33, %v5177_v47  ;;  %v5290_v61 = vpop.f32.mrf.mxu2 }
 0xd0c   : > { %6542 = vpow2.f32 %v6434_v2  ;;  %v5246_v31 = vadd.f32 %v5245_v59, %v5215_v54  ;;  %v5319_v21 = vpop.f32.mrf.mxu3 }
 0xd0e   : > { %v5291_v35 = vadd.f32 %v5290_v61, %v5246_v31 }
 0xd10   : > { %v5320_v20 = vadd.f32 %v5319_v21, %v5291_v35 }
 0xd12   : > { %v6543_v50 = vpop.eup %6542  ;;  %v5346_v0 = vrot.slane %v5320_v20, 4 }
 0xd13   : > { %v5329_v49 = vadd.f32 1.0, %v6543_v50 }
 0xd15   : > { %6544 = vrcp.f32 %v5329_v49  ;;  %v5341_v37 = vand.u32 2147483648, %v5329_v49  ;;  %v5339_v4 = vand.u32 2147483647, %v5329_v49  ;;  %vm5335_vm4 = vweird.f32 %v5329_v49 }
 0xd17   : > { %v5342_v44 = vor.u32 1.1754944e-38, %v5341_v37  ;;  %vm5340_vm6 = vcmp.eq.f32.partialorder %v5339_v4, 8.507059e+37 }
 0xd1b   : > { %v6545_v36 = vpop.eup %6544 }
 0xd1c   : > { %v5331_v46 = vmul.f32 %v6545_v36, %v5329_v49  ;;  %vm5336_vm3 = vweird.f32 %v6545_v36 }
 0xd1d   : > { %vm5337_vm5 = vmor %vm5335_vm4, %vm5336_vm3 }
 0xd1e   : > { %v5332_v41 = vsub.f32 1.0, %v5331_v46 }
 0xd20   : > { %v5333_v55 = vmul.f32 %v6545_v36, %v5332_v41 }
 0xd22   : > { %v5334_v26 = vadd.f32 %v6545_v36, %v5333_v55 }
 0xd24   : > { %v5338_v23 = vsel %vm5337_vm5, %v6545_v36, %v5334_v26 }
 0xd25   : > { %v5343_v45 = vsel %vm5340_vm6, %v5342_v44, %v5338_v23 }
 0xd26   : > { %v5348_v15 = vmul.f32 %v5346_v0, %v5343_v45 }
 0xd28   : > { %v5349_v28 = vadd.f32 %v5348_v15, %v8719_v27 }
 0xd2a   : > { %6546 = vtanh.f32 %v5349_v28 }
 0xd30   : > { %v6547_v62 = vpop.eup %6546 }
 0xd31   : > { %v5352_v8 = vrot.slane %v6547_v62, 2 }
 0xd33   : > { %v5354_v34 = vsub.f32 %v8832_v40, %v5352_v8 }
 0xd35   : > { %v5356_v60 = vrot.slane %v5354_v34, 6 }
 0xd37   : > { %5357 = vrot.lane.b32.xlu0 %v5356_v60, %s6582_s1 }
 0xda9   : > { %v5358_v7 = vpop.permute.xlu0 %5357 }
 0xdaa   : > { %v5360_v22 = vmul.f32 %v5358_v7, %v5343_v45 }
 0xdac   : > { %5362 = vrot.lane.b32.xlu1 %v5360_v22, %s6582_s1  ;;  %v5911_v22 = vld [vmem:[%s9122_s6 + $0x38] sm:$0xff] (%p1702_p0) }
 0xe1e   : > { %v5363_v2 = vpop.permute.xlu1 %5362 }
 0xe1f   : > { %v8943_v43 = vadd.f32 %v6547_v62, %v5363_v2  ;;  %v5910_v2 = vld [vmem:[%s9122_s6 + $0x30] sm:$0xff] (%p1702_p0) }
 0xe21   : > { %v5367_v38 = vrot.slane %v8943_v43, 4 }
 0xe23   : > { %v8947_v63 = vmax.f32 %v8837_v16, %v5367_v38  ;;  %v5370_v33 = vsel %vm729_vm2, %v5367_v38, 0  ;;  %v9006_v38 = vand.u32 (%p1702_p0), 4294901760, %v5911_v22 }
 0xe24   : > { %v5396_v50 = vand.u32 4294901760, %v5370_v33 }
 0xe26   : > { %v5397_v47 = vsub.f32 %v5370_v33, %v5396_v50  ;;  %5462 = vmatmul.f32.vlgmr.msrb.gmra.mxu1 %v5396_v50 }
 0xe27   : > { %5750 = vmatpush.msrb.mxu1 %v7966_v52 }
 0xe28   : > { %5500 = vmatmul.f32.vlgmr.msrb.gmra.mxu2 %v5397_v47  ;;  %v5398_v40 = vand.u32 4294901760, %v5397_v47 }
 0xe29   : > { %5752 = vmatpush.msrb.mxu1 %v7969_v42  ;;  %5783 = vmatpush.msrb.mxu2 %v8009_v56 }
 0xe2a   : > { %5531 = vmatmul.f32.vlgmr.msrb.gmra.mxu3 %v5398_v40  ;;  %v5399_v49 = vsub.f32 %v5397_v47, %v5398_v40 }
 0xe2b   : > { %5754 = vmatpush.msrb.mxu1 %v7978_v25  ;;  %5787 = vmatpush.msrb.mxu2 %v8032_v5 }
 0xe2c   : > { %5826 = vmatpush.msrb.mxu3 %v7966_v52  ;;  %v5400_v16 = vand.u32 4294901760, %v5399_v49 }
 0xe2d   : > { %5756 = vmatpush.msrb.mxu1 %v8000_v9  ;;  %5791 = vmatpush.msrb.mxu2 %v8051_v29 }
 0xe2e   : > { %5828 = vmatpush.msrb.mxu3 %v7969_v42  ;;  %5401 = vmatmul.f32.vlgmr.msrb.gmra.mxu0 %v5400_v16 }
 0xe2f   : > { %5605 = vmatmul.f32.vlgmr.msra.gmra.mxu1 %v5396_v50  ;;  %5713 = vmatpush.msrb.mxu0 %v7988_v12 }
 0xe30   : > { %5758 = vmatpush.msrb.mxu1 %v8020_v32  ;;  %5795 = vmatpush.msrb.mxu2 %v8075_v1 }
 0xe31   : > { %5830 = vmatpush.msrb.mxu3 %v7978_v25  ;;  %5638 = vmatmul.f32.vlgmr.msra.gmra.mxu2 %v5400_v16  ;;  %v5905_v16 = vld [vmem:[%s9122_s6 + $0x8] sm:$0xff] (%p1702_p0) }
 0xe32   : > { %5716 = vmatpush.msrb.mxu0 %v7992_v58  ;;  %5760 = vmatpush.msrb.mxu1 %v8041_v6 }
 0xe33   : > { %5799 = vmatpush.msrb.mxu2 %v8091_v11  ;;  %5832 = vmatpush.msrb.mxu3 %v8000_v9 }
 0xe34   : > { %5699 = vmatmul.f32.vlgmr.msra.gmra.mxu3 %v5396_v50  ;;  %5719 = vmatpush.msrb.mxu0 %v8013_v10 }
 0xe35   : > { %5762 = vmatpush.msrb.mxu1 %v8062_v3  ;;  %5803 = vmatpush.msrb.mxu2 %v8105_v14 }
 0xe36   : > { %5834 = vmatpush.msrb.mxu3 %v8020_v32  ;;  %5722 = vmatpush.msrb.mxu0 %v8038_v17 }
 0xe37   : > { %5764 = vmatpush.msrb.mxu1 %v8082_v13  ;;  %5807 = vmatpush.msrb.mxu2 %v8120_v53 }
 0xe38   : > { %5836 = vmatpush.msrb.mxu3 %v8041_v6  ;;  %5576 = vmatmul.f32.vlgmr.msra.gmra.mxu0 %v5396_v50 }
 0xe39   : > { %5768 = vmatmul.f32.vlgmr.msrb.gmra.mxu1 %v5398_v40  ;;  %5725 = vmatpush.msrb.mxu0 %v8059_v39 }
 0xe3a   : > { %5811 = vmatpush.msrb.mxu2 %v8131_v24  ;;  %5838 = vmatpush.msrb.mxu3 %v8062_v3 }
 0xe3b   : > { %5813 = vmatmul.f32.vlgmr.msrb.gmra.mxu2 %v5396_v50  ;;  %5728 = vmatpush.msrb.mxu0 %v8079_v48 }
 0xe3c   : > { %5840 = vmatpush.msrb.mxu3 %v8082_v13 }
 0xe3d   : > { %5842 = vmatmul.f32.vlgmr.msrb.gmra.mxu3 %v5396_v50  ;;  %5731 = vmatpush.msrb.mxu0 %v8095_v30  ;;  %v5906_v50 = vld [vmem:[%s9122_s6 + $0x10] sm:$0xff] (%p1702_p0) }
 0xe3e   :  { %v9025_v49 = vand.u32 (%p1702_p0), 4294901760, %v5906_v50  ;;  %6060 = vmatpush.msra.mxu3 (%p1702_p0), %v9006_v38 }
 0xe3f   : > { %5734 = vmatpush.msrb.mxu0 %v8109_v51 }
 0xe40   : > { %5737 = vmatmul.f32.vlgmr.msrb.gmra.mxu0 %v5397_v47 }
 0xe41   :  { %5928 = vmatpush.msra.mxu0 (%p1702_p0), %v9006_v38 }
 0xea3   : > { %v5463_v1 = vpop.f32.mrf.mxu1 }
 0xeab   : > { %v5402_v14 = vpop.f32.mrf.mxu0  ;;  %v5501_v29 = vpop.f32.mrf.mxu2 }
 0xeac   : > { %v5403_v17 = vadd.f32 %v5402_v14, %v9452_v57  ;;  %v5606_v48 = vpop.f32.mrf.mxu1  ;;  %v5908_v57 = vld [vmem:[%s9122_s6 + $0x20] sm:$0xff] (%p1702_p0) }
 0xead   : > { %v5532_v11 = vpop.f32.mrf.mxu3  ;;  %v9021_v47 = vand.u32 (%p1702_p0), 4294901760, %v5908_v57  ;;  %v5904_v14 = vld [vmem:[%s9122_s6] sm:$0xff] (%p1702_p0) }
 0xeae   : > { %v5464_v39 = vadd.f32 %v5463_v1, %v5403_v17  ;;  %v5961_v17 = vsub.f32 (%p1702_p0), %v5911_v22, %v9006_v38  ;;  %v6157_v22 = vld [vmem:[%s9124_s8] sm:$0xff] (%p1702_p0) }
 0xeb0   : > { %v5502_v5 = vadd.f32 %v5501_v29, %v5464_v39  ;;  %v9042_v29 = vand.u32 (%p1702_p0), 4294901760, %v5905_v16  ;;  %6023 = vmatpush.msra.mxu2 (%p1702_p0), %v5961_v17 }
 0xeb2   : > { %v5533_v53 = vadd.f32 %v5532_v11, %v5502_v5  ;;  %v9045_v5 = vsub.f32 (%p1702_p0), %v5908_v57, %v9021_v47 }
 0xeb4   : > { %v5639_v58 = vpop.f32.mrf.mxu2 }
 0xeb5   : > { %v5577_v24 = vpop.f32.mrf.mxu0  ;;  %v5640_v51 = vadd.f32 %v5639_v58, %v9453_v18  ;;  %v5907_v18 = vld [vmem:[%s9122_s6 + $0x18] sm:$0xff] (%p1702_p0) }
 0xeb6   : > { %v5578_v52 = vadd.f32 %v5577_v24, %v5533_v53  ;;  %v5769_v13 = vpop.f32.mrf.mxu1  ;;  %v9023_v40 = vand.u32 (%p1702_p0), 4294901760, %v5907_v18  ;;  %v9051_v53 = vsub.f32 (%p1702_p0), %v5906_v50, %v9025_v49  ;;  %v5962_v24 = vand.u32 (%p1702_p0), 4294901760, %v5961_v17 }
 0xeb7   : > { %v5700_v9 = vpop.f32.mrf.mxu3 }
 0xeb8   : > { %v5607_v42 = vadd.f32 %v5606_v48, %v5578_v52  ;;  %v5701_v32 = vadd.f32 %v5700_v9, %v5640_v51 }
 0xeba   : > { %v5847_v25 = vrot.slane %v5607_v42, 2  ;;  %v9056_v42 = vand.u32 (%p1702_p0), 4294901760, %v5904_v14 }
 0xebc   : > { %v5849_v12 = vadd.f32 %v5847_v25, %v9426_v19  ;;  %v5980_v25 = vand.u32 (%p1702_p0), 4294901760, %v9045_v5 }
 0xebd   : > { %v5738_v56 = vpop.f32.mrf.mxu0 }
 0xebe   : > { %v6435_v30 = vmul.f32 -1.442695, %v5849_v12  ;;  %v5739_v3 = vadd.f32 %v5738_v56, %v5701_v32  ;;  %v5814_v31 = vpop.f32.mrf.mxu2  ;;  %v9061_v12 = vsub.f32 (%p1702_p0), %v5905_v16, %v9042_v29  ;;  %v5992_v56 = vand.u32 (%p1702_p0), 4294901760, %v9051_v53 }
 0xec0   : > { %6548 = vpow2.f32 %v6435_v30  ;;  %v5770_v54 = vadd.f32 %v5769_v13, %v5739_v3  ;;  %v5843_v19 = vpop.f32.mrf.mxu3  ;;  %v5963_v30 = vsub.f32 (%p1702_p0), %v5961_v17, %v5962_v24  ;;  %v5981_v3 = vsub.f32 (%p1702_p0), %v9045_v5, %v5980_v25 }
 0xec1   :  { %v6003_v13 = vsub.f32 (%p1702_p0), %v5904_v14, %v9056_v42 }
 0xec2   : > { %v5815_v36 = vadd.f32 %v5814_v31, %v5770_v54  ;;  %v5964_v32 = vand.u32 (%p1702_p0), 4294901760, %v5963_v30  ;;  %v5998_v31 = vand.u32 (%p1702_p0), 4294901760, %v9061_v12 }
 0xec4   : > { %v5844_v41 = vadd.f32 %v5843_v19, %v5815_v36  ;;  %5965 = vmatpush.msra.mxu1 (%p1702_p0), %v5964_v32  ;;  %v5993_v19 = vsub.f32 (%p1702_p0), %v9051_v53, %v5992_v56 }
 0xec6   : > { %v6549_v10 = vpop.eup %6548  ;;  %v5870_v26 = vrot.slane %v5844_v41, 2 }
 0xec7   : > { %v5853_v6 = vadd.f32 1.0, %v6549_v10 }
 0xec9   : > { %6550 = vrcp.f32 %v5853_v6  ;;  %v5865_v46 = vand.u32 2147483648, %v5853_v6  ;;  %v5863_v37 = vand.u32 2147483647, %v5853_v6  ;;  %vm5859_vm10 = vweird.f32 %v5853_v6 }
 0xecb   : > { %v5866_v55 = vor.u32 1.1754944e-38, %v5865_v46  ;;  %vm5864_vm8 = vcmp.eq.f32.partialorder %v5863_v37, 8.507059e+37  ;;  %v6004_v46 = vand.u32 (%p1702_p0), 4294901760, %v6003_v13  ;;  %v5999_v37 = vsub.f32 (%p1702_p0), %v9061_v12, %v5998_v31 }
 0xecf   : > { %v6551_v59 = vpop.eup %6550 }
 0xed0   : > { %v5855_v61 = vmul.f32 %v6551_v59, %v5853_v6  ;;  %vm5860_vm9 = vweird.f32 %v6551_v59 }
 0xed1   : > { %vm5861_vm7 = vmor %vm5859_vm10, %vm5860_vm9 }
 0xed2   : > { %v5856_v35 = vsub.f32 1.0, %v5855_v61 }
 0xed4   : > { %v5857_v21 = vmul.f32 %v6551_v59, %v5856_v35  ;;  %v5982_v35 = vand.u32 (%p1702_p0), 4294901760, %v5981_v3  ;;  %v6557_v3 = vld [vmem:[%s9125_s9] ss:$0 sm:$0xff] (%p1702_p0) }
 0xed6   : > { %v5858_v20 = vadd.f32 %v6551_v59, %v5857_v21 }
 0xed8   : > { %v5862_v4 = vsel %vm5861_vm7, %v6551_v59, %v5858_v20 }
 0xed9   : > { %v5867_v44 = vsel %vm5864_vm8, %v5866_v55, %v5862_v4  ;;  %v5994_v55 = vand.u32 (%p1702_p0), 4294901760, %v5993_v19  ;;  %v6005_v4 = vsub.f32 (%p1702_p0), %v6003_v13, %v6004_v46 }
 0xeda   : > { %v5872_v23 = vmul.f32 %v5870_v26, %v5867_v44 }
 0xedc   : > { %v5873_v0 = vadd.f32 %v5872_v23, %v8719_v27 }
 0xede   : > { %6552 = vtanh.f32 %v5873_v0  ;;  %v6006_v0 = vand.u32 (%p1702_p0), 4294901760, %v6005_v4 }
 0xee4   : > { %v6553_v45 = vpop.eup %6552 }
 0xee5   : > { %v5876_v15 = vrot.slane %v6553_v45, 2 }
 0xee7   : > { %v5878_v28 = vsub.f32 %v8943_v43, %v5876_v15  ;;  %v5909_v43 = vld [vmem:[%s9122_s6 + $0x28] sm:$0xff] (%p1702_p0) }
 0xee8   :  { %v9010_v33 = vand.u32 (%p1702_p0), 4294901760, %v5909_v43 }
 0xee9   : > { %v5880_v62 = vrot.slane %v5878_v28, 6  ;;  %v6159_v28 = vld [vmem:[%s9124_s8 + $0x10] sm:$0xff] (%p1702_p0) }
 0xeea   :  { %v9039_v39 = vsub.f32 (%p1702_p0), %v5909_v43, %v9010_v33 }
 0xeeb   : > { %5881 = vrot.lane.b32.xlu2 %v5880_v62, %s6582_s1 }
 0xeec   :  { %v5974_v48 = vand.u32 (%p1702_p0), 4294901760, %v9039_v39 }
 0xeee   :  { %v5975_v51 = vsub.f32 (%p1702_p0), %v9039_v39, %v5974_v48 }
 0xef0   :  { %v5976_v54 = vand.u32 (%p1702_p0), 4294901760, %v5975_v51 }
 0xf45   : > { %v5882_v8 = vpop.permute.xlu2 %5881 }
 0xf46   : > { %v5884_v34 = vmul.f32 %v5882_v8, %v5867_v44  ;;  %v6000_v44 = vand.u32 (%p1702_p0), 4294901760, %v5999_v37  ;;  %v6183_v8 = vand.u32 (%p1702_p0), 4294901760, %v6159_v28 }
 0xf48   : > { %5886 = vrot.lane.b32.xlu0 %v5884_v34, %s6582_s1  ;;  %v6158_v34 = vld [vmem:[%s9124_s8 + $0x8] sm:$0xff] (%p1702_p0) }
 0xfba   : > { %v5887_v60 = vpop.permute.xlu0 %5886 }
 0xfbb   : > { %v5889_v11 = vadd.f32 %v6553_v45, %v5887_v60   ;;  %v6160_v45 = vld [vmem:[%s9124_s8 + $0x18] sm:$0xff] (%p1702_p0) }
 0xfbc   :  { %v6181_v15 = vand.u32 (%p1702_p0), 4294901760, %v6160_v45 }
 0xfbd   : > { %v5891_v7 = vrot.slane %v5889_v11, 6  ;;  %v9048_v11 = vsub.f32 (%p1702_p0), %v5907_v18, %v9023_v40 }
 0xfbe   :  { %1704 = sbr.rel (!%p1702_p0) target bundleno = 648 (0x288), region = 70  ;;  %v6211_v62 = vsub.f32 (%p1702_p0), %v6160_v45, %v6181_v15 }
 0xfbf   : > { %v5893_v27 = vmax.f32 %v8947_v63, %v5891_v7  ;;  %v9008_v63 = vand.u32 (%p1702_p0), 4294901760, %v5910_v2  ;;  %v5986_v9 = vand.u32 (%p1702_p0), 4294901760, %v9048_v11  ;;  %v6217_v7 = vsub.f32 (%p1702_p0), %v6159_v28, %v6183_v8 }
 0xfc0   :  { %v6212_v60 = vand.u32 (%p1702_p0), 4294901760, %v6211_v62 }
 0xfc1   : > { %5897 = vst.msk [vmem:[%s5895_s23] sm:$0x3] %vm5896_vm11, %v5893_v27  ;;  %v9036_v1 = vsub.f32 (%p1702_p0), %v5910_v2, %v9008_v63  ;;  %5930 = vmatpush.msra.mxu0 (%p1702_p0), %v9008_v63  ;;  %6062 = vmatpush.msra.mxu3 (%p1702_p0), %v9008_v63  ;;  %v5987_v59 = vsub.f32 (%p1702_p0), %v9048_v11, %v5986_v9  ;;  %v6218_v43 = vand.u32 (%p1702_p0), 4294901760, %v6217_v7 }
 0xfc2   : > { %5902 = vst.msk [vmem:[%s5900_s24] sm:$0x3] %vm5901_vm12, %v5893_v27  ;;  %v6185_v27 = vand.u32 (%p1702_p0), 4294901760, %v6158_v34  ;;  %v6213_v2 = vsub.f32 (%p1702_p0), %v6211_v62, %v6212_v60 }
 0xfc3   :  { %v5968_v52 = vand.u32 4294901760, %v9036_v1  ;;  %5932 = vmatpush.msra.mxu0 %v9010_v33  ;;  %6026 = vmatpush.msra.mxu2 %v9036_v1  ;;  %v5988_v21 = vand.u32 4294901760, %v5987_v59  ;;  %v6219_v57 = vsub.f32 %v6217_v7, %v6218_v43 }
 0xfc4   :  { %6064 = vmatpush.msra.mxu3 %v9010_v33 }
 0xfc5   :  { %v5969_v58 = vsub.f32 %v9036_v1, %v5968_v52  ;;  %5934 = vmatpush.msra.mxu0 %v9021_v47  ;;  %6029 = vmatpush.msra.mxu2 %v9039_v39  ;;  %v6556_v1 = vld [vmem:[%s9123_s7] ss:$0 sm:$0xff] }
 0xfc6   :  { %6066 = vmatpush.msra.mxu3 %v9021_v47 }
 0xfc7   :  { %v5970_v6 = vand.u32 4294901760, %v5969_v58  ;;  %5936 = vmatpush.msra.mxu0 %v9023_v40  ;;  %6032 = vmatpush.msra.mxu2 %v9045_v5 }
 0xfc8   :  { %6068 = vmatpush.msra.mxu3 %v9023_v40 }
 0xfc9   :  { %v5903_v10 = vld [vmem:[#allocation3] sm:$0xff]  ;;  %5971 = vmatpush.msra.mxu1 %v5970_v6  ;;  %5938 = vmatpush.msra.mxu0 %v9025_v49 }
 0xfca   :  { %v5917_v36 = vsel %vm729_vm2, %v5903_v10, 0  ;;  %6035 = vmatpush.msra.mxu2 %v9048_v11  ;;  %6070 = vmatpush.msra.mxu3 %v9025_v49  ;;  %vm6165_vm2 = vcmask 261120  }
 0xfcb   :  { %v5943_v61 = vand.u32 4294901760, %v5917_v36  ;;  %5977 = vmatpush.msra.mxu1 %v5976_v54  ;;  %5940 = vmatpush.msra.mxu0 %v9042_v29 }
 0xfcc   :  { %6038 = vmatpush.msra.mxu2 %v9051_v53  ;;  %6072 = vmatpush.msra.mxu3 %v9042_v29 }
 0xfcd   :  { %v5944_v41 = vsub.f32 %v5917_v36, %v5943_v61  ;;  %5983 = vmatpush.msra.mxu1 %v5982_v35  ;;  %5942 = vmatpush.msra.mxu0 %v9056_v42 }
 0xfce   :  { %6041 = vmatpush.msra.mxu2 %v9061_v12  ;;  %6074 = vmatpush.msra.mxu3 %v9056_v42 }
 0xfcf   :  { %v5945_v20 = vand.u32 4294901760, %v5944_v41  ;;  %6093 = vmatpush.msrb.mxu0 %v5962_v24  ;;  %5989 = vmatpush.msra.mxu1 %v5988_v21 }
 0xfd0   :  { %6044 = vmatpush.msra.mxu2 %v6003_v13 }
 0xfd1   :  { %v5946_v26 = vsub.f32 %v5944_v41, %v5945_v20  ;;  %6097 = vmatpush.msrb.mxu0 %v5968_v52  ;;  %5995 = vmatpush.msra.mxu1 %v5994_v55 }
 0xfd2   :  { %6047 = vmatmul.f32.vlgmr.msra.gmra.mxu2 %v5944_v41  ;;  %6078 = vmatmul.f32.vlgmr.msra.gmra.mxu3 %v5945_v20 }
 0xfd3   :  { %v5947_v23 = vand.u32 4294901760, %v5946_v26  ;;  %6101 = vmatpush.msrb.mxu0 %v5974_v48  ;;  %6001 = vmatpush.msra.mxu1 %v6000_v44 }
 0xfd4   :  { %6182 = vmatpush.msrb.mxu2 %v6181_v15 }
 0xfd5   :  { %5948 = vmatmul.f32.vlgmr.msra.gmra.mxu0 %v5947_v23  ;;  %6007 = vmatpush.msra.mxu1 %v6006_v0 }
 0xfd6   :  { %6105 = vmatpush.msrb.mxu0 %v5980_v25  ;;  %6009 = vmatmul.f32.vlgmr.msra.gmra.mxu1 %v5943_v61 }
 0xfd7   :  { %6136 = vmatpush.msrb.mxu1 %v9006_v38  ;;  %6184 = vmatpush.msrb.mxu2 %v6183_v8  ;;  %v6223_v38 = vsub.f32 %v6158_v34, %v6185_v27 }
 0xfd8   :  { %6109 = vmatpush.msrb.mxu0 %v5986_v9 }
 0xfd9   :  { %6138 = vmatpush.msrb.mxu1 %v9008_v63  ;;  %v6187_v63 = vand.u32 4294901760, %v6157_v22  ;;  %6186 = vmatpush.msrb.mxu2 %v6185_v27  ;;  %v6224_v18 = vand.u32 4294901760, %v6223_v38 }
 0xfda   :  { %6113 = vmatpush.msrb.mxu0 %v5992_v56 }
 0xfdb   :  { %6140 = vmatpush.msrb.mxu1 %v9010_v33  ;;  %v6214_v33 = vand.u32 4294901760, %v6213_v2  ;;  %v6229_v50 = vsub.f32 %v6157_v22, %v6187_v63  ;;  %6188 = vmatpush.msrb.mxu2 %v6187_v63 }
 0xfdc   :  { %6117 = vmatpush.msrb.mxu0 %v5998_v31 }
 0xfdd   :  { %6142 = vmatpush.msrb.mxu1 %v9021_v47  ;;  %6215 = vmatpush.msrb.mxu3 %v6214_v33  ;;  %v6220_v47 = vand.u32 4294901760, %v6219_v57 }
 0xfde   :  { %6121 = vmatpush.msrb.mxu0 %v6004_v46  ;;  %6253 = vmatpush.msra.mxu2 %v6211_v62 }
 0xfdf   :  { %6123 = vmatmul.f32.vlgmr.msrb.gmra.mxu0 %v5943_v61  ;;  %6144 = vmatpush.msrb.mxu1 %v9023_v40  ;;  %v6225_v40 = vsub.f32 %v6223_v38, %v6224_v18 }
 0xfe0   :  { %6311 = vmatpush.msra.mxu0 %v6212_v60  ;;  %6221 = vmatpush.msrb.mxu3 %v6220_v47 }
 0xfe1   :  { %6146 = vmatpush.msrb.mxu1 %v9025_v49  ;;  %v6230_v49 = vand.u32 4294901760, %v6229_v50  ;;  %v6226_v16 = vand.u32 4294901760, %v6225_v40  ;;  %6256 = vmatpush.msra.mxu2 %v6217_v7 }
 0xfe2   :  { %6315 = vmatpush.msra.mxu0 %v6218_v43 }
 0xfe3   :  { %6148 = vmatpush.msrb.mxu1 %v9042_v29  ;;  %v6231_v14 = vsub.f32 %v6229_v50, %v6230_v49  ;;  %6227 = vmatpush.msrb.mxu3 %v6226_v16 }
 0xfe4   :  { %6319 = vmatpush.msra.mxu0 %v6224_v18  ;;  %6259 = vmatpush.msra.mxu2 %v6223_v38 }
 0xfe5   :  { %6150 = vmatpush.msrb.mxu1 %v9056_v42  ;;  %v6232_v17 = vand.u32 4294901760, %v6231_v14 }
 0xfe6   :  { %6152 = vmatmul.f32.vlgmr.msrb.gmra.mxu1 %v5943_v61  ;;  %6323 = vmatpush.msra.mxu0 %v6230_v49 }
 0xfe7   :  { %6342 = vmatpush.msra.mxu1 %v6181_v15  ;;  %6233 = vmatpush.msrb.mxu3 %v6232_v17 }
 0xfe8   :  { %6262 = vmatpush.msra.mxu2 %v6229_v50 }
 0xfe9   :  { %6344 = vmatpush.msra.mxu1 %v6183_v8  ;;  %6282 = vmatpush.msra.mxu3 %v6181_v15 }
 0xfeb   :  { %6346 = vmatpush.msra.mxu1 %v6185_v27  ;;  %6284 = vmatpush.msra.mxu3 %v6183_v8 }
 0xfed   :  { %6348 = vmatpush.msra.mxu1 %v6187_v63  ;;  %6286 = vmatpush.msra.mxu3 %v6185_v27 }
 0xfef   :  { %6288 = vmatpush.msra.mxu3 %v6187_v63 }
0x1052   :  { %v5949_v39 = vpop.f32.mrf.mxu0 }
0x1053   :  { %v5950_v29 = vadd.f32 %v6556_v1, %v5949_v39  ;;  %v6010_v5 = vpop.f32.mrf.mxu1 }
0x1055   :  { %v6048_v11 = vpop.f32.mrf.mxu2  ;;  %v6011_v53 = vadd.f32 %v6010_v5, %v5950_v29  ;;  %v6079_v52 = vpop.f32.mrf.mxu3 }
0x1057   :  { %v6049_v24 = vadd.f32 %v6048_v11, %v6011_v53 }
0x1059   :  { %v6080_v48 = vadd.f32 %v6079_v52, %v6049_v24 }
0x105c   :  { %v6124_v42 = vpop.f32.mrf.mxu0 }
0x105d   :  { %v6125_v25 = vadd.f32 %v6124_v42, %v6080_v48 }
0x1063   :  { %v6153_v12 = vpop.f32.mrf.mxu1 }
0x1064   :  { %v6154_v30 = vadd.f32 %v6153_v12, %v6125_v25 }
0x1066   :  { %v6156_v58 = vmax.f32 %v6154_v30, 0.0 }
0x1068   :  { %v6167_v51 = vsel %vm6165_vm2, %v6156_v58, 0 }
0x1069   :  { %v6189_v9 = vand.u32 4294901760, %v6167_v51 }
0x106b   :  { %v6190_v56 = vsub.f32 %v6167_v51, %v6189_v9  ;;  %6235 = vmatmul.f32.vlgmr.msrb.gmra.mxu3 %v6189_v9  ;;  %6325 = vmatmul.f32.vlgmr.msra.gmra.mxu0 %v6189_v9 }
0x106c   :  { %6350 = vmatmul.f32.vlgmr.msra.gmra.mxu1 %v6189_v9 }
0x106d   :  { %v6191_v10 = vand.u32 4294901760, %v6190_v56 }
0x106f   :  { %v6192_v32 = vsub.f32 %v6190_v56, %v6191_v10 }
0x1071   :  { %v6193_v6 = vand.u32 4294901760, %v6192_v32 }
0x1073   :  { %6194 = vmatmul.f32.vlgmr.msrb.gmra.mxu2 %v6193_v6  ;;  %6292 = vmatmul.f32.vlgmr.msra.gmra.mxu3 %v6191_v10 }
0x107b   :  { %6265 = vmatmul.f32.vlgmr.msra.gmra.mxu2 %v6190_v56 }
0x10e8   :  { %v6326_v46 = vpop.f32.mrf.mxu0 }
0x10e9   :  { %v6351_v21 = vpop.f32.mrf.mxu1 }
0x10ee   :  { %v6236_v13 = vpop.f32.mrf.mxu3 }
0x10f6   :  { %v6195_v54 = vpop.f32.mrf.mxu2  ;;  %v6293_v35 = vpop.f32.mrf.mxu3 }
0x10f7   :  { %v6196_v59 = vadd.f32 %v6557_v3, %v6195_v54 }
0x10f9   :  { %v6237_v31 = vadd.f32 %v6236_v13, %v6196_v59 }
0x10fe   :  { %v6266_v36 = vpop.f32.mrf.mxu2 }
0x10ff   :  { %v6267_v61 = vadd.f32 %v6266_v36, %v6237_v31 }
0x1101   :  { %v6294_v19 = vadd.f32 %v6293_v35, %v6267_v61 }
0x1103   :  { %v6327_v41 = vadd.f32 %v6326_v46, %v6294_v19 }
0x1105   :  { %v6352_v37 = vadd.f32 %v6351_v21, %v6327_v41 }
0x1107   :  { %v6438_v20 = vmul.f32 -1.442695, %v6352_v37 }
0x1109   :  { %6558 = vpow2.f32 %v6438_v20 }
0x110f   :  { %v6559_v55 = vpop.eup %6558 }
0x1110   :  { %v6357_v4 = vadd.f32 1.0, %v6559_v55 }
0x1112   :  { %6560 = vrcp.f32 %v6357_v4  ;;  %v6369_v0 = vand.u32 2147483648, %v6357_v4  ;;  %v6367_v15 = vand.u32 2147483647, %v6357_v4  ;;  %vm6363_vm14 = vweird.f32 %v6357_v4 }
0x1114   :  { %v6370_v62 = vor.u32 1.1754944e-38, %v6369_v0  ;;  %vm6368_vm1 = vcmp.eq.f32.partialorder %v6367_v15, 8.507059e+37 }
0x1118   :  { %v6561_v26 = vpop.eup %6560 }
0x1119   :  { %v6359_v44 = vmul.f32 %v6561_v26, %v6357_v4  ;;  %vm6364_vm13 = vweird.f32 %v6561_v26 }
0x111a   :  { %vm6365_vm15 = vmor %vm6363_vm14, %vm6364_vm13 }
0x111b   :  { %v6360_v23 = vsub.f32 1.0, %v6359_v44 }
0x111d   :  { %v6361_v45 = vmul.f32 %v6561_v26, %v6360_v23 }
0x111f   :  { %v6362_v28 = vadd.f32 %v6561_v26, %v6361_v45 }
0x1121   :  { %v6366_v8 = vsel %vm6365_vm15, %v6561_v26, %v6362_v28 }
0x1122   :  { %v6371_v34 = vsel %vm6368_vm1, %v6370_v62, %v6366_v8 }
0x1123   :  { %6374 = vst.msk [vmem:[%s9126_s10] sm:$0xff] %vm6373_vm0, %v6371_v34 }

</bundles_post_ra>
